<compile_context>
chip_gen: v5e
topology: v5e:2x2
jax: 0.10.0
libtpu: 0.0.40
codegen_flags: <defaults>
</compile_context>

<pallas_src>
import functools

import jax
import jax.numpy as jnp
from jax.experimental import pallas as pl
from jax.experimental.pallas import tpu as pltpu

LANE = 128
SUBLANE = 8
FUSED_MAX_NODES = 2048   # bf16 L_hat <= 8 MiB -> VMEM-resident on v5e/v6e/v7x
STREAM_TM = 512          # streamed L_hat tile rows (upper bound)
STREAM_TK = 1024         # streamed L_hat tile cols (upper bound)


def _round_up(x, m):
    return ((x + m - 1) // m) * m


def _pick_tile(n_pad, target, quantum):
    """Largest multiple of `quantum` that divides n_pad and is <= target."""
    t = max(quantum, min(target, n_pad))
    t = (t // quantum) * quantum
    while n_pad % t:
        t -= quantum
    return t


# ----------------------------------------------------------------------------
# Streaming path: one pallas_call per ChebConv layer, L_hat tiled over HBM.
# ----------------------------------------------------------------------------
def _cheb_layer_kernel(lhat_ref, x_ref, w0_ref, w1_ref, b_ref, out_ref, tx1_ref,
                       *, tm, tk, activation):
    i = pl.program_id(0)
    k = pl.program_id(1)

    @pl.when(k == 0)
    def _init():
        tx1_ref[...] = jnp.zeros_like(tx1_ref)

    # Propagation: Tx_1 row tile += L_hat tile @ X column tile (bf16 MXU, f32 acc).
    # X is VMEM-resident (constant block index); slice the k-th column tile here.
    col0 = pl.multiple_of(k * tk, tk)
    tx1_ref[...] += jnp.dot(lhat_ref[...], x_ref[pl.ds(col0, tk), :],
                            preferred_element_type=jnp.float32)

    @pl.when(k == pl.num_programs(1) - 1)
    def _finalize():
        row0 = pl.multiple_of(i * tm, tm)
        x_rows = x_ref[pl.ds(row0, tm), :].astype(jnp.float32)      # Tx_0 branch
        # Tiny transform matmuls kept in f32 (negligible FLOPs, tighter numerics).
        y = (jnp.dot(x_rows, w0_ref[...], preferred_element_type=jnp.float32)
             + jnp.dot(tx1_ref[...], w1_ref[...], preferred_element_type=jnp.float32)
             + b_ref[...])
        if activation == "relu":
            out_ref[...] = jnp.maximum(y, 0.0).astype(out_ref.dtype)
        else:  # log_softmax over the class axis (dim=1)
            m = jnp.max(y, axis=1, keepdims=True)
            lse = jnp.log(jnp.sum(jnp.exp(y - m), axis=1, keepdims=True)) + m
            out_ref[...] = (y - lse).astype(out_ref.dtype)


def _cheb_conv_layer(lhat, x, w0, w1, b, *, activation, tm, tk, out_dtype):
    n_pad = lhat.shape[0]
    fin = x.shape[1]
    fout = w0.shape[1]
    grid = (n_pad // tm, n_pad // tk)

    flops = 2 * n_pad * n_pad * fin + 4 * n_pad * fin * fout
    bytes_accessed = (n_pad * n_pad * 2              # L_hat streamed once
                      + n_pad * fin * 2              # X resident, read once
                      + 2 * fin * fout * 4 + fout * 4
                      + n_pad * fout * jnp.dtype(out_dtype).itemsize)
    transcendentals = n_pad * fout if activation == "log_softmax" else 0

    kernel = functools.partial(_cheb_layer_kernel, tm=tm, tk=tk,
                               activation=activation)
    return pl.pallas_call(
        kernel,
        out_shape=jax.ShapeDtypeStruct((n_pad, fout), out_dtype),
        grid_spec=pltpu.PrefetchScalarGridSpec(
            num_scalar_prefetch=0,
            grid=grid,
            in_specs=[
                # TODO(synk): sweep pipeline_mode=pl.Buffered(3) on this spec on
                # v7x once the 3.2 TB/s HBM exposes DMA issue overhead.
                pl.BlockSpec((tm, tk), lambda i, k: (i, k)),      # L_hat (streamed)
                pl.BlockSpec((n_pad, fin), lambda i, k: (0, 0)),  # X/h, VMEM-resident
                pl.BlockSpec((fin, fout), lambda i, k: (0, 0)),   # W0
                pl.BlockSpec((fin, fout), lambda i, k: (0, 0)),   # W1
                pl.BlockSpec((1, fout), lambda i, k: (0, 0)),     # bias
            ],
            out_specs=pl.BlockSpec((tm, fout), lambda i, k: (i, 0)),
            scratch_shapes=[pltpu.VMEM((tm, fin), jnp.float32)],  # lane-aligned Tx_1
        ),
        compiler_params=pltpu.CompilerParams(
            dimension_semantics=("parallel", "arbitrary")),
        cost_estimate=pl.CostEstimate(flops=flops,
                                      transcendentals=transcendentals,
                                      bytes_accessed=bytes_accessed),
    )(lhat, x, w0, w1, b)


# ----------------------------------------------------------------------------
# Fused path: both layers in one pallas_call, L_hat resident in VMEM.
# ----------------------------------------------------------------------------
def _chebnet_fused_kernel(lhat_ref, x_ref, w10_ref, w11_ref, b1_ref,
                          w20_ref, w21_ref, b2_ref, out_ref):
    lhat = lhat_ref[...]                                   # bf16, VMEM-resident
    x = x_ref[...]                                         # bf16
    # Layer 1: relu(X @ W0 + (L_hat @ X) @ W1 + b1)
    tx1 = jnp.dot(lhat, x, preferred_element_type=jnp.float32)
    h = jnp.maximum(
        jnp.dot(x.astype(jnp.float32), w10_ref[...],
                preferred_element_type=jnp.float32)
        + jnp.dot(tx1, w11_ref[...], preferred_element_type=jnp.float32)
        + b1_ref[...], 0.0)
    # Dropout: module evaluated in inference mode (training=False) -> identity.
    # TODO(synk): training-mode dropout would need pltpu.prng_seed/prng_random_bits.
    # Layer 2 reuses the SAME VMEM-resident L_hat (no second HBM read of the N^2 term).
    tx1_2 = jnp.dot(lhat, h.astype(jnp.bfloat16), preferred_element_type=jnp.float32)
    y = (jnp.dot(h, w20_ref[...], preferred_element_type=jnp.float32)
         + jnp.dot(tx1_2, w21_ref[...], preferred_element_type=jnp.float32)
         + b2_ref[...])
    m = jnp.max(y, axis=1, keepdims=True)
    lse = jnp.log(jnp.sum(jnp.exp(y - m), axis=1, keepdims=True)) + m
    out_ref[...] = (y - lse).astype(out_ref.dtype)


def _chebnet_fused(lhat, x, w10, w11, b1, w20, w21, b2, *, out_dtype):
    n_pad = lhat.shape[0]
    fin = x.shape[1]
    hid = w10.shape[1]
    ncls = w20.shape[1]

    flops = (2 * n_pad * n_pad * fin + 4 * n_pad * fin * hid
             + 2 * n_pad * n_pad * hid + 4 * n_pad * hid * ncls)
    bytes_accessed = (n_pad * n_pad * 2 + n_pad * fin * 2
                      + 2 * fin * hid * 4 + 2 * hid * ncls * 4 + (hid + ncls) * 4
                      + n_pad * ncls * jnp.dtype(out_dtype).itemsize)
    transcendentals = n_pad * ncls

    def full(shape):
        return pl.BlockSpec(shape, lambda i: (0, 0))

    return pl.pallas_call(
        _chebnet_fused_kernel,
        out_shape=jax.ShapeDtypeStruct((n_pad, ncls), out_dtype),
        grid_spec=pltpu.PrefetchScalarGridSpec(
            num_scalar_prefetch=0,
            grid=(1,),
            in_specs=[
                full((n_pad, n_pad)),   # L_hat, resident across both layers
                full((n_pad, fin)),     # X
                full((fin, hid)), full((fin, hid)), full((1, hid)),
                full((hid, ncls)), full((hid, ncls)), full((1, ncls)),
            ],
            out_specs=full((n_pad, ncls)),
        ),
        compiler_params=pltpu.CompilerParams(
            dimension_semantics=("arbitrary",),
            vmem_limit_bytes=48 * 1024 * 1024),
        cost_estimate=pl.CostEstimate(flops=flops,
                                      transcendentals=transcendentals,
                                      bytes_accessed=bytes_accessed),
    )(lhat, x, w10, w11, b1, w20, w21, b2)


# ----------------------------------------------------------------------------
# Top-level forward.
# ----------------------------------------------------------------------------
def chebnet_forward(lhat, x, w10, w11, b1, w20, w21, b2, *, force_streaming=False):
    n = x.shape[0]
    # Pad nodes only to a multiple of 128 (lane width), NOT to the streaming tile.
    n_pad = _round_up(n, LANE)

    # Zero-pad: zero L_hat rows AND columns keep real rows exact (padded h rows
    # may be relu(b1) != 0 but always multiply zero L_hat columns).
    lhat_p = jnp.zeros((n_pad, n_pad), jnp.bfloat16).at[:n, :n].set(
        lhat.astype(jnp.bfloat16))
    x_p = jnp.zeros((n_pad, x.shape[1]), jnp.bfloat16).at[:n].set(
        x.astype(jnp.bfloat16))

    w10f, w11f = w10.astype(jnp.float32), w11.astype(jnp.float32)
    w20f, w21f = w20.astype(jnp.float32), w21.astype(jnp.float32)
    b1f = b1.astype(jnp.float32).reshape(1, -1)
    b2f = b2.astype(jnp.float32).reshape(1, -1)

    if (not force_streaming) and n_pad <= FUSED_MAX_NODES:
        out = _chebnet_fused(lhat_p, x_p, w10f, w11f, b1f, w20f, w21f, b2f,
                             out_dtype=jnp.float32)
        return out[:n]

    # Streaming path: L_hat tiled from HBM, one kernel per layer.
    # >= 2 row tiles keeps both v7x TensorCores busy on the "parallel" axis.
    tm = _pick_tile(n_pad, min(STREAM_TM, n_pad // 2), SUBLANE)
    tk = _pick_tile(n_pad, STREAM_TK, LANE)

    h = _cheb_conv_layer(lhat_p, x_p, w10f, w11f, b1f,
                         activation="relu", tm=tm, tk=tk, out_dtype=jnp.bfloat16)
    # Dropout: inference mode -> identity.
    out = _cheb_conv_layer(lhat_p, h, w20f, w21f, b2f,
                           activation="log_softmax", tm=tm, tk=tk,
                           out_dtype=jnp.float32)
    return out[:n]


# ----------------------------------------------------------------------------
# Helpers, reference, demo.
# ----------------------------------------------------------------------------
def build_scaled_laplacian(edge_index, num_nodes):
    """Dense L_hat = -D^{-1/2} A D^{-1/2} (PyG ChebConv, sym norm, lambda_max=2)."""
    src, dst = edge_index
    adj = jnp.zeros((num_nodes, num_nodes), jnp.float32)
    adj = adj.at[src, dst].set(1.0)
    deg = jnp.sum(adj, axis=1)
    dinv = jnp.where(deg > 0, 1.0 / jnp.sqrt(deg), 0.0)
    # diagonal of the scaled Laplacian is exactly 0 for lambda_max=2
    return -(dinv[:, None] * adj * dinv[None, :])


def reference_forward(lhat, x, w10, w11, b1, w20, w21, b2):
    h = jnp.maximum(x @ w10 + (lhat @ x) @ w11 + b1, 0.0)
    logits = h @ w20 + (lhat @ h) @ w21 + b2
    return jax.nn.log_softmax(logits, axis=1)


def glorot(key, shape):
    fan_in, fan_out = shape
    limit = jnp.sqrt(6.0 / (fan_in + fan_out))
    return jax.random.uniform(key, shape, jnp.float32, -limit, limit)


if __name__ == "__main__":
    key = jax.random.PRNGKey(0)
    # nodes, num_features, hidden=32 (fixed by the module), num_classes
    N, F, H, C = 300, 16, 32, 6

    k_x, k_w10, k_w11, k_w20, k_w21 = jax.random.split(key, 5)

    # deterministic node features
    x = jax.random.normal(k_x, (N, F), jnp.float32)

    # deterministic small graph: ring with both directions
    src = jnp.arange(N, dtype=jnp.int32)
    dst = (src + 1) % N
    edge_index = jnp.stack([jnp.concatenate([src, dst]),
                            jnp.concatenate([dst, src])], axis=0)
    lhat = build_scaled_laplacian(edge_index, N)

    # ChebConv(F, 32, K=2): two weight matrices [F, 32] + bias [32]
    w10 = glorot(k_w10, (F, H))
    w11 = glorot(k_w11, (F, H))
    b1 = jnp.zeros((1, H), jnp.float32)
    # ChebConv(32, C, K=2): two weight matrices [32, C] + bias [C]
    w20 = glorot(k_w20, (H, C))
    w21 = glorot(k_w21, (H, C))
    b2 = jnp.zeros((1, C), jnp.float32)

    ref = reference_forward(lhat, x, w10, w11, b1, w20, w21, b2)

    # Fused (VMEM-resident L_hat) path — the one small graphs take by default.
    fwd_fused = jax.jit(chebnet_forward)
    out_fused = jax.block_until_ready(
        fwd_fused(lhat, x, w10, w11, b1, w20, w21, b2))
    assert out_fused.shape == (N, C)
    assert jnp.allclose(jnp.sum(jnp.exp(out_fused), axis=1), 1.0, atol=1e-4)
    assert float(jnp.max(jnp.abs(out_fused - ref))) < 0.1

    # Streaming (tiled L_hat) path — exercised here too so both paths are tested.
    fwd_stream = jax.jit(functools.partial(chebnet_forward, force_streaming=True))
    out_stream = jax.block_until_ready(
        fwd_stream(lhat, x, w10, w11, b1, w20, w21, b2))
    assert out_stream.shape == (N, C)
    assert jnp.allclose(jnp.sum(jnp.exp(out_stream), axis=1), 1.0, atol=1e-4)
    assert float(jnp.max(jnp.abs(out_stream - ref))) < 0.1

    print("KERNEL_OK")
</pallas_src>

<mosaic_0001>
module attributes {stable_mosaic.version = 11 : i64} {
  func.func @_chebnet_fused_kernel(%arg0: i32, %arg1: memref<384x384xbf16, #tpu.memory_space<vmem>>, %arg2: memref<384x16xbf16, #tpu.memory_space<vmem>>, %arg3: memref<16x32xf32, #tpu.memory_space<vmem>>, %arg4: memref<16x32xf32, #tpu.memory_space<vmem>>, %arg5: memref<1x32xf32, #tpu.memory_space<vmem>>, %arg6: memref<32x6xf32, #tpu.memory_space<vmem>>, %arg7: memref<32x6xf32, #tpu.memory_space<vmem>>, %arg8: memref<1x6xf32, #tpu.memory_space<vmem>>, %arg9: memref<384x6xf32, #tpu.memory_space<vmem>>) attributes {dimension_semantics = [#tpu.dimension_semantics<arbitrary>], iteration_bounds = array<i64: 1>, scalar_prefetch = 0 : i64, scratch_operands = 0 : i64, tpu.core_type = #tpu.core_type<tc>, window_params = [{pipeline_mode = #tpu.pipeline_mode<synchronous>, transform_indices = @transform_0, window_bounds = array<i64: 384, 384>}, {pipeline_mode = #tpu.pipeline_mode<synchronous>, transform_indices = @transform_1, window_bounds = array<i64: 384, 16>}, {pipeline_mode = #tpu.pipeline_mode<synchronous>, transform_indices = @transform_2, window_bounds = array<i64: 16, 32>}, {pipeline_mode = #tpu.pipeline_mode<synchronous>, transform_indices = @transform_3, window_bounds = array<i64: 16, 32>}, {pipeline_mode = #tpu.pipeline_mode<synchronous>, transform_indices = @transform_4, window_bounds = array<i64: 1, 32>}, {pipeline_mode = #tpu.pipeline_mode<synchronous>, transform_indices = @transform_5, window_bounds = array<i64: 32, 6>}, {pipeline_mode = #tpu.pipeline_mode<synchronous>, transform_indices = @transform_6, window_bounds = array<i64: 32, 6>}, {pipeline_mode = #tpu.pipeline_mode<synchronous>, transform_indices = @transform_7, window_bounds = array<i64: 1, 6>}, {pipeline_mode = #tpu.pipeline_mode<synchronous>, transform_indices = @transform_8, window_bounds = array<i64: 384, 6>}]} {
    %c0 = arith.constant 0 : index
    %c0_0 = arith.constant 0 : index
    %0 = vector.load %arg1[%c0, %c0_0] : memref<384x384xbf16, #tpu.memory_space<vmem>>, vector<384x384xbf16>
    %c0_1 = arith.constant 0 : index
    %c0_2 = arith.constant 0 : index
    %1 = vector.load %arg2[%c0_1, %c0_2] : memref<384x16xbf16, #tpu.memory_space<vmem>>, vector<384x16xbf16>
    %cst = arith.constant dense<0.000000e+00> : vector<384x16xf32>
    %2 = tpu.matmul %0, %1, %cst {dimension_numbers = #tpu.dot_dimension_numbers<[1], [0], [0], [1], [0, 0, 1, 1], [], []>} : vector<384x384xbf16>, vector<384x16xbf16>, vector<384x16xf32> -> vector<384x16xf32>
    %3 = arith.extf %1 : vector<384x16xbf16> to vector<384x16xf32>
    %c0_3 = arith.constant 0 : index
    %c0_4 = arith.constant 0 : index
    %4 = vector.load %arg3[%c0_3, %c0_4] : memref<16x32xf32, #tpu.memory_space<vmem>>, vector<16x32xf32>
    %cst_5 = arith.constant dense<0.000000e+00> : vector<384x32xf32>
    %5 = tpu.matmul %3, %4, %cst_5 {dimension_numbers = #tpu.dot_dimension_numbers<[1], [0], [0], [1], [0, 0, 1, 1], [], []>} : vector<384x16xf32>, vector<16x32xf32>, vector<384x32xf32> -> vector<384x32xf32>
    %c0_6 = arith.constant 0 : index
    %c0_7 = arith.constant 0 : index
    %6 = vector.load %arg4[%c0_6, %c0_7] : memref<16x32xf32, #tpu.memory_space<vmem>>, vector<16x32xf32>
    %cst_8 = arith.constant dense<0.000000e+00> : vector<384x32xf32>
    %7 = tpu.matmul %2, %6, %cst_8 {dimension_numbers = #tpu.dot_dimension_numbers<[1], [0], [0], [1], [0, 0, 1, 1], [], []>} : vector<384x16xf32>, vector<16x32xf32>, vector<384x32xf32> -> vector<384x32xf32>
    %8 = arith.addf %5, %7 : vector<384x32xf32>
    %c0_9 = arith.constant 0 : index
    %c0_10 = arith.constant 0 : index
    %9 = vector.load %arg5[%c0_9, %c0_10] : memref<1x32xf32, #tpu.memory_space<vmem>>, vector<1x32xf32>
    %10 = vector.broadcast %9 : vector<1x32xf32> to vector<384x32xf32>
    %11 = arith.addf %8, %10 : vector<384x32xf32>
    %cst_11 = arith.constant 0.000000e+00 : f32
    %12 = vector.broadcast %cst_11 : f32 to vector<384x32xf32>
    %13 = arith.maximumf %11, %12 : vector<384x32xf32>
    %14 = arith.truncf %13 : vector<384x32xf32> to vector<384x32xbf16>
    %cst_12 = arith.constant dense<0.000000e+00> : vector<384x32xf32>
    %15 = tpu.matmul %0, %14, %cst_12 {dimension_numbers = #tpu.dot_dimension_numbers<[1], [0], [0], [1], [0, 0, 1, 1], [], []>} : vector<384x384xbf16>, vector<384x32xbf16>, vector<384x32xf32> -> vector<384x32xf32>
    %c0_13 = arith.constant 0 : index
    %c0_14 = arith.constant 0 : index
    %16 = vector.load %arg6[%c0_13, %c0_14] : memref<32x6xf32, #tpu.memory_space<vmem>>, vector<32x6xf32>
    %cst_15 = arith.constant dense<0.000000e+00> : vector<384x6xf32>
    %17 = tpu.matmul %13, %16, %cst_15 {dimension_numbers = #tpu.dot_dimension_numbers<[1], [0], [0], [1], [0, 0, 1, 1], [], []>} : vector<384x32xf32>, vector<32x6xf32>, vector<384x6xf32> -> vector<384x6xf32>
    %c0_16 = arith.constant 0 : index
    %c0_17 = arith.constant 0 : index
    %18 = vector.load %arg7[%c0_16, %c0_17] : memref<32x6xf32, #tpu.memory_space<vmem>>, vector<32x6xf32>
    %cst_18 = arith.constant dense<0.000000e+00> : vector<384x6xf32>
    %19 = tpu.matmul %15, %18, %cst_18 {dimension_numbers = #tpu.dot_dimension_numbers<[1], [0], [0], [1], [0, 0, 1, 1], [], []>} : vector<384x32xf32>, vector<32x6xf32>, vector<384x6xf32> -> vector<384x6xf32>
    %20 = arith.addf %17, %19 : vector<384x6xf32>
    %c0_19 = arith.constant 0 : index
    %c0_20 = arith.constant 0 : index
    %21 = vector.load %arg8[%c0_19, %c0_20] : memref<1x6xf32, #tpu.memory_space<vmem>>, vector<1x6xf32>
    %22 = vector.broadcast %21 : vector<1x6xf32> to vector<384x6xf32>
    %23 = arith.addf %20, %22 : vector<384x6xf32>
    %cst_21 = arith.constant dense<0xFF800000> : vector<384xf32>
    %24 = vector.multi_reduction <maximumf>, %23, %cst_21 [1] : vector<384x6xf32> to vector<384xf32>
    %25 = vector.shape_cast %24 : vector<384xf32> to vector<384x1xf32>
    %26 = vector.broadcast %25 : vector<384x1xf32> to vector<384x6xf32>
    %27 = arith.subf %23, %26 : vector<384x6xf32>
    %28 = math.exp %27 : vector<384x6xf32>
    %cst_22 = arith.constant dense<0.000000e+00> : vector<384xf32>
    %29 = vector.multi_reduction <add>, %28, %cst_22 [1] : vector<384x6xf32> to vector<384xf32>
    %30 = vector.shape_cast %29 : vector<384xf32> to vector<384x1xf32>
    %31 = math.log %30 : vector<384x1xf32>
    %32 = arith.addf %31, %25 : vector<384x1xf32>
    %33 = vector.broadcast %32 : vector<384x1xf32> to vector<384x6xf32>
    %34 = arith.subf %23, %33 : vector<384x6xf32>
    %c0_23 = arith.constant 0 : index
    %c0_24 = arith.constant 0 : index
    %35 = vector.load %arg9[%c0_23, %c0_24] : memref<384x6xf32, #tpu.memory_space<vmem>>, vector<384x6xf32>
    tpu.vector_store %arg9[%c0_23, %c0_24], %34 {strides = array<i32>} : memref<384x6xf32, #tpu.memory_space<vmem>>, vector<384x6xf32>,
    return
  }
  func.func @transform_0(%arg0: i32) -> (i32, i32) {
    %c0_i32 = arith.constant 0 : i32
    %c0_i32_0 = arith.constant 0 : i32
    %c0_i32_1 = arith.constant 0 : i32
    return %c0_i32, %c0_i32_0 : i32, i32
  }
  func.func @transform_1(%arg0: i32) -> (i32, i32) {
    %c0_i32 = arith.constant 0 : i32
    %c0_i32_0 = arith.constant 0 : i32
    %c0_i32_1 = arith.constant 0 : i32
    return %c0_i32, %c0_i32_0 : i32, i32
  }
  func.func @transform_2(%arg0: i32) -> (i32, i32) {
    %c0_i32 = arith.constant 0 : i32
    %c0_i32_0 = arith.constant 0 : i32
    %c0_i32_1 = arith.constant 0 : i32
    return %c0_i32, %c0_i32_0 : i32, i32
  }
  func.func @transform_3(%arg0: i32) -> (i32, i32) {
    %c0_i32 = arith.constant 0 : i32
    %c0_i32_0 = arith.constant 0 : i32
    %c0_i32_1 = arith.constant 0 : i32
    return %c0_i32, %c0_i32_0 : i32, i32
  }
  func.func @transform_4(%arg0: i32) -> (i32, i32) {
    %c0_i32 = arith.constant 0 : i32
    %c0_i32_0 = arith.constant 0 : i32
    %c0_i32_1 = arith.constant 0 : i32
    return %c0_i32, %c0_i32_0 : i32, i32
  }
  func.func @transform_5(%arg0: i32) -> (i32, i32) {
    %c0_i32 = arith.constant 0 : i32
    %c0_i32_0 = arith.constant 0 : i32
    %c0_i32_1 = arith.constant 0 : i32
    return %c0_i32, %c0_i32_0 : i32, i32
  }
  func.func @transform_6(%arg0: i32) -> (i32, i32) {
    %c0_i32 = arith.constant 0 : i32
    %c0_i32_0 = arith.constant 0 : i32
    %c0_i32_1 = arith.constant 0 : i32
    return %c0_i32, %c0_i32_0 : i32, i32
  }
  func.func @transform_7(%arg0: i32) -> (i32, i32) {
    %c0_i32 = arith.constant 0 : i32
    %c0_i32_0 = arith.constant 0 : i32
    %c0_i32_1 = arith.constant 0 : i32
    return %c0_i32, %c0_i32_0 : i32, i32
  }
  func.func @transform_8(%arg0: i32) -> (i32, i32) {
    %c0_i32 = arith.constant 0 : i32
    %c0_i32_0 = arith.constant 0 : i32
    %c0_i32_1 = arith.constant 0 : i32
    return %c0_i32, %c0_i32_0 : i32, i32
  }
}

</mosaic_0001>

<bundles_post_ra>
// kernel: chebnet_forward.1
= control target key start
LH: loop header
LB: loop body
LE: loop exit
PB: predicated region body
PF: predicated region fallthrough
CT: control target
= control target key end

     0   :  { %vm1140_vm0 = vcmask 130048   ;;  %vm2270_vm1 = vcmask 261120   ;;  %vm2933_vm2 = vcmask 48128   ;;  %s7484_s1 = inlined_call_operand.vmem [shape: bf16[384,16], index: 1, kind: input, shape index: {}]   ;;  %s7485_s0 = inlined_call_operand.vmem [shape: bf16[384,384], index: 0, kind: input, shape index: {}]   ;;  %s7486_s3 = inlined_call_operand.vmem [shape: f32[16,32], index: 3, kind: input, shape index: {}]   ;;  %s7487_s2 = inlined_call_operand.vmem [shape: f32[16,32], index: 2, kind: input, shape index: {}]   ;;  %s7488_s4 = inlined_call_operand.vmem [shape: f32[1,32], index: 4, kind: input, shape index: {}]   ;;  %s7489_s6 = inlined_call_operand.vmem [shape: f32[32,6], index: 6, kind: input, shape index: {}]   ;;  %s7490_s5 = inlined_call_operand.vmem [shape: f32[32,6], index: 5, kind: input, shape index: {}]   ;;  %s7491_s7 = inlined_call_operand.vmem [shape: f32[1,6], index: 7, kind: input, shape index: {}]   ;;  %s7492_s8 = inlined_call_operand.vmem [shape: f32[384,6], index: 8, kind: output, shape index: {}]  }
   0x1   :  { %v4265_v0 = vld [vmem:[%s7484_s1 + $0x38] sm:$0xff]  ;;  %v4264_v2 = vld [vmem:[%s7484_s1 + $0x30] sm:$0xff]  ;;  %v4263_v4 = vld [vmem:[%s7484_s1 + $0x28] sm:$0xff] }
   0x2   :  { %v4281_v1 = vld [vmem:[%s7484_s1 + $0xb8] sm:$0xff]  ;;  %4282 = vmatpush.bf16.msra.mxu1 %v4265_v0  ;;  %v4280_v3 = vld [vmem:[%s7484_s1 + $0xb0] sm:$0xff]  ;;  %701 = vmatpush.bf16.msra.mxu0 %v4265_v0  ;;  %v4279_v5 = vld [vmem:[%s7484_s1 + $0xa8] sm:$0xff] }
   0x3   :  { %959 = vmatpush.bf16.msra.mxu2 %v4281_v1  ;;  %v4262_v6 = vld [vmem:[%s7484_s1 + $0x20] sm:$0xff]  ;;  %v4261_v8 = vld [vmem:[%s7484_s1 + $0x18] sm:$0xff]  ;;  %v4260_v10 = vld [vmem:[%s7484_s1 + $0x10] sm:$0xff] }
   0x4   :  { %v4278_v7 = vld [vmem:[%s7484_s1 + $0xa0] sm:$0xff]  ;;  %v4277_v9 = vld [vmem:[%s7484_s1 + $0x98] sm:$0xff]  ;;  %v4276_v11 = vld [vmem:[%s7484_s1 + $0x90] sm:$0xff] }
   0x5   :  { %v4259_v12 = vld [vmem:[%s7484_s1 + $0x8] sm:$0xff]  ;;  %v4258_v14 = vld [vmem:[%s7484_s1] sm:$0xff]  ;;  %v4188_v19 = vld [vmem:[%s7485_s0 + $0x10] sm:$0xf0] }
   0x6   :  { %4283 = vmatpush.bf16.msra.mxu1 %v4264_v2  ;;  %702 = vmatpush.bf16.msra.mxu0 %v4264_v2  ;;  %v4275_v13 = vld [vmem:[%s7484_s1 + $0x88] sm:$0xff]  ;;  %v4274_v15 = vld [vmem:[%s7484_s1 + $0x80] sm:$0xff]  ;;  %v3768_v22 = vld [vmem:[%s7485_s0 + $0x138] sm:$0xf] }
   0x7   :  { %960 = vmatpush.bf16.msra.mxu2 %v4280_v3  ;;  %v3756_v16 = vld [vmem:[%s7485_s0 + $0x120] sm:$0xf]  ;;  %v4223_v17 = vld [vmem:[%s7485_s0 + $0x128] sm:$0xf0]  ;;  %v3620_v18 = vld [vmem:[%s7485_s0 + $0x8] sm:$0xf] }
   0x8   :  { %v4592_v20 = vor.u32 %v4223_v17, %v3756_v16  ;;  %v4594_v21 = vor.u32 %v4188_v19, %v3620_v18  ;;  %v4226_v23 = vld [vmem:[%s7485_s0 + $0x140] sm:$0xf0]  ;;  %v3632_v24 = vld [vmem:[%s7485_s0 + $0x20] sm:$0xf]  ;;  %v4191_v25 = vld [vmem:[%s7485_s0 + $0x28] sm:$0xf0] }
   0x9   :  { %v4610_v26 = vor.u32 %v4226_v23, %v3768_v22  ;;  %v4612_v27 = vor.u32 %v4191_v25, %v3632_v24  ;;  %v3780_v28 = vld [vmem:[%s7485_s0 + $0x150] sm:$0xf]  ;;  %v4229_v29 = vld [vmem:[%s7485_s0 + $0x158] sm:$0xf0]  ;;  %v3644_v30 = vld [vmem:[%s7485_s0 + $0x38] sm:$0xf] }
   0xa   :  { %4284 = vmatpush.bf16.msra.mxu1 %v4263_v4  ;;  %703 = vmatpush.bf16.msra.mxu0 %v4263_v4  ;;  %7646 = vst [vmem:[#allocation2_spill] sm:$0xff] %v4592_v20  ;;  %v4194_v31 = vld [vmem:[%s7485_s0 + $0x40] sm:$0xf0]  ;;  %v4628_v32 = vor.u32 %v4229_v29, %v3780_v28  ;;  %v3792_v34 = vld [vmem:[%s7485_s0 + $0x168] sm:$0xf]  ;;  %v4269_v23 = vld [vmem:[%s7484_s1 + $0x58] sm:$0xff] }
   0xb   :  { %961 = vmatpush.bf16.msra.mxu2 %v4279_v5  ;;  %7647 = vst [vmem:[#allocation3_spill] sm:$0xff] %v4594_v21  ;;  %v4630_v33 = vor.u32 %v4194_v31, %v3644_v30  ;;  %v4232_v35 = vld [vmem:[%s7485_s0 + $0x170] sm:$0xf0]  ;;  %v3656_v36 = vld [vmem:[%s7485_s0 + $0x50] sm:$0xf]  ;;  %v4270_v17 = vld [vmem:[%s7484_s1 + $0x60] sm:$0xff] }
   0xc   :  { %7648 = vst [vmem:[#allocation4_spill] sm:$0xff] %v4610_v26  ;;  %v4197_v37 = vld [vmem:[%s7485_s0 + $0x58] sm:$0xf0]  ;;  %v4646_v38 = vor.u32 %v4232_v35, %v3792_v34  ;;  %v3804_v40 = vld [vmem:[%s7485_s0 + $0x180] sm:$0xf]  ;;  %v4268_v25 = vld [vmem:[%s7484_s1 + $0x50] sm:$0xff] }
   0xd   :  { %7649 = vst [vmem:[#allocation5_spill] sm:$0xff] %v4612_v27  ;;  %v4648_v39 = vor.u32 %v4197_v37, %v3656_v36  ;;  %v4235_v41 = vld [vmem:[%s7485_s0 + $0x188] sm:$0xf0]  ;;  %v3668_v42 = vld [vmem:[%s7485_s0 + $0x68] sm:$0xf] }
   0xe   :  { %4285 = vmatpush.bf16.msra.mxu1 %v4262_v6  ;;  %704 = vmatpush.bf16.msra.mxu0 %v4262_v6  ;;  %7650 = vst [vmem:[#allocation6_spill] sm:$0xff] %v4628_v32  ;;  %v4200_v43 = vld [vmem:[%s7485_s0 + $0x70] sm:$0xf0]  ;;  %v4664_v44 = vor.u32 %v4235_v41, %v3804_v40  ;;  %v3816_v46 = vld [vmem:[%s7485_s0 + $0x198] sm:$0xf]  ;;  %v4267_v31 = vld [vmem:[%s7484_s1 + $0x48] sm:$0xff] }
   0xf   :  { %962 = vmatpush.bf16.msra.mxu2 %v4278_v7  ;;  %7651 = vst [vmem:[#allocation7_spill] sm:$0xff] %v4630_v33  ;;  %v4666_v45 = vor.u32 %v4200_v43, %v3668_v42  ;;  %v4238_v47 = vld [vmem:[%s7485_s0 + $0x1a0] sm:$0xf0]  ;;  %v3680_v48 = vld [vmem:[%s7485_s0 + $0x80] sm:$0xf]  ;;  %v4273_v7 = vld [vmem:[%s7484_s1 + $0x78] sm:$0xff] }
  0x10   :  { %7652 = vst [vmem:[#allocation8_spill] sm:$0xff] %v4646_v38  ;;  %v4203_v49 = vld [vmem:[%s7485_s0 + $0x88] sm:$0xf0]  ;;  %v4682_v50 = vor.u32 %v4238_v47, %v3816_v46  ;;  %v3828_v52 = vld [vmem:[%s7485_s0 + $0x1b0] sm:$0xf]  ;;  %v4266_v42 = vld [vmem:[%s7484_s1 + $0x40] sm:$0xff] }
  0x11   :  { %7653 = vst [vmem:[#allocation9_spill] sm:$0xff] %v4648_v39  ;;  %v4684_v51 = vor.u32 %v4203_v49, %v3680_v48  ;;  %v4241_v53 = vld [vmem:[%s7485_s0 + $0x1b8] sm:$0xf0]  ;;  %v3692_v54 = vld [vmem:[%s7485_s0 + $0x98] sm:$0xf] }
  0x12   :  { %4286 = vmatpush.bf16.msra.mxu1 %v4261_v8  ;;  %705 = vmatpush.bf16.msra.mxu0 %v4261_v8  ;;  %7654 = vst [vmem:[#allocation10_spill] sm:$0xff] %v4664_v44  ;;  %v4206_v55 = vld [vmem:[%s7485_s0 + $0xa0] sm:$0xf0]  ;;  %v4700_v56 = vor.u32 %v4241_v53, %v3828_v52  ;;  %v3840_v58 = vld [vmem:[%s7485_s0 + $0x1c8] sm:$0xf] }
  0x13   :  { %963 = vmatpush.bf16.msra.mxu2 %v4277_v9  ;;  %7655 = vst [vmem:[#allocation11_spill] sm:$0xff] %v4666_v45  ;;  %v4702_v57 = vor.u32 %v4206_v55, %v3692_v54  ;;  %v4244_v59 = vld [vmem:[%s7485_s0 + $0x1d0] sm:$0xf0]  ;;  %v3704_v60 = vld [vmem:[%s7485_s0 + $0xb0] sm:$0xf] }
  0x14   :  { %7656 = vst [vmem:[#allocation12_spill] sm:$0xff] %v4682_v50  ;;  %v4209_v61 = vld [vmem:[%s7485_s0 + $0xb8] sm:$0xf0]  ;;  %v4718_v62 = vor.u32 %v4244_v59, %v3840_v58  ;;  %v3852_v0 = vld [vmem:[%s7485_s0 + $0x1e0] sm:$0xf]  ;;  %v4272_v9 = vld [vmem:[%s7484_s1 + $0x70] sm:$0xff] }
  0x15   :  { %7657 = vst [vmem:[#allocation13_spill] sm:$0xff] %v4684_v51  ;;  %v4720_v63 = vor.u32 %v4209_v61, %v3704_v60  ;;  %v4247_v1 = vld [vmem:[%s7485_s0 + $0x1e8] sm:$0xf0]  ;;  %v3716_v2 = vld [vmem:[%s7485_s0 + $0xc8] sm:$0xf] }
  0x16   :  { %4287 = vmatpush.bf16.msra.mxu1 %v4260_v10  ;;  %706 = vmatpush.bf16.msra.mxu0 %v4260_v10  ;;  %7658 = vst [vmem:[#allocation14_spill] sm:$0xff] %v4700_v56  ;;  %v4212_v3 = vld [vmem:[%s7485_s0 + $0xd0] sm:$0xf0]  ;;  %v4736_v4 = vor.u32 %v4247_v1, %v3852_v0  ;;  %v3612_v29 = vld [vmem:[%s7485_s0] sm:$0xf] }
  0x17   :  { %964 = vmatpush.bf16.msra.mxu2 %v4276_v11  ;;  %7659 = vst [vmem:[#allocation15_spill] sm:$0xff] %v4702_v57  ;;  %v4738_v5 = vor.u32 %v4212_v3, %v3716_v2  ;;  %v4271_v11 = vld [vmem:[%s7484_s1 + $0x68] sm:$0xff]  ;;  %v3876_v35 = vld [vmem:[%s7485_s0 + $0x210] sm:$0xf]  ;;  %v4253_v36 = vld [vmem:[%s7485_s0 + $0x218] sm:$0xf0] }
  0x18   :  { %7660 = vst [vmem:[#allocation16_spill] sm:$0xff] %v4718_v62  ;;  %v4187_v30 = vld [vmem:[%s7485_s0 + $0x8] sm:$0xf0]  ;;  %v3740_v37 = vld [vmem:[%s7485_s0 + $0xf8] sm:$0xf]  ;;  %v4821_v43 = vor.u32 %v4253_v36, %v3876_v35 }
  0x19   :  { %7661 = vst [vmem:[#allocation17_spill] sm:$0xff] %v4720_v63  ;;  %v4801_v34 = vor.u32 %v4187_v30, %v3612_v29  ;;  %v4218_v40 = vld [vmem:[%s7485_s0 + $0x100] sm:$0xf0]  ;;  %v3624_v52 = vld [vmem:[%s7485_s0 + $0x18] sm:$0xf] }
  0x1a   :  { %4288 = vmatpush.bf16.msra.mxu1 %v4259_v12  ;;  %707 = vmatpush.bf16.msra.mxu0 %v4259_v12  ;;  %7662 = vst [vmem:[#allocation18_spill] sm:$0xff] %v4736_v4  ;;  %v3864_v12 = vld [vmem:[%s7485_s0 + $0x1f8] sm:$0xf]  ;;  %v4823_v46 = vor.u32 %v4218_v40, %v3740_v37  ;;  %v4190_v53 = vld [vmem:[%s7485_s0 + $0x20] sm:$0xf0] }
  0x1b   :  { %965 = vmatpush.bf16.msra.mxu2 %v4275_v13  ;;  %7663 = vst [vmem:[#allocation19_spill] sm:$0xff] %v4738_v5  ;;  %v4250_v13 = vld [vmem:[%s7485_s0 + $0x200] sm:$0xf0]  ;;  %v4839_v54 = vor.u32 %v4190_v53, %v3624_v52  ;;  %v3888_v55 = vld [vmem:[%s7485_s0 + $0x228] sm:$0xf] }
  0x1c   :  { %v4774_v18 = vor.u32 %v4250_v13, %v3864_v12  ;;  %7666 = vst [vmem:[#allocation22_spill] sm:$0xff] %v4801_v34  ;;  %v4256_v58 = vld [vmem:[%s7485_s0 + $0x230] sm:$0xf0]  ;;  %v3752_v59 = vld [vmem:[%s7485_s0 + $0x110] sm:$0xf] }
  0x1d   :  { %7667 = vst [vmem:[#allocation23_spill] sm:$0xff] %v4821_v43  ;;  %v4221_v60 = vld [vmem:[%s7485_s0 + $0x118] sm:$0xf0]  ;;  %v4856_v0 = vor.u32 %v4256_v58, %v3888_v55  ;;  %v4186_v13 = vld [vmem:[%s7485_s0 + $0x4] sm:$0xf] }
  0x1e   :  { %4289 = vmatpush.bf16.msra.mxu1 %v4258_v14  ;;  %708 = vmatpush.bf16.msra.mxu0 %v4258_v14  ;;  %v3728_v14 = vld [vmem:[%s7485_s0 + $0xe0] sm:$0xf]  ;;  %7664 = vst [vmem:[#allocation20_spill] sm:$0xff] %v4774_v18  ;;  %v4858_v1 = vor.u32 %v4221_v60, %v3752_v59  ;;  %v3648_v36 = vld [vmem:[%s7485_s0 + $0x48] sm:$0xf] }
  0x1f   :  { %966 = vmatpush.bf16.msra.mxu2 %v4274_v15  ;;  %v4215_v15 = vld [vmem:[%s7485_s0 + $0xe8] sm:$0xf0]  ;;  %7668 = vst [vmem:[#allocation24_spill] sm:$0xff] %v4823_v46  ;;  %v4196_v37 = vld [vmem:[%s7485_s0 + $0x50] sm:$0xf0] }
  0x20   :  { %v4776_v19 = vor.u32 %v4215_v15, %v3728_v14  ;;  %7669 = vst [vmem:[#allocation25_spill] sm:$0xff] %v4839_v54  ;;  %v3614_v14 = vld [vmem:[%s7485_s0 + $0xc] sm:$0xf0]  ;;  %v3764_v15 = vld [vmem:[%s7485_s0 + $0x128] sm:$0xf]  ;;  %v4909_v40 = vor.u32 %v4196_v37, %v3648_v36 }
  0x21   :  { %769 = vmatmul.bf16.vlgmr.msra.gmra.mxu1 %v4592_v20  ;;  %709 = vmatmul.bf16.vlgmr.msra.gmra.mxu0 %v4801_v34  ;;  %7670 = vst [vmem:[#allocation26_spill] sm:$0xff] %v4856_v0  ;;  %v3626_v52 = vld [vmem:[%s7485_s0 + $0x24] sm:$0xf0]  ;;  %v3776_v53 = vld [vmem:[%s7485_s0 + $0x140] sm:$0xf] }
  0x22   :  { %967 = vmatmul.bf16.vlgmr.msra.gmra.mxu2 %v4594_v21  ;;  %830 = vmatpush.bf16.msrb.mxu1 %v4273_v7  ;;  %7665 = vst [vmem:[#allocation21_spill] sm:$0xff] %v4776_v19  ;;  %v4227_v55 = vld [vmem:[%s7485_s0 + $0x148] sm:$0xf0]  ;;  %v4192_v36 = vld [vmem:[%s7485_s0 + $0x34] sm:$0xf] }
  0x23   :  { %7671 = vst [vmem:[#allocation27_spill] sm:$0xff] %v4858_v1  ;;  %v4928_v60 = vor.u32 %v4227_v55, %v3776_v53  ;;  %v3638_v37 = vld [vmem:[%s7485_s0 + $0x3c] sm:$0xf0]  ;;  %v3720_v20 = vld [vmem:[%s7485_s0 + $0xd8] sm:$0xf] }
  0x24   :  { %7678 = vst [vmem:[#allocation34_spill] sm:$0xff] %v4909_v40  ;;  %v4961_v55 = vor.u32 %v4192_v36, %v3638_v37  ;;  %v4202_v36 = vld [vmem:[%s7485_s0 + $0x80] sm:$0xf0]  ;;  %v3708_v21 = vld [vmem:[%s7485_s0 + $0xc0] sm:$0xf] }
  0x25   :  { %7680 = vst [vmem:[#allocation36_spill] sm:$0xff] %v4928_v60 }
  0x26   :  { %831 = vmatpush.bf16.msrb.mxu1 %v4272_v9  ;;  %v3636_v9 = vld [vmem:[%s7485_s0 + $0x30] sm:$0xf]  ;;  %7684 = vst [vmem:[#allocation40_spill] sm:$0xff] %v4961_v55 }
  0x2a   :  { %832 = vmatpush.bf16.msrb.mxu1 %v4271_v11  ;;  %v4193_v11 = vld [vmem:[%s7485_s0 + $0x38] sm:$0xf0] }
  0x2b   :  { %v4874_v12 = vor.u32 %v4193_v11, %v3636_v9 }
  0x2d   :  { %7673 = vst [vmem:[#allocation29_spill] sm:$0xff] %v4874_v12 }
  0x2e   :  { %833 = vmatpush.bf16.msrb.mxu1 %v4270_v17  ;;  %v4224_v17 = vld [vmem:[%s7485_s0 + $0x130] sm:$0xf0] }
  0x2f   :  { %v4893_v29 = vor.u32 %v4224_v17, %v3764_v15  ;;  %v4199_v15 = vld [vmem:[%s7485_s0 + $0x68] sm:$0xf0] }
  0x31   :  { %774 = vmatmul.bf16.gmra.mxu1 %v4610_v26  ;;  %714 = vmatmul.bf16.gmra.mxu0 %v4839_v54  ;;  %7675 = vst [vmem:[#allocation31_spill] sm:$0xff] %v4893_v29 }
  0x32   :  { %972 = vmatmul.bf16.gmra.mxu2 %v4612_v27  ;;  %834 = vmatpush.bf16.msrb.mxu1 %v4269_v23 }
  0x36   :  { %835 = vmatpush.bf16.msrb.mxu1 %v4268_v25  ;;  %v4891_v25 = vor.u32 %v4186_v13, %v3614_v14  ;;  %v3660_v14 = vld [vmem:[%s7485_s0 + $0x60] sm:$0xf] }
  0x37   :  { %v4944_v17 = vor.u32 %v4199_v15, %v3660_v14 }
  0x38   :  { %7674 = vst [vmem:[#allocation30_spill] sm:$0xff] %v4891_v25 }
  0x39   :  { %7683 = vst [vmem:[#allocation39_spill] sm:$0xff] %v4944_v17 }
  0x3a   :  { %836 = vmatpush.bf16.msrb.mxu1 %v4267_v31 }
  0x3e   :  { %837 = vmatpush.bf16.msrb.mxu1 %v4266_v42  ;;  %v4189_v42 = vld [vmem:[%s7485_s0 + $0x1c] sm:$0xf] }
  0x3f   :  { %v4926_v59 = vor.u32 %v4189_v42, %v3626_v52  ;;  %v3788_v42 = vld [vmem:[%s7485_s0 + $0x158] sm:$0xf]  ;;  %v4230_v52 = vld [vmem:[%s7485_s0 + $0x160] sm:$0xf0] }
  0x40   :  { %v4963_v14 = vor.u32 %v4230_v52, %v3788_v42  ;;  %v4195_v42 = vld [vmem:[%s7485_s0 + $0x4c] sm:$0xf]  ;;  %v3650_v52 = vld [vmem:[%s7485_s0 + $0x54] sm:$0xf0] }
  0x41   :  { %779 = vmatmul.bf16.gmra.mxu1 %v4628_v32  ;;  %719 = vmatmul.bf16.gmra.mxu0 %v4874_v12  ;;  %7679 = vst [vmem:[#allocation35_spill] sm:$0xff] %v4926_v59  ;;  %v3744_v12 = vld [vmem:[%s7485_s0 + $0x108] sm:$0xf] }
  0x42   :  { %977 = vmatmul.bf16.gmra.mxu2 %v4630_v33  ;;  %7685 = vst [vmem:[#allocation41_spill] sm:$0xff] %v4963_v14 }
  0x51   :  { %784 = vmatmul.bf16.gmra.mxu1 %v4646_v38  ;;  %724 = vmatmul.bf16.gmra.mxu0 %v4909_v40 }
  0x52   :  { %982 = vmatmul.bf16.gmra.mxu2 %v4648_v39  ;;  %v3824_v39 = vld [vmem:[%s7485_s0 + $0x1a0] sm:$0xf] }
  0x61   :  { %789 = vmatmul.bf16.gmra.mxu1 %v4664_v44  ;;  %729 = vmatmul.bf16.gmra.mxu0 %v4944_v17  ;;  %v4242_v44 = vld [vmem:[%s7485_s0 + $0x1c0] sm:$0xf0] }
  0x62   :  { %987 = vmatmul.bf16.gmra.mxu2 %v4666_v45 }
  0x71   :  { %794 = vmatmul.bf16.gmra.mxu1 %v4682_v50 }
  0x72   :  { %992 = vmatmul.bf16.gmra.mxu2 %v4684_v51 }
  0x81   :  { %799 = vmatmul.bf16.gmra.mxu1 %v4700_v56 }
  0x82   :  { %997 = vmatmul.bf16.gmra.mxu2 %v4702_v57  ;;  %v3684_v57 = vld [vmem:[%s7485_s0 + $0x90] sm:$0xf] }
  0x91   :  { %804 = vmatmul.bf16.gmra.mxu1 %v4718_v62 }
  0x92   :  { %1002 = vmatmul.bf16.gmra.mxu2 %v4720_v63 }
  0x9e   :  { %v4740_v6 = vpop.f32.mrf.mxu1  ;;  %v5076_v50 = vpop.f32.mrf.mxu0 }
  0xa1   :  { %809 = vmatmul.bf16.gmra.mxu1 %v4736_v4  ;;  %v3696_v4 = vld [vmem:[%s7485_s0 + $0xa8] sm:$0xf] }
  0xa2   :  { %1007 = vmatmul.bf16.gmra.mxu2 %v4738_v5 }
  0xa5   :  { %v4747_v8 = vpop.f32.mrf.mxu2 }
  0xa6   :  { %v4752_v10 = vpop.f32.mrf.mxu1 }
  0xad   :  { %v4769_v16 = vpop.f32.mrf.mxu2 }
  0xae   :  { %v4778_v22 = vpop.f32.mrf.mxu1 }
  0xb1   :  { %814 = vmatmul.bf16.gmra.mxu1 %v4774_v18 }
  0xb2   :  { %1012 = vmatmul.bf16.gmra.mxu2 %v4776_v19 }
  0xb5   :  { %v4785_v24 = vpop.f32.mrf.mxu2 }
  0xb6   :  { %v4790_v28 = vpop.f32.mrf.mxu1 }
  0xbd   :  { %v4816_v41 = vpop.f32.mrf.mxu2 }
  0xbe   :  { %v4825_v47 = vpop.f32.mrf.mxu1 }
  0xc1   :  { %819 = vmatmul.bf16.gmra.mxu1 %v4821_v43  ;;  %v4236_v43 = vld [vmem:[%s7485_s0 + $0x190] sm:$0xf0] }
  0xc2   :  { %1017 = vmatmul.bf16.gmra.mxu2 %v4823_v46  ;;  %v4233_v46 = vld [vmem:[%s7485_s0 + $0x178] sm:$0xf0] }
  0xc5   :  { %v4829_v48 = vpop.f32.mrf.mxu2 }
  0xc6   :  { %v4831_v49 = vpop.f32.mrf.mxu1 }
  0xcd   :  { %v4854_v61 = vpop.f32.mrf.mxu2 }
  0xce   :  { %v4860_v2 = vpop.f32.mrf.mxu1 }
  0xd1   :  { %824 = vmatmul.bf16.gmra.mxu1 %v4856_v0 }
  0xd2   :  { %1022 = vmatmul.bf16.gmra.mxu2 %v4858_v1  ;;  %v3672_v1 = vld [vmem:[%s7485_s0 + $0x78] sm:$0xf] }
  0xd3   :  { %v4979_v37 = vor.u32 %v4202_v36, %v3672_v1  ;;  %v4996_v36 = vor.u32 %v4195_v42, %v3650_v52  ;;  %v4205_v42 = vld [vmem:[%s7485_s0 + $0x98] sm:$0xf0]  ;;  %v3662_v52 = vld [vmem:[%s7485_s0 + $0x6c] sm:$0xf0] }
  0xd5   :  { %v4864_v3 = vpop.f32.mrf.mxu2  ;;  %7688 = vst [vmem:[#allocation44_spill] sm:$0xff] %v4979_v37  ;;  %734 = vmatmul.bf16.gmra.mxu0 %v4979_v37 }
  0xd6   :  { %v4866_v7 = vpop.f32.mrf.mxu1  ;;  %7689 = vst [vmem:[#allocation45_spill] sm:$0xff] %v4996_v36 }
  0xd7   :  { %7672 = vst [vmem:[#allocation28_spill] sm:$0xff] %v4866_v7 }
  0xdd   :  { %v4889_v23 = vpop.f32.mrf.mxu2 }
  0xde   :  { %v4895_v30 = vpop.f32.mrf.mxu1 }
  0xdf   :  { %7676 = vst [vmem:[#allocation32_spill] sm:$0xff] %v4895_v30 }
  0xe1   :  { %838 = vmatmul.bf16.vlgmr.msrb.gmra.mxu1 %v4891_v25 }
  0xe2   :  { %1027 = vmatmul.bf16.gmra.mxu2 %v4893_v29 }
  0xe5   :  { %v4899_v31 = vpop.f32.mrf.mxu2 }
  0xe6   :  { %v4901_v35 = vpop.f32.mrf.mxu1 }
  0xe7   :  { %7677 = vst [vmem:[#allocation33_spill] sm:$0xff] %v4901_v35 }
  0xed   :  { %v4924_v58 = vpop.f32.mrf.mxu2 }
  0xee   :  { %v4930_v9 = vpop.f32.mrf.mxu1 }
  0xef   :  { %7681 = vst [vmem:[#allocation37_spill] sm:$0xff] %v4930_v9  ;;  %v4222_v9 = vld [vmem:[%s7485_s0 + $0x124] sm:$0xf] }
  0xf1   :  { %843 = vmatmul.bf16.gmra.mxu1 %v4926_v59 }
  0xf2   :  { %1032 = vmatmul.bf16.gmra.mxu2 %v4928_v60 }
  0xf5   :  { %v4934_v11 = vpop.f32.mrf.mxu2 }
  0xf6   :  { %v4936_v13 = vpop.f32.mrf.mxu1 }
  0xf7   :  { %7682 = vst [vmem:[#allocation38_spill] sm:$0xff] %v4936_v13 }
  0xfd   :  { %v4959_v53 = vpop.f32.mrf.mxu2 }
  0xfe   :  { %v4965_v15 = vpop.f32.mrf.mxu1 }
  0xff   :  { %7686 = vst [vmem:[#allocation42_spill] sm:$0xff] %v4965_v15 }
 0x101   :  { %848 = vmatmul.bf16.gmra.mxu1 %v4961_v55 }
 0x102   :  { %1037 = vmatmul.bf16.gmra.mxu2 %v4963_v14  ;;  %v3800_v14 = vld [vmem:[%s7485_s0 + $0x170] sm:$0xf] }
 0x103   :  { %v4998_v19 = vor.u32 %v4233_v46, %v3800_v14  ;;  %v5014_v46 = vor.u32 %v4205_v42, %v3684_v57  ;;  %v4198_v14 = vld [vmem:[%s7485_s0 + $0x64] sm:$0xf] }
 0x104   :  { %v5029_v57 = vor.u32 %v4198_v14, %v3662_v52  ;;  %v4208_v14 = vld [vmem:[%s7485_s0 + $0xb0] sm:$0xf0]  ;;  %v4201_v52 = vld [vmem:[%s7485_s0 + $0x7c] sm:$0xf] }
 0x105   :  { %v4969_v60 = vpop.f32.mrf.mxu2  ;;  %7690 = vst [vmem:[#allocation46_spill] sm:$0xff] %v4998_v19  ;;  %739 = vmatmul.bf16.gmra.mxu0 %v5014_v46 }
 0x106   :  { %v4971_v29 = vpop.f32.mrf.mxu1  ;;  %7693 = vst [vmem:[#allocation49_spill] sm:$0xff] %v5014_v46 }
 0x107   :  { %7687 = vst [vmem:[#allocation43_spill] sm:$0xff] %v4971_v29 }
 0x108   :  { %7694 = vst [vmem:[#allocation50_spill] sm:$0xff] %v5029_v57 }
 0x10d   :  { %v4994_v1 = vpop.f32.mrf.mxu2 }
 0x10e   :  { %v5000_v5 = vpop.f32.mrf.mxu1 }
 0x10f   :  { %7691 = vst [vmem:[#allocation47_spill] sm:$0xff] %v5000_v5 }
 0x111   :  { %853 = vmatmul.bf16.gmra.mxu1 %v4996_v36  ;;  %v4245_v36 = vld [vmem:[%s7485_s0 + $0x1d8] sm:$0xf0] }
 0x112   :  { %1042 = vmatmul.bf16.gmra.mxu2 %v4998_v19  ;;  %v3812_v19 = vld [vmem:[%s7485_s0 + $0x188] sm:$0xf] }
 0x113   :  { %v5031_v42 = vor.u32 %v4236_v43, %v3812_v19  ;;  %v5047_v19 = vor.u32 %v4208_v14, %v3696_v4  ;;  %v4239_v4 = vld [vmem:[%s7485_s0 + $0x1a8] sm:$0xf0] }
 0x114   :  { %v5066_v62 = vor.u32 %v4239_v4, %v3824_v39  ;;  %v4211_v39 = vld [vmem:[%s7485_s0 + $0xc8] sm:$0xf0]  ;;  %v3686_v4 = vld [vmem:[%s7485_s0 + $0x9c] sm:$0xf0] }
 0x115   :  { %v5004_v63 = vpop.f32.mrf.mxu2  ;;  %7695 = vst [vmem:[#allocation51_spill] sm:$0xff] %v5031_v42  ;;  %744 = vmatmul.bf16.gmra.mxu0 %v5047_v19 }
 0x116   :  { %v5006_v0 = vpop.f32.mrf.mxu1  ;;  %7698 = vst [vmem:[#allocation54_spill] sm:$0xff] %v5047_v19 }
 0x117   :  { %7692 = vst [vmem:[#allocation48_spill] sm:$0xff] %v5006_v0 }
 0x118   :  { %7700 = vst [vmem:[#allocation56_spill] sm:$0xff] %v5066_v62 }
 0x11d   :  { %v5035_v18 = vpop.f32.mrf.mxu2 }
 0x11e   :  { %v5033_v51 = vpop.f32.mrf.mxu1 }
 0x11f   :  { %7696 = vst [vmem:[#allocation52_spill] sm:$0xff] %v5033_v51 }
 0x121   :  { %858 = vmatmul.bf16.gmra.mxu1 %v5029_v57 }
 0x122   :  { %1047 = vmatmul.bf16.gmra.mxu2 %v5031_v42  ;;  %v3674_v42 = vld [vmem:[%s7485_s0 + $0x84] sm:$0xf0] }
 0x123   :  { %v5064_v14 = vor.u32 %v4201_v52, %v3674_v42  ;;  %v5084_v42 = vor.u32 %v4211_v39, %v3708_v21  ;;  %v4204_v52 = vld [vmem:[%s7485_s0 + $0x94] sm:$0xf] }
 0x124   :  { %v5101_v39 = vor.u32 %v4204_v52, %v3686_v4  ;;  %v4207_v4 = vld [vmem:[%s7485_s0 + $0xac] sm:$0xf] }
 0x125   :  { %v5049_v43 = vpop.f32.mrf.mxu2  ;;  %7699 = vst [vmem:[#allocation55_spill] sm:$0xff] %v5064_v14  ;;  %749 = vmatmul.bf16.gmra.mxu0 %v5084_v42 }
 0x126   :  { %v5039_v45 = vpop.f32.mrf.mxu1  ;;  %7703 = vst [vmem:[#allocation59_spill] sm:$0xff] %v5084_v42  ;;  %v3732_v42 = vld [vmem:[%s7485_s0 + $0xf0] sm:$0xf] }
 0x127   :  { %7697 = vst [vmem:[#allocation53_spill] sm:$0xff] %v5039_v45 }
 0x128   :  { %7704 = vst [vmem:[#allocation60_spill] sm:$0xff] %v5101_v39 }
 0x12d   :  { %v5072_v56 = vpop.f32.mrf.mxu2 }
 0x12e   :  { %v5068_v33 = vpop.f32.mrf.mxu1 }
 0x12f   :  { %7701 = vst [vmem:[#allocation57_spill] sm:$0xff] %v5068_v33  ;;  %v1138_v33 = vld [vmem:[%s7486_s3] sm:$0xff] }
 0x131   :  { %863 = vmatmul.bf16.gmra.mxu1 %v5064_v14  ;;  %v5107_v14 = vpop.f32.mrf.mxu0 }
 0x132   :  { %1052 = vmatmul.bf16.gmra.mxu2 %v5066_v62  ;;  %v3836_v62 = vld [vmem:[%s7485_s0 + $0x1b8] sm:$0xf] }
 0x133   :  { %v5103_v38 = vor.u32 %v4242_v44, %v3836_v62  ;;  %v4214_v44 = vld [vmem:[%s7485_s0 + $0xe0] sm:$0xf0] }
 0x134   :  { %v5123_v52 = vor.u32 %v4214_v44, %v3720_v20 }
 0x135   :  { %v5099_v21 = vpop.f32.mrf.mxu2  ;;  %7705 = vst [vmem:[#allocation61_spill] sm:$0xff] %v5103_v38 }
 0x136   :  { %v5074_v27 = vpop.f32.mrf.mxu1  ;;  %7708 = vst [vmem:[#allocation64_spill] sm:$0xff] %v5123_v52  ;;  %754 = vmatmul.bf16.gmra.mxu0 %v5123_v52 }
 0x137   :  { %7702 = vst [vmem:[#allocation58_spill] sm:$0xff] %v5074_v27 }
 0x139   :  { %v5113_v57 = vpop.f32.mrf.mxu0 }
 0x13d   :  { %v5121_v62 = vpop.f32.mrf.mxu2 }
 0x13e   :  { %v5105_v32 = vpop.f32.mrf.mxu1 }
 0x13f   :  { %7706 = vst [vmem:[#allocation62_spill] sm:$0xff] %v5105_v32  ;;  %v4216_v32 = vld [vmem:[%s7485_s0 + $0xf4] sm:$0xf] }
 0x141   :  { %868 = vmatmul.bf16.gmra.mxu1 %v5101_v39  ;;  %v3848_v39 = vld [vmem:[%s7485_s0 + $0x1d0] sm:$0xf]  ;;  %v5144_v59 = vpop.f32.mrf.mxu0 }
 0x142   :  { %1057 = vmatmul.bf16.gmra.mxu2 %v5103_v38  ;;  %v3698_v38 = vld [vmem:[%s7485_s0 + $0xb4] sm:$0xf0]  ;;  %v5140_v44 = vor.u32 %v4245_v36, %v3848_v39 }
 0x143   :  { %v5138_v20 = vor.u32 %v4207_v4, %v3698_v38  ;;  %v4217_v38 = vld [vmem:[%s7485_s0 + $0xf8] sm:$0xf0]  ;;  %v4210_v4 = vld [vmem:[%s7485_s0 + $0xc4] sm:$0xf] }
 0x144   :  { %7710 = vst [vmem:[#allocation66_spill] sm:$0xff] %v5140_v44  ;;  %v5158_v36 = vor.u32 %v4217_v38, %v3732_v42  ;;  %v4248_v42 = vld [vmem:[%s7485_s0 + $0x1f0] sm:$0xf0] }
 0x145   :  { %7709 = vst [vmem:[#allocation65_spill] sm:$0xff] %v5138_v20  ;;  %v5146_v52 = vpop.f32.mrf.mxu2 }
 0x146   :  { %v5111_v26 = vpop.f32.mrf.mxu1  ;;  %7713 = vst [vmem:[#allocation69_spill] sm:$0xff] %v5158_v36  ;;  %759 = vmatmul.bf16.gmra.mxu0 %v5158_v36 }
 0x147   :  { %7707 = vst [vmem:[#allocation63_spill] sm:$0xff] %v5111_v26 }
 0x149   :  { %v5160_v39 = vpop.f32.mrf.mxu0 }
 0x14d   :  { %v5175_v38 = vpop.f32.mrf.mxu2 }
 0x14e   :  { %v5142_v55 = vpop.f32.mrf.mxu1 }
 0x14f   :  { %7711 = vst [vmem:[#allocation67_spill] sm:$0xff] %v5142_v55 }
 0x151   :  { %873 = vmatmul.bf16.gmra.mxu1 %v5138_v20  ;;  %v3860_v20 = vld [vmem:[%s7485_s0 + $0x1e8] sm:$0xf]  ;;  %v5183_v36 = vpop.f32.mrf.mxu0 }
 0x152   :  { %1062 = vmatmul.bf16.gmra.mxu2 %v5140_v44  ;;  %v3710_v44 = vld [vmem:[%s7485_s0 + $0xcc] sm:$0xf0]  ;;  %v5179_v46 = vor.u32 %v4248_v42, %v3860_v20  ;;  %v4220_v20 = vld [vmem:[%s7485_s0 + $0x110] sm:$0xf0]  ;;  %v3722_v42 = vld [vmem:[%s7485_s0 + $0xe4] sm:$0xf0] }
 0x153   :  { %v5177_v19 = vor.u32 %v4210_v4, %v3710_v44  ;;  %v5195_v44 = vor.u32 %v4220_v20, %v3744_v12  ;;  %v4213_v4 = vld [vmem:[%s7485_s0 + $0xdc] sm:$0xf] }
 0x154   :  { %7715 = vst [vmem:[#allocation71_spill] sm:$0xff] %v5179_v46  ;;  %v5212_v20 = vor.u32 %v4213_v4, %v3722_v42  ;;  %v4254_v4 = vld [vmem:[%s7485_s0 + $0x220] sm:$0xf0] }
 0x155   :  { %7714 = vst [vmem:[#allocation70_spill] sm:$0xff] %v5177_v19  ;;  %v5185_v17 = vpop.f32.mrf.mxu2 }
 0x156   :  { %v5150_v25 = vpop.f32.mrf.mxu1  ;;  %7716 = vst [vmem:[#allocation72_spill] sm:$0xff] %v5195_v44  ;;  %764 = vmatmul.bf16.gmra.mxu0 %v5195_v44 }
 0x157   :  { %7712 = vst [vmem:[#allocation68_spill] sm:$0xff] %v5150_v25 }
 0x158   :  { %7717 = vst [vmem:[#allocation73_spill] sm:$0xff] %v5212_v20 }
 0x159   :  { %v5210_v12 = vpop.f32.mrf.mxu0 }
 0x15d   :  { %v5216_v44 = vpop.f32.mrf.mxu2 }
 0x15e   :  { %v839_v37 = vpop.f32.mrf.mxu1 }
 0x161   :  { %878 = vmatmul.bf16.gmra.mxu1 %v5177_v19  ;;  %v4251_v19 = vld [vmem:[%s7485_s0 + $0x208] sm:$0xf0]  ;;  %v5220_v55 = vpop.f32.mrf.mxu0 }
 0x162   :  { %1067 = vmatmul.bf16.gmra.mxu2 %v5179_v46  ;;  %v3872_v46 = vld [vmem:[%s7485_s0 + $0x200] sm:$0xf] }
 0x163   :  { %v5214_v54 = vor.u32 %v4251_v19, %v3872_v46  ;;  %v3734_v46 = vld [vmem:[%s7485_s0 + $0xfc] sm:$0xf0]  ;;  %v3884_v19 = vld [vmem:[%s7485_s0 + $0x218] sm:$0xf] }
 0x164   :  { %v5236_v42 = vor.u32 %v4216_v32, %v3734_v46 }
 0x165   :  { %7718 = vst [vmem:[#allocation74_spill] sm:$0xff] %v5214_v54  ;;  %v5222_v26 = vpop.f32.mrf.mxu2 }
 0x166   :  { %v5187_v40 = vpop.f32.mrf.mxu1  ;;  %7719 = vst [vmem:[#allocation75_spill] sm:$0xff] %v5236_v42 }
 0x167   :  { %v842_v30 = vadd.f32 %v5187_v40, %v5107_v14 }
 0x169   :  { %v5246_v45 = vpop.f32.mrf.mxu0 }
 0x16d   :  { %v5250_v32 = vpop.f32.mrf.mxu2 }
 0x16e   :  { %v844_v34 = vpop.f32.mrf.mxu1 }
 0x171   :  { %883 = vmatmul.bf16.gmra.mxu1 %v5212_v20  ;;  %v1139_v20 = vld [vmem:[%s7486_s3 + $0x8] sm:$0xff] }
 0x172   :  { %1072 = vmatmul.bf16.gmra.mxu2 %v5214_v54  ;;  %v5238_v54 = vor.u32 %v4254_v4, %v3884_v19  ;;  %4290 = vmatpush.msra.mxu3 %v1139_v20  ;;  %v4219_v19 = vld [vmem:[%s7485_s0 + $0x10c] sm:$0xf]  ;;  %v3896_v4 = vld [vmem:[%s7485_s0 + $0x230] sm:$0xf] }
 0x173   :  { %1299 = vmatpush.msrb.mxu2 %v1139_v20  ;;  %v3746_v20 = vld [vmem:[%s7485_s0 + $0x114] sm:$0xf0] }
 0x174   :  { %7720 = vst [vmem:[#allocation76_spill] sm:$0xff] %v5238_v54  ;;  %4291 = vmatpush.msra.mxu3 %v1138_v33  ;;  %v5268_v51 = vor.u32 %v4219_v19, %v3746_v20  ;;  %v3758_v19 = vld [vmem:[%s7485_s0 + $0x12c] sm:$0xf0]  ;;  %v840_v20 = vadd.f32 %v839_v37, %v5076_v50  ;;  %v971_v50 = vadd.f32 %v4769_v16, %v842_v30  ;;  %v3770_v37 = vld [vmem:[%s7485_s0 + $0x144] sm:$0xf0] }
 0x175   :  { %1300 = vmatpush.msrb.mxu2 %v1138_v33  ;;  %v4257_v33 = vld [vmem:[%s7485_s0 + $0x238] sm:$0xf0] }
 0x176   :  { %v846_v25 = vpop.f32.mrf.mxu1  ;;  %7721 = vst [vmem:[#allocation77_spill] sm:$0xff] %v5268_v51  ;;  %v5270_v0 = vor.u32 %v4257_v33, %v3896_v4  ;;  %v5285_v4 = vor.u32 %v4222_v9, %v3758_v19 }
 0x178   :  { %7722 = vst [vmem:[#allocation78_spill] sm:$0xff] %v5270_v0 }
 0x179   :  { %7723 = vst [vmem:[#allocation79_spill] sm:$0xff] %v5285_v4 }
 0x17e   :  { %v849_v27 = vpop.f32.mrf.mxu1 }
 0x181   :  { %888 = vmatmul.bf16.gmra.mxu1 %v5236_v42  ;;  %v5266_v42 = vpop.f32.mrf.mxu2 }
 0x182   :  { %1077 = vmatmul.bf16.gmra.mxu2 %v5238_v54  ;;  %v5264_v54 = vpop.f32.mrf.mxu0 }
 0x186   :  { %v851_v46 = vpop.f32.mrf.mxu1 }
 0x189   :  { %v5276_v13 = vpop.f32.mrf.mxu2 }
 0x18a   :  { %v5274_v29 = vpop.f32.mrf.mxu0 }
 0x18e   :  { %v854_v5 = vpop.f32.mrf.mxu1 }
 0x191   :  { %893 = vmatmul.bf16.gmra.mxu1 %v5268_v51  ;;  %v969_v51 = vadd.f32 %v4747_v8, %v840_v20  ;;  %v5290_v35 = vpop.f32.mrf.mxu2  ;;  %v4225_v8 = vld [vmem:[%s7485_s0 + $0x13c] sm:$0xf]  ;;  %v847_v20 = vadd.f32 %v846_v25, %v5144_v59 }
 0x192   :  { %1082 = vmatmul.bf16.gmra.mxu2 %v5270_v0  ;;  %v5287_v0 = vpop.f32.mrf.mxu0  ;;  %v5309_v40 = vor.u32 %v4225_v8, %v3770_v37  ;;  %v850_v8 = vadd.f32 %v849_v27, %v5160_v39 }
 0x194   :  { %7724 = vst [vmem:[#allocation80_spill] sm:$0xff] %v5309_v40 }
 0x196   :  { %v856_v15 = vpop.f32.mrf.mxu1 }
 0x199   :  { %v5307_v19 = vpop.f32.mrf.mxu2 }
 0x19a   :  { %v5297_v9 = vpop.f32.mrf.mxu0 }
 0x19e   :  { %v859_v33 = vpop.f32.mrf.mxu1 }
 0x1a1   :  { %898 = vmatmul.bf16.gmra.mxu1 %v5285_v4 }
 0x1a2   :  { %3994 = vmatmul.msk.f32.vlgmr.msrb.gmra.mxu2 %vm1140_vm0, %v969_v51  ;;  %v845_v51 = vadd.f32 %v844_v34, %v5113_v57  ;;  %v5314_v30 = vpop.f32.mrf.mxu0  ;;  %v976_v34 = vadd.f32 %v4816_v41, %v847_v20  ;;  %v4228_v57 = vld [vmem:[%s7485_s0 + $0x154] sm:$0xf] }
 0x1a4   :  { %v974_v16 = vadd.f32 %v4785_v24, %v845_v51  ;;  %v3782_v24 = vld [vmem:[%s7485_s0 + $0x15c] sm:$0xf0]  ;;  %v979_v51 = vadd.f32 %v4829_v48, %v850_v8  ;;  %v4231_v48 = vld [vmem:[%s7485_s0 + $0x16c] sm:$0xf] }
 0x1a5   :  { %v5330_v25 = vor.u32 %v4228_v57, %v3782_v24  ;;  %v3794_v57 = vld [vmem:[%s7485_s0 + $0x174] sm:$0xf0]  ;;  %v855_v24 = vadd.f32 %v854_v5, %v5210_v12  ;;  %v3806_v12 = vld [vmem:[%s7485_s0 + $0x18c] sm:$0xf0] }
 0x1a6   :  { %v861_v7 = vpop.f32.mrf.mxu1 }
 0x1a7   :  { %7725 = vst [vmem:[#allocation81_spill] sm:$0xff] %v5330_v25  ;;  %v984_v8 = vadd.f32 %v4864_v3, %v855_v24  ;;  %v4234_v3 = vld [vmem:[%s7485_s0 + $0x184] sm:$0xf] }
 0x1aa   :  { %3995 = vmatmul.msk.f32.gmra.mxu2 %vm1140_vm0, %v971_v50  ;;  %v5317_v50 = vpop.f32.mrf.mxu2  ;;  %v5328_v37 = vpop.f32.mrf.mxu0 }
 0x1ae   :  { %v864_v14 = vpop.f32.mrf.mxu1 }
 0x1b1   :  { %903 = vmatmul.bf16.gmra.mxu1 %v5309_v40  ;;  %v5773_v40 = vld [vmem:[%s7488_s4] ss:$0 sm:$0xff] }
 0x1b2   :  { %3996 = vmatmul.msk.f32.gmra.mxu2 %vm1140_vm0, %v974_v16  ;;  %v5333_v41 = vpop.f32.mrf.mxu2  ;;  %v852_v16 = vadd.f32 %v851_v46, %v5183_v36  ;;  %v5351_v36 = vor.u32 %v4231_v48, %v3794_v57  ;;  %v5376_v48 = vor.u32 %v4234_v3, %v3806_v12 }
 0x1b4   :  { %v981_v27 = vadd.f32 %v4854_v61, %v852_v16  ;;  %7726 = vst [vmem:[#allocation82_spill] sm:$0xff] %v5351_v36 }
 0x1b5   :  { %7727 = vst [vmem:[#allocation83_spill] sm:$0xff] %v5376_v48 }
 0x1b6   :  { %v866_v4 = vpop.f32.mrf.mxu1 }
 0x1ba   :  { %3997 = vmatmul.msk.f32.gmra.mxu2 %vm1140_vm0, %v976_v34  ;;  %v5338_v34 = vpop.f32.mrf.mxu0  ;;  %v5341_v39 = vpop.f32.mrf.mxu2 }
 0x1be   :  { %v869_v59 = vpop.f32.mrf.mxu1 }
 0x1c1   :  { %908 = vmatmul.bf16.gmra.mxu1 %v5330_v25 }
 0x1c2   :  { %3998 = vmatmul.msk.f32.gmra.mxu2 %vm1140_vm0, %v979_v51  ;;  %v5354_v61 = vpop.f32.mrf.mxu0  ;;  %v857_v51 = vadd.f32 %v856_v15, %v5220_v55  ;;  %v5359_v16 = vpop.f32.mrf.mxu2  ;;  %v860_v55 = vadd.f32 %v859_v33, %v5246_v45 }
 0x1c4   :  { %v986_v25 = vadd.f32 %v4889_v23, %v857_v51  ;;  %v989_v23 = vadd.f32 %v4899_v31, %v860_v55  ;;  %v4237_v31 = vld [vmem:[%s7485_s0 + $0x19c] sm:$0xf]  ;;  %v3818_v51 = vld [vmem:[%s7485_s0 + $0x1a4] sm:$0xf0] }
 0x1c6   :  { %v871_v20 = vpop.f32.mrf.mxu1 }
 0x1ca   :  { %3999 = vmatmul.msk.f32.gmra.mxu2 %vm1140_vm0, %v981_v27  ;;  %v5365_v5 = vpop.f32.mrf.mxu0  ;;  %v5374_v15 = vpop.f32.mrf.mxu2 }
 0x1ce   :  { %v874_v46 = vpop.f32.mrf.mxu1 }
 0x1d1   :  { %913 = vmatmul.bf16.gmra.mxu1 %v5351_v36 }
 0x1d2   :  { %4000 = vmatmul.msk.f32.gmra.mxu2 %vm1140_vm0, %v984_v8  ;;  %v5384_v24 = vpop.f32.mrf.mxu0  ;;  %v5389_v33 = vpop.f32.mrf.mxu2 }
 0x1d6   :  { %v5361_v27 = vpop.f32.mrf.mxu1 }
 0x1da   :  { %4001 = vmatmul.msk.f32.gmra.mxu2 %vm1140_vm0, %v986_v25  ;;  %v862_v25 = vadd.f32 %v861_v7, %v5264_v54  ;;  %v865_v54 = vadd.f32 %v864_v14, %v5274_v29  ;;  %v5399_v7 = vor.u32 %v4237_v31, %v3818_v51  ;;  %v5401_v3 = vpop.f32.mrf.mxu0  ;;  %v5406_v55 = vpop.f32.mrf.mxu2  ;;  %v870_v31 = vadd.f32 %v869_v59, %v5297_v9 }
 0x1dc   :  { %v991_v45 = vadd.f32 %v4924_v58, %v862_v25  ;;  %7728 = vst [vmem:[#allocation84_spill] sm:$0xff] %v5399_v7  ;;  %v994_v58 = vadd.f32 %v4934_v11, %v865_v54  ;;  %v4240_v11 = vld [vmem:[%s7485_s0 + $0x1b4] sm:$0xf] }
 0x1de   :  { %v5378_v57 = vpop.f32.mrf.mxu1 }
 0x1e1   :  { %918 = vmatmul.bf16.gmra.mxu1 %v5376_v48 }
 0x1e2   :  { %4002 = vmatmul.msk.f32.gmra.mxu2 %vm1140_vm0, %v989_v23  ;;  %v867_v23 = vadd.f32 %v866_v4, %v5287_v0  ;;  %v5414_v14 = vpop.f32.mrf.mxu0  ;;  %v5424_v51 = vpop.f32.mrf.mxu2 }
 0x1e4   :  { %v996_v29 = vadd.f32 %v4959_v53, %v867_v23  ;;  %v999_v53 = vadd.f32 %v4969_v60, %v870_v31  ;;  %v4243_v60 = vld [vmem:[%s7485_s0 + $0x1cc] sm:$0xf] }
 0x1e6   :  { %v5386_v8 = vpop.f32.mrf.mxu1 }
 0x1ea   :  { %4003 = vmatmul.msk.f32.gmra.mxu2 %vm1140_vm0, %v991_v45  ;;  %v3830_v45 = vld [vmem:[%s7485_s0 + $0x1bc] sm:$0xf0]  ;;  %v762_v54 = vpop.f32.mrf.mxu0  ;;  %v5434_v23 = vpop.f32.mrf.mxu2 }
 0x1eb   :  { %v5426_v0 = vor.u32 %v4240_v11, %v3830_v45  ;;  %v3842_v45 = vld [vmem:[%s7485_s0 + $0x1d4] sm:$0xf0] }
 0x1ec   :  { %v5447_v31 = vor.u32 %v4243_v60, %v3842_v45 }
 0x1ed   :  { %7729 = vst [vmem:[#allocation85_spill] sm:$0xff] %v5426_v0 }
 0x1ee   :  { %v5403_v12 = vpop.f32.mrf.mxu1  ;;  %7730 = vst [vmem:[#allocation86_spill] sm:$0xff] %v5447_v31 }
 0x1f1   :  { %923 = vmatmul.bf16.gmra.mxu1 %v5399_v7 }
 0x1f2   :  { %4004 = vmatmul.msk.f32.gmra.mxu2 %vm1140_vm0, %v994_v58  ;;  %v872_v58 = vadd.f32 %v871_v20, %v5314_v30  ;;  %v875_v30 = vadd.f32 %v874_v46, %v5328_v37  ;;  %v765_v20 = vpop.f32.mrf.mxu0  ;;  %v877_v37 = vadd.f32 %v5361_v27, %v5338_v34  ;;  %v3854_v34 = vld [vmem:[%s7485_s0 + $0x1ec] sm:$0xf0]  ;;  %v880_v27 = vadd.f32 %v5378_v57, %v5354_v61 }
 0x1f4   :  { %v1001_v9 = vadd.f32 %v4994_v1, %v872_v58 }
 0x1f6   :  { %v5411_v25 = vpop.f32.mrf.mxu1 }
 0x1fa   :  { %4005 = vmatmul.msk.f32.gmra.mxu2 %vm1140_vm0, %v996_v29  ;;  %v767_v46 = vpop.f32.mrf.mxu0 }
 0x1fe   :  { %v5428_v4 = vpop.f32.mrf.mxu1 }
 0x201   :  { %928 = vmatmul.bf16.gmra.mxu1 %v5426_v0 }
 0x202   :  { %4006 = vmatmul.msk.f32.gmra.mxu2 %vm1140_vm0, %v999_v53  ;;  %v5450_v53 = vpop.f32.mrf.mxu2 }
 0x206   :  { %v891_v29 = vpop.f32.mrf.mxu1 }
 0x207   :  { %v892_v59 = vadd.f32 %v891_v29, %v762_v54 }
 0x209   :  { %v1021_v11 = vadd.f32 %v5175_v38, %v892_v59  ;;  %v1004_v38 = vadd.f32 %v5004_v63, %v875_v30 }
 0x20a   :  { %4007 = vmatmul.msk.f32.gmra.mxu2 %vm1140_vm0, %v1001_v9  ;;  %v1006_v9 = vadd.f32 %v5035_v18, %v877_v37  ;;  %v5459_v63 = vpop.f32.mrf.mxu2 }
 0x20b   :  { %4015 = vmatmul.msk.f32.vlgmr.msra.gmra.mxu3 %vm1140_vm0, %v1021_v11 }
 0x20e   :  { %v894_v1 = vpop.f32.mrf.mxu1 }
 0x20f   :  { %v895_v54 = vadd.f32 %v894_v1, %v765_v20  ;;  %v882_v20 = vadd.f32 %v5386_v8, %v5365_v5  ;;  %v3866_v5 = vld [vmem:[%s7485_s0 + $0x204] sm:$0xf0]  ;;  %v885_v8 = vadd.f32 %v5403_v12, %v5384_v24  ;;  %v887_v24 = vadd.f32 %v5411_v25, %v5401_v3  ;;  %v3878_v3 = vld [vmem:[%s7485_s0 + $0x21c] sm:$0xf0] }
 0x210   :  { %v890_v25 = vadd.f32 %v5428_v4, %v5414_v14 }
 0x211   :  { %v1024_v58 = vadd.f32 %v5185_v17, %v895_v54  ;;  %933 = vmatmul.bf16.gmra.mxu1 %v5447_v31  ;;  %v4246_v17 = vld [vmem:[%s7485_s0 + $0x1e4] sm:$0xf]  ;;  %v1011_v57 = vadd.f32 %v5072_v56, %v882_v20  ;;  %v1016_v37 = vadd.f32 %v5121_v62, %v887_v24 }
 0x212   :  { %4008 = vmatmul.msk.f32.gmra.mxu2 %vm1140_vm0, %v1004_v38  ;;  %v5472_v18 = vor.u32 %v4246_v17, %v3854_v34  ;;  %v5481_v1 = vpop.f32.mrf.mxu2  ;;  %v1014_v38 = vadd.f32 %v5099_v21, %v885_v8 }
 0x213   :  { %4016 = vmatmul.msk.f32.gmra.mxu3 %vm1140_vm0, %v1024_v58 }
 0x214   :  { %7731 = vst [vmem:[#allocation87_spill] sm:$0xff] %v5472_v18 }
 0x216   :  { %v896_v29 = vpop.f32.mrf.mxu1 }
 0x217   :  { %v897_v59 = vadd.f32 %v896_v29, %v767_v46 }
 0x219   :  { %v1026_v11 = vadd.f32 %v5216_v44, %v897_v59  ;;  %v1009_v44 = vadd.f32 %v5049_v43, %v880_v27 }
 0x21a   :  { %4009 = vmatmul.msk.f32.gmra.mxu2 %vm1140_vm0, %v1006_v9  ;;  %v5497_v56 = vpop.f32.mrf.mxu2 }
 0x21b   :  { %4017 = vmatmul.msk.f32.gmra.mxu3 %vm1140_vm0, %v1026_v11 }
 0x21e   :  { %v899_v60 = vpop.f32.mrf.mxu1 }
 0x21f   :  { %v900_v45 = vadd.f32 %v899_v60, %v4740_v6 }
 0x221   :  { %v1029_v30 = vadd.f32 %v5222_v26, %v900_v45  ;;  %938 = vmatmul.bf16.gmra.mxu1 %v5472_v18  ;;  %v4249_v26 = vld [vmem:[%s7485_s0 + $0x1fc] sm:$0xf] }
 0x222   :  { %4010 = vmatmul.msk.f32.gmra.mxu2 %vm1140_vm0, %v1009_v44  ;;  %v5510_v46 = vpop.f32.mrf.mxu2 }
 0x223   :  { %4018 = vmatmul.msk.f32.gmra.mxu3 %vm1140_vm0, %v1029_v30  ;;  %v7736_v30 = vld [vmem:[#allocation32_spill] sm:$0xff] }
 0x226   :  { %v901_v61 = vpop.f32.mrf.mxu1 }
 0x227   :  { %v902_v43 = vadd.f32 %v901_v61, %v4752_v10  ;;  %v5499_v10 = vor.u32 %v4249_v26, %v3866_v5  ;;  %v7738_v26 = vld [vmem:[#allocation37_spill] sm:$0xff] }
 0x229   :  { %v1031_v6 = vadd.f32 %v5250_v32, %v902_v43  ;;  %7732 = vst [vmem:[#allocation88_spill] sm:$0xff] %v5499_v10 }
 0x22a   :  { %4011 = vmatmul.msk.f32.gmra.mxu2 %vm1140_vm0, %v1011_v57  ;;  %v5528_v9 = vpop.f32.mrf.mxu2 }
 0x22b   :  { %4019 = vmatmul.msk.f32.gmra.mxu3 %vm1140_vm0, %v1031_v6 }
 0x22e   :  { %v904_v32 = vpop.f32.mrf.mxu1 }
 0x22f   :  { %v905_v54 = vadd.f32 %v904_v32, %v4778_v22  ;;  %v7739_v32 = vld [vmem:[#allocation38_spill] sm:$0xff] }
 0x231   :  { %v1034_v58 = vadd.f32 %v5266_v42, %v905_v54  ;;  %943 = vmatmul.bf16.gmra.mxu1 %v5499_v10  ;;  %v4252_v42 = vld [vmem:[%s7485_s0 + $0x214] sm:$0xf] }
 0x232   :  { %4012 = vmatmul.msk.f32.gmra.mxu2 %vm1140_vm0, %v1014_v38  ;;  %v5524_v62 = vor.u32 %v4252_v42, %v3878_v3 }
 0x233   :  { %4020 = vmatmul.msk.f32.gmra.mxu3 %vm1140_vm0, %v1034_v58  ;;  %v7740_v58 = vld [vmem:[#allocation42_spill] sm:$0xff] }
 0x234   :  { %7733 = vst [vmem:[#allocation89_spill] sm:$0xff] %v5524_v62 }
 0x236   :  { %v906_v12 = vpop.f32.mrf.mxu1 }
 0x237   :  { %v907_v21 = vadd.f32 %v906_v12, %v4790_v28 }
 0x239   :  { %v1036_v22 = vadd.f32 %v5276_v13, %v907_v21  ;;  %v1019_v13 = vadd.f32 %v5146_v52, %v890_v25  ;;  %v4255_v52 = vld [vmem:[%s7485_s0 + $0x22c] sm:$0xf] }
 0x23a   :  { %4013 = vmatmul.msk.f32.gmra.mxu2 %vm1140_vm0, %v1016_v37  ;;  %v7741_v37 = vld [vmem:[#allocation43_spill] sm:$0xff] }
 0x23b   :  { %4021 = vmatmul.msk.f32.gmra.mxu3 %vm1140_vm0, %v1036_v22 }
 0x23e   :  { %v909_v28 = vpop.f32.mrf.mxu1 }
 0x23f   :  { %v910_v29 = vadd.f32 %v909_v28, %v4825_v47  ;;  %v3890_v47 = vld [vmem:[%s7485_s0 + $0x234] sm:$0xf0] }
 0x241   :  { %v1039_v59 = vadd.f32 %v5290_v35, %v910_v29  ;;  %948 = vmatmul.bf16.gmra.mxu1 %v5524_v62  ;;  %v5543_v35 = vor.u32 %v4255_v52, %v3890_v47 }
 0x242   :  { %4014 = vmatmul.msk.f32.gmra.mxu2 %vm1140_vm0, %v1019_v13  ;;  %v7743_v13 = vld [vmem:[#allocation48_spill] sm:$0xff] }
 0x243   :  { %4022 = vmatmul.msk.f32.gmra.mxu3 %vm1140_vm0, %v1039_v59  ;;  %7734 = vst [vmem:[#allocation90_spill] sm:$0xff] %v5543_v35 }
 0x246   :  { %v911_v14 = vpop.f32.mrf.mxu1 }
 0x247   :  { %v912_v4 = vadd.f32 %v911_v14, %v4831_v49 }
 0x249   :  { %v1041_v11 = vadd.f32 %v5307_v19, %v912_v4  ;;  %v7735_v19 = vld [vmem:[#allocation28_spill] sm:$0xff] }
 0x24a   :  { %v7744_v4 = vld [vmem:[#allocation52_spill] sm:$0xff] }
 0x24b   :  { %4023 = vmatmul.msk.f32.gmra.mxu3 %vm1140_vm0, %v1041_v11 }
 0x24e   :  { %v914_v17 = vpop.f32.mrf.mxu1 }
 0x24f   :  { %v915_v34 = vadd.f32 %v914_v17, %v4860_v2  ;;  %v7745_v17 = vld [vmem:[#allocation53_spill] sm:$0xff] }
 0x251   :  { %v1044_v27 = vadd.f32 %v5317_v50, %v915_v34  ;;  %953 = vmatmul.bf16.gmra.mxu1 %v5543_v35  ;;  %v7737_v50 = vld [vmem:[#allocation33_spill] sm:$0xff] }
 0x253   :  { %4024 = vmatmul.msk.f32.gmra.mxu3 %vm1140_vm0, %v1044_v27 }
 0x256   :  { %v916_v49 = vpop.f32.mrf.mxu1 }
 0x257   :  { %v917_v60 = vadd.f32 %v916_v49, %v7735_v19  ;;  %v7746_v19 = vld [vmem:[#allocation57_spill] sm:$0xff] }
 0x259   :  { %v1046_v44 = vadd.f32 %v5333_v41, %v917_v60 }
 0x25b   :  { %4025 = vmatmul.msk.f32.gmra.mxu3 %vm1140_vm0, %v1046_v44 }
 0x25e   :  { %v919_v45 = vpop.f32.mrf.mxu1 }
 0x25f   :  { %v920_v20 = vadd.f32 %v919_v45, %v7736_v30  ;;  %v7747_v30 = vld [vmem:[#allocation58_spill] sm:$0xff] }
 0x261   :  { %v1049_v61 = vadd.f32 %v5341_v39, %v920_v20 }
 0x263   :  { %4026 = vmatmul.msk.f32.gmra.mxu3 %vm1140_vm0, %v1049_v61 }
 0x266   :  { %v921_v2 = vpop.f32.mrf.mxu1 }
 0x267   :  { %v922_v57 = vadd.f32 %v921_v2, %v7737_v50  ;;  %v1137_v50 = vld [vmem:[%s7487_s2 + $0x8] sm:$0xff] }
 0x268   :  { %1604 = vmatpush.msrb.mxu3 %v1137_v50 }
 0x269   :  { %v1051_v43 = vadd.f32 %v5359_v16, %v922_v57  ;;  %v7748_v57 = vld [vmem:[#allocation62_spill] sm:$0xff] }
 0x26b   :  { %4027 = vmatmul.msk.f32.gmra.mxu3 %vm1140_vm0, %v1051_v43 }
 0x26e   :  { %v924_v6 = vpop.f32.mrf.mxu1 }
 0x26f   :  { %v925_v5 = vadd.f32 %v924_v6, %v7738_v26 }
 0x271   :  { %v1054_v41 = vadd.f32 %v5374_v15, %v925_v5 }
 0x273   :  { %4028 = vmatmul.msk.f32.gmra.mxu3 %vm1140_vm0, %v1054_v41  ;;  %v7749_v41 = vld [vmem:[#allocation63_spill] sm:$0xff] }
 0x276   :  { %v926_v8 = vpop.f32.mrf.mxu1 }
 0x277   :  { %v927_v38 = vadd.f32 %v926_v8, %v7739_v32 }
 0x279   :  { %v1056_v39 = vadd.f32 %v5389_v33, %v927_v38  ;;  %v7742_v33 = vld [vmem:[#allocation47_spill] sm:$0xff] }
 0x27b   :  { %4029 = vmatmul.msk.f32.gmra.mxu3 %vm1140_vm0, %v1056_v39 }
 0x27e   :  { %v929_v54 = vpop.f32.mrf.mxu1 }
 0x27f   :  { %v930_v24 = vadd.f32 %v929_v54, %v7740_v58  ;;  %v7750_v58 = vld [vmem:[#allocation67_spill] sm:$0xff] }
 0x281   :  { %v1059_v16 = vadd.f32 %v5406_v55, %v930_v24 }
 0x283   :  { %4030 = vmatmul.msk.f32.gmra.mxu3 %vm1140_vm0, %v1059_v16 }
 0x286   :  { %v931_v12 = vpop.f32.mrf.mxu1 }
 0x287   :  { %v932_v21 = vadd.f32 %v931_v12, %v7741_v37  ;;  %v7751_v37 = vld [vmem:[#allocation68_spill] sm:$0xff] }
 0x289   :  { %v1061_v15 = vadd.f32 %v5424_v51, %v932_v21 }
 0x28b   :  { %4031 = vmatmul.msk.f32.gmra.mxu3 %vm1140_vm0, %v1061_v15 }
 0x28e   :  { %v934_v22 = vpop.f32.mrf.mxu1  ;;  %v5570_v42 = vpop.f32.mrf.mxu3 }
 0x28f   :  { %v935_v3 = vadd.f32 %v934_v22, %v7742_v33  ;;  %v125_v33 = vld [vmem:[%s7484_s1] sm:$0xff]  }
 0x291   :  { %v1064_v25 = vadd.f32 %v5434_v23, %v935_v3 }
 0x293   :  { %4032 = vmatmul.msk.f32.gmra.mxu3 %vm1140_vm0, %v1064_v25  ;;  %v1088_v25 = vunpack.c.l.bf16 %v125_v33 }
 0x296   :  { %v936_v28 = vpop.f32.mrf.mxu1  ;;  %v5575_v55 = vpop.f32.mrf.mxu3 }
 0x297   :  { %v937_v29 = vadd.f32 %v936_v28, %v7743_v13  ;;  %v1089_v13 = vunpack.c.h.bf16 %v125_v33 }
 0x299   :  { %v1066_v59 = vadd.f32 %v5450_v53, %v937_v29  ;;  %v127_v29 = vld [vmem:[%s7484_s1 + $0x8] sm:$0xff]  }
 0x29b   :  { %4033 = vmatmul.msk.f32.gmra.mxu3 %vm1140_vm0, %v1066_v59 }
 0x29e   :  { %v939_v51 = vpop.f32.mrf.mxu1  ;;  %v5580_v14 = vpop.f32.mrf.mxu3 }
 0x29f   :  { %v940_v11 = vadd.f32 %v939_v51, %v7744_v4  ;;  %v1090_v51 = vunpack.c.l.bf16 %v127_v29 }
 0x2a1   :  { %v1069_v52 = vadd.f32 %v5459_v63, %v940_v11  ;;  %v1091_v11 = vunpack.c.h.bf16 %v127_v29 }
 0x2a3   :  { %4034 = vmatmul.msk.f32.gmra.mxu3 %vm1140_vm0, %v1069_v52  ;;  %v129_v52 = vld [vmem:[%s7484_s1 + $0x10] sm:$0xff]  }
 0x2a6   :  { %v941_v23 = vpop.f32.mrf.mxu1  ;;  %v5585_v47 = vpop.f32.mrf.mxu3 }
 0x2a7   :  { %v942_v34 = vadd.f32 %v941_v23, %v7745_v17  ;;  %v1092_v17 = vunpack.c.l.bf16 %v129_v52 }
 0x2a9   :  { %v1071_v27 = vadd.f32 %v5481_v1, %v942_v34 }
 0x2ab   :  { %4035 = vmatmul.msk.f32.gmra.mxu3 %vm1140_vm0, %v1071_v27  ;;  %v1093_v27 = vunpack.c.h.bf16 %v129_v52 }
 0x2ae   :  { %v944_v53 = vpop.f32.mrf.mxu1  ;;  %v5590_v49 = vpop.f32.mrf.mxu3 }
 0x2af   :  { %v945_v60 = vadd.f32 %v944_v53, %v7746_v19  ;;  %v131_v53 = vld [vmem:[%s7484_s1 + $0x18] sm:$0xff]  }
 0x2b1   :  { %v1074_v44 = vadd.f32 %v5497_v56, %v945_v60  ;;  %v1136_v56 = vld [vmem:[%s7487_s2] sm:$0xff]  ;;  %v1094_v60 = vunpack.c.l.bf16 %v131_v53 }
 0x2b2   :  { %1605 = vmatpush.msrb.mxu3 %v1136_v56  ;;  %v135_v56 = vld [vmem:[%s7484_s1 + $0x28] sm:$0xff]  }
 0x2b3   :  { %4036 = vmatmul.msk.f32.gmra.mxu3 %vm1140_vm0, %v1074_v44 }
 0x2b6   :  { %v946_v63 = vpop.f32.mrf.mxu1  ;;  %v5595_v45 = vpop.f32.mrf.mxu3 }
 0x2b7   :  { %v947_v20 = vadd.f32 %v946_v63, %v7747_v30  ;;  %v1095_v63 = vunpack.c.h.bf16 %v131_v53  ;;  %v133_v30 = vld [vmem:[%s7484_s1 + $0x20] sm:$0xff]   ;;  %v144_v53 = vld [vmem:[%s7484_s1 + $0x4c] sm:$0xff]  }
 0x2b8   :  { %v1097_v50 = vunpack.c.h.bf16 %v133_v30 }
 0x2b9   :  { %v1076_v61 = vadd.f32 %v5510_v46, %v947_v20  ;;  %v1080_v46 = vpop.f32.mrf.mxu2 }
 0x2bb   :  { %4037 = vmatmul.msk.f32.gmra.mxu3 %vm1140_vm0, %v1076_v61  ;;  %v1096_v61 = vunpack.c.l.bf16 %v133_v30 }
 0x2be   :  { %v949_v1 = vpop.f32.mrf.mxu1  ;;  %v5600_v2 = vpop.f32.mrf.mxu3 }
 0x2bf   :  { %v950_v43 = vadd.f32 %v949_v1, %v7748_v57 }
 0x2c1   :  { %v1079_v6 = vadd.f32 %v5528_v9, %v950_v43  ;;  %v1083_v38 = vpop.f32.mrf.mxu2  ;;  %v1098_v43 = vunpack.c.l.bf16 %v135_v56 }
 0x2c3   :  { %4038 = vmatmul.msk.f32.gmra.mxu3 %vm1140_vm0, %v1079_v6 }
 0x2c6   :  { %v951_v26 = vpop.f32.mrf.mxu1  ;;  %v5611_v5 = vpop.f32.mrf.mxu3 }
 0x2c7   :  { %v952_v8 = vadd.f32 %v951_v26, %v7749_v41  ;;  %v137_v26 = vld [vmem:[%s7484_s1 + $0x30] sm:$0xff]  }
 0x2c9   :  { %v1081_v32 = vadd.f32 %v1080_v46, %v952_v8  ;;  %v1085_v15 = vpop.f32.mrf.mxu2  ;;  %v1099_v46 = vunpack.c.h.bf16 %v135_v56  ;;  %v1100_v8 = vunpack.c.l.bf16 %v137_v26 }
 0x2cb   :  { %4039 = vmatmul.msk.f32.gmra.mxu3 %vm1140_vm0, %v1081_v32 }
 0x2ce   :  { %v954_v39 = vpop.f32.mrf.mxu1  ;;  %v5615_v54 = vpop.f32.mrf.mxu3 }
 0x2cf   :  { %v955_v24 = vadd.f32 %v954_v39, %v7750_v58  ;;  %v139_v58 = vld [vmem:[%s7484_s1 + $0x38] sm:$0xff]  }
 0x2d1   :  { %v1084_v16 = vadd.f32 %v1083_v38, %v955_v24  ;;  %v1101_v38 = vunpack.c.h.bf16 %v137_v26  ;;  %v5685_v39 = vpop.f32.mrf.mxu2 }
 0x2d3   :  { %4040 = vmatmul.msk.f32.gmra.mxu3 %vm1140_vm0, %v1084_v16  ;;  %v1102_v16 = vunpack.c.l.bf16 %v139_v58 }
 0x2d6   :  { %v956_v9 = vpop.f32.mrf.mxu1  ;;  %v5619_v12 = vpop.f32.mrf.mxu3 }
 0x2d7   :  { %v957_v21 = vadd.f32 %v956_v9, %v7751_v37 }
 0x2d9   :  { %v1086_v22 = vadd.f32 %v1085_v15, %v957_v21  ;;  %v5693_v9 = vpop.f32.mrf.mxu2  ;;  %v1103_v21 = vunpack.c.h.bf16 %v139_v58 }
 0x2db   :  { %4041 = vmatmul.msk.f32.gmra.mxu3 %vm1140_vm0, %v1086_v22  ;;  %v141_v22 = vld [vmem:[%s7484_s1 + $0x40] sm:$0xf] }
 0x2de   :  { %v5626_v3 = vpop.f32.mrf.mxu3 }
 0x2e1   :  { %v5699_v15 = vpop.f32.mrf.mxu2 }
 0x2e3   :  { %4042 = vmatmul.msk.f32.vlgmr.msrb.gmra.mxu3 %vm1140_vm0, %v1088_v25  ;;  %v1104_v25 = vunpack.c.l.bf16 %v141_v22 }
 0x2e6   :  { %v5629_v28 = vpop.f32.mrf.mxu3 }
 0x2e7   :  { %7752 = vst [vmem:[#allocation28_spill] sm:$0xff] %v5629_v28 }
 0x2e9   :  { %v5710_v29 = vpop.f32.mrf.mxu2 }
 0x2eb   :  { %4043 = vmatmul.msk.f32.gmra.mxu3 %vm1140_vm0, %v1089_v13  ;;  %v142_v13 = vld [vmem:[%s7484_s1 + $0x44] sm:$0xff]  }
 0x2ee   :  { %v5635_v59 = vpop.f32.mrf.mxu3 }
 0x2ef   :  { %7753 = vst [vmem:[#allocation32_spill] sm:$0xff] %v5635_v59 }
 0x2f3   :  { %4044 = vmatmul.msk.f32.gmra.mxu3 %vm1140_vm0, %v1090_v51 }
 0x2f6   :  { %v5638_v4 = vpop.f32.mrf.mxu3 }
 0x2f7   :  { %7754 = vst [vmem:[#allocation33_spill] sm:$0xff] %v5638_v4 }
 0x2fb   :  { %4045 = vmatmul.msk.f32.gmra.mxu3 %vm1140_vm0, %v1091_v11  ;;  %v1105_v11 = vunpack.c.l.bf16 %v142_v13 }
 0x2fe   :  { %v5644_v23 = vpop.f32.mrf.mxu3 }
 0x2ff   :  { %7755 = vst [vmem:[#allocation37_spill] sm:$0xff] %v5644_v23 }
 0x303   :  { %4046 = vmatmul.msk.f32.gmra.mxu3 %vm1140_vm0, %v1092_v17  ;;  %v1106_v17 = vunpack.c.h.bf16 %v142_v13 }
 0x306   :  { %v5647_v34 = vpop.f32.mrf.mxu3 }
 0x307   :  { %7756 = vst [vmem:[#allocation38_spill] sm:$0xff] %v5647_v34 }
 0x30b   :  { %4047 = vmatmul.msk.f32.gmra.mxu3 %vm1140_vm0, %v1093_v27  ;;  %v5717_v27 = vpop.f32.mrf.mxu2 }
 0x30e   :  { %v5653_v19 = vpop.f32.mrf.mxu3 }
 0x30f   :  { %7757 = vst [vmem:[#allocation42_spill] sm:$0xff] %v5653_v19 }
 0x313   :  { %4048 = vmatmul.msk.f32.gmra.mxu3 %vm1140_vm0, %v1094_v60  ;;  %v5725_v30 = vpop.f32.mrf.mxu2 }
 0x316   :  { %v5656_v44 = vpop.f32.mrf.mxu3 }
 0x31b   :  { %4049 = vmatmul.msk.f32.gmra.mxu3 %vm1140_vm0, %v1095_v63  ;;  %v1107_v63 = vunpack.c.l.bf16 %v144_v53  ;;  %v5731_v56 = vpop.f32.mrf.mxu2 }
 0x31e   :  { %v5662_v20 = vpop.f32.mrf.mxu3 }
 0x323   :  { %4050 = vmatmul.msk.f32.gmra.mxu3 %vm1140_vm0, %v1096_v61 }
 0x326   :  { %v5665_v1 = vpop.f32.mrf.mxu3 }
 0x32b   :  { %4051 = vmatmul.msk.f32.gmra.mxu3 %vm1140_vm0, %v1097_v50  ;;  %v1108_v50 = vunpack.c.h.bf16 %v144_v53  ;;  %v150_v53 = vld [vmem:[%s7484_s1 + $0x64] sm:$0xff]  }
 0x32e   :  { %v5671_v57 = vpop.f32.mrf.mxu3 }
 0x333   :  { %4052 = vmatmul.msk.f32.gmra.mxu3 %vm1140_vm0, %v1098_v43  ;;  %v146_v43 = vld [vmem:[%s7484_s1 + $0x54] sm:$0xff]  }
 0x334   :  { %v1109_v26 = vunpack.c.l.bf16 %v146_v43  ;;  %v1110_v58 = vunpack.c.h.bf16 %v146_v43 }
 0x336   :  { %v5674_v6 = vpop.f32.mrf.mxu3 }
 0x33b   :  { %4053 = vmatmul.msk.f32.gmra.mxu3 %vm1140_vm0, %v1099_v46 }
 0x33e   :  { %v5680_v41 = vpop.f32.mrf.mxu3 }
 0x343   :  { %4054 = vmatmul.msk.f32.gmra.mxu3 %vm1140_vm0, %v1100_v8  ;;  %v5739_v8 = vpop.f32.mrf.mxu2 }
 0x346   :  { %v5683_v32 = vpop.f32.mrf.mxu3 }
 0x34b   :  { %4055 = vmatmul.msk.f32.gmra.mxu3 %vm1140_vm0, %v1101_v38 }
 0x34e   :  { %v5691_v24 = vpop.f32.mrf.mxu3 }
 0x353   :  { %4056 = vmatmul.msk.f32.gmra.mxu3 %vm1140_vm0, %v1102_v16  ;;  %v148_v16 = vld [vmem:[%s7484_s1 + $0x5c] sm:$0xff]  }
 0x354   :  { %v1111_v22 = vunpack.c.l.bf16 %v148_v16 }
 0x356   :  { %v5696_v37 = vpop.f32.mrf.mxu3 }
 0x35b   :  { %4057 = vmatmul.msk.f32.gmra.mxu3 %vm1140_vm0, %v1103_v21 }
 0x35e   :  { %v5704_v33 = vpop.f32.mrf.mxu3 }
 0x363   :  { %4058 = vmatmul.msk.f32.gmra.mxu3 %vm1140_vm0, %v1104_v25  ;;  %v1326_v25 = vpop.f32.mrf.mxu2 }
 0x366   :  { %v5712_v51 = vpop.f32.mrf.mxu3 }
 0x36b   :  { %4059 = vmatmul.msk.f32.gmra.mxu3 %vm1140_vm0, %v1105_v11  ;;  %v1112_v11 = vunpack.c.h.bf16 %v148_v16  ;;  %v152_v16 = vld [vmem:[%s7484_s1 + $0x6c] sm:$0xff]  }
 0x36c   :  { %v1116_v10 = vunpack.c.h.bf16 %v152_v16 }
 0x36e   :  { %v5715_v52 = vpop.f32.mrf.mxu3 }
 0x373   :  { %4060 = vmatmul.msk.f32.gmra.mxu3 %vm1140_vm0, %v1106_v17  ;;  %v1329_v17 = vpop.f32.mrf.mxu2 }
 0x376   :  { %v5723_v60 = vpop.f32.mrf.mxu3 }
 0x37b   :  { %4061 = vmatmul.msk.f32.gmra.mxu3 %vm1140_vm0, %v1107_v63  ;;  %v1332_v43 = vpop.f32.mrf.mxu2 }
 0x37e   :  { %v5728_v61 = vpop.f32.mrf.mxu3 }
 0x383   :  { %4062 = vmatmul.msk.f32.gmra.mxu3 %vm1140_vm0, %v1108_v50  ;;  %v1113_v50 = vunpack.c.l.bf16 %v150_v53 }
 0x386   :  { %v5736_v46 = vpop.f32.mrf.mxu3 }
 0x38b   :  { %4063 = vmatmul.msk.f32.gmra.mxu3 %vm1140_vm0, %v1109_v26 }
 0x38e   :  { %v5741_v38 = vpop.f32.mrf.mxu3 }
 0x393   :  { %4064 = vmatmul.msk.f32.gmra.mxu3 %vm1140_vm0, %v1110_v58  ;;  %v1114_v58 = vunpack.c.h.bf16 %v150_v53  ;;  %v154_v53 = vld [vmem:[%s7484_s1 + $0x74] sm:$0xff]  }
 0x394   :  { %v1118_v7 = vunpack.c.h.bf16 %v154_v53 }
 0x396   :  { %v5747_v21 = vpop.f32.mrf.mxu3 }
 0x39b   :  { %4065 = vmatmul.msk.f32.gmra.mxu3 %vm1140_vm0, %v1111_v22  ;;  %v1335_v22 = vpop.f32.mrf.mxu2 }
 0x39e   :  { %v1628_v13 = vpop.f32.mrf.mxu3 }
 0x3a3   :  { %4066 = vmatmul.msk.f32.gmra.mxu3 %vm1140_vm0, %v1112_v11  ;;  %v1115_v11 = vunpack.c.l.bf16 %v152_v16  ;;  %v1338_v18 = vpop.f32.mrf.mxu2  ;;  %v156_v16 = vld [vmem:[%s7484_s1 + $0x7c] sm:$0xff]  }
 0x3a4   :  { %v1120_v23 = vunpack.c.h.bf16 %v156_v16 }
 0x3a6   :  { %v1631_v63 = vpop.f32.mrf.mxu3 }
 0x3ab   :  { %4067 = vmatmul.msk.f32.gmra.mxu3 %vm1140_vm0, %v1113_v50  ;;  %v1341_v31 = vpop.f32.mrf.mxu2 }
 0x3ae   :  { %v1634_v26 = vpop.f32.mrf.mxu3 }
 0x3b3   :  { %4068 = vmatmul.msk.f32.gmra.mxu3 %vm1140_vm0, %v1114_v58  ;;  %v1117_v58 = vunpack.c.l.bf16 %v154_v53  ;;  %v1344_v48 = vpop.f32.mrf.mxu2 }
 0x3b6   :  { %v1637_v35 = vpop.f32.mrf.mxu3 }
 0x3bb   :  { %4069 = vmatmul.msk.f32.gmra.mxu3 %vm1140_vm0, %v1115_v11  ;;  %v1347_v28 = vpop.f32.mrf.mxu2 }
 0x3be   :  { %v1640_v62 = vpop.f32.mrf.mxu3 }
 0x3bf   :  { %v1641_v34 = vadd.f32 %v1640_v62, %v1335_v22 }
 0x3c1   :  { %v5794_v62 = vadd.f32 %v5773_v40, %v1641_v34  ;;  %v1629_v34 = vadd.f32 %v1628_v13, %v5739_v8  ;;  %v1623_v13 = vadd.f32 %v5741_v38, %v5725_v30 }
 0x3c3   :  { %4070 = vmatmul.msk.f32.gmra.mxu3 %vm1140_vm0, %v1116_v10  ;;  %v1119_v10 = vunpack.c.l.bf16 %v156_v16  ;;  %v5826_v16 = vadd.f32 %v5773_v40, %v1629_v34 }
 0x3c6   :  { %v1643_v50 = vpop.f32.mrf.mxu3 }
 0x3c7   :  { %v1644_v59 = vadd.f32 %v1643_v50, %v1338_v18  ;;  %v1635_v18 = vadd.f32 %v1634_v26, %v1329_v17  ;;  %v7569_v50 = vmax.f32 %v5794_v62, 0.0 }
 0x3c9   :  { %v5809_v26 = vadd.f32 %v5773_v40, %v1635_v18  ;;  %v1617_v18 = vadd.f32 %v5728_v61, %v5710_v29  ;;  %v160_v61 = vld [vmem:[%s7484_s1 + $0x8c] sm:$0xff]  }
 0x3cb   :  { %4071 = vmatmul.msk.f32.gmra.mxu3 %vm1140_vm0, %v1117_v58  ;;  %v5864_v34 = vadd.f32 %v5773_v40, %v1617_v18 }
 0x3ce   :  { %v1646_v0 = vpop.f32.mrf.mxu3 }
 0x3cf   :  { %v1647_v58 = vadd.f32 %v1646_v0, %v1341_v31  ;;  %v158_v31 = vld [vmem:[%s7484_s1 + $0x84] sm:$0xff]  }
 0x3d0   :  { %v1122_v30 = vunpack.c.h.bf16 %v158_v31 }
 0x3d1   :  { %v5779_v19 = vadd.f32 %v5773_v40, %v1647_v58 }
 0x3d3   :  { %4072 = vmatmul.msk.f32.gmra.mxu3 %vm1140_vm0, %v1118_v7 }
 0x3d6   :  { %v1649_v11 = vpop.f32.mrf.mxu3 }
 0x3d7   :  { %v1650_v36 = vadd.f32 %v1649_v11, %v1344_v48  ;;  %v1638_v11 = vadd.f32 %v1637_v35, %v1332_v43  ;;  %v1121_v43 = vunpack.c.l.bf16 %v158_v31 }
 0x3d9   :  { %v5776_v7 = vadd.f32 %v5773_v40, %v1650_v36 }
 0x3db   :  { %4073 = vmatmul.msk.f32.gmra.mxu3 %vm1140_vm0, %v1119_v10  ;;  %7758 = vst [vmem:[#allocation43_spill] sm:$0xff] %v5776_v7  ;;  %v5785_v10 = vadd.f32 %v5773_v40, %v1644_v59  ;;  %v7566_v0 = vmax.f32 %v5776_v7, 0.0 }
 0x3dd   :  { %v7568_v17 = vmax.f32 %v5785_v10, 0.0 }
 0x3de   :  { %v1652_v53 = vpop.f32.mrf.mxu3 }
 0x3df   :  { %v1653_v4 = vadd.f32 %v1652_v53, %v1347_v28  ;;  %v7567_v28 = vmax.f32 %v5779_v19, 0.0  ;;  %v1620_v53 = vadd.f32 %v5736_v46, %v5717_v27  ;;  %v7573_v27 = vmax.f32 %v5826_v16, 0.0 }
 0x3e0   :  { %v1614_v46 = vadd.f32 %v5723_v60, %v5699_v15 }
 0x3e1   :  { %v5782_v48 = vadd.f32 %v5773_v40, %v1653_v4  ;;  %v1632_v4 = vadd.f32 %v1631_v63, %v1326_v25  ;;  %v1857_v22 = vpack.c.bf16 %v7567_v28, %v7568_v17  ;;  %v1626_v25 = vadd.f32 %v5747_v21, %v5731_v56  ;;  %v7761_v28 = vld [vmem:[#allocation25_spill] sm:$0xff] }
 0x3e2   :  { %v7571_v56 = vmax.f32 %v5809_v26, 0.0  ;;  %v5854_v31 = vadd.f32 %v5773_v40, %v1620_v53 }
 0x3e3   :  { %7759 = vst [vmem:[#allocation47_spill] sm:$0xff] %v5782_v48  ;;  %4074 = vmatmul.msk.f32.gmra.mxu3 %vm1140_vm0, %v1120_v23  ;;  %v7565_v36 = vmax.f32 %v5782_v48, 0.0  ;;  %v5804_v23 = vadd.f32 %v5773_v40, %v1638_v11  ;;  %v5819_v63 = vadd.f32 %v5773_v40, %v1632_v4  ;;  %v5838_v11 = vadd.f32 %v5773_v40, %v1626_v25 }
 0x3e4   :  { %v1608_v25 = vadd.f32 %v5712_v51, %v5685_v39 }
 0x3e5   :  { %v1858_v35 = vpack.c.bf16 %v7565_v36, %v7566_v0  ;;  %v7570_v8 = vmax.f32 %v5804_v23, 0.0  ;;  %v7572_v38 = vmax.f32 %v5819_v63, 0.0  ;;  %v7574_v29 = vmax.f32 %v5838_v11, 0.0  ;;  %v7760_v36 = vld [vmem:[#allocation22_spill] sm:$0xff] }
 0x3e6   :  { %v5801_v59 = vpop.f32.mrf.mxu3  ;;  %v5888_v18 = vadd.f32 %v5773_v40, %v1608_v25 }
 0x3e7   :  { %1875 = vmatpush.bf16.msrb.mxu0 %v1858_v35  ;;  %v1856_v58 = vpack.c.bf16 %v7569_v50, %v7570_v8  ;;  %v5844_v35 = vadd.f32 %v5773_v40, %v1623_v13  ;;  %v1855_v4 = vpack.c.bf16 %v7571_v56, %v7572_v38  ;;  %v1854_v15 = vpack.c.bf16 %v7573_v27, %v7574_v29 }
 0x3e8   :  { %v5876_v13 = vadd.f32 %v5773_v40, %v1614_v46 }
 0x3e9   :  { %v7575_v60 = vmax.f32 %v5844_v35, 0.0 }
 0x3ea   :  { %v7578_v39 = vmax.f32 %v5876_v13, 0.0 }
 0x3eb   :  { %4075 = vmatmul.msk.f32.gmra.mxu3 %vm1140_vm0, %v1121_v43  ;;  %1876 = vmatpush.bf16.msrb.mxu0 %v1857_v22  ;;  %v1611_v43 = vadd.f32 %v5715_v52, %v5693_v9  ;;  %v1123_v9 = vunpack.c.l.bf16 %v160_v61  ;;  %v7576_v52 = vmax.f32 %v5854_v31, 0.0 }
 0x3ed   :  { %v1853_v53 = vpack.c.bf16 %v7575_v60, %v7576_v52 }
 0x3ee   :  { %v5833_v21 = vpop.f32.mrf.mxu3 }
 0x3ef   :  { %1877 = vmatpush.bf16.msrb.mxu0 %v1856_v58  ;;  %v5880_v58 = vadd.f32 %v5773_v40, %v1611_v43  ;;  %v1124_v43 = vunpack.c.h.bf16 %v160_v61 }
 0x3f3   :  { %4076 = vmatmul.msk.f32.gmra.mxu3 %vm1140_vm0, %v1122_v30  ;;  %1878 = vmatpush.bf16.msrb.mxu0 %v1855_v4  ;;  %v7577_v30 = vmax.f32 %v5864_v34, 0.0  ;;  %v7579_v4 = vmax.f32 %v5880_v58, 0.0 }
 0x3f5   :  { %v1852_v51 = vpack.c.bf16 %v7577_v30, %v7578_v39 }
 0x3f6   :  { %v5871_v22 = vpop.f32.mrf.mxu3 }
 0x3f7   :  { %1879 = vmatpush.bf16.msrb.mxu0 %v1854_v15  ;;  %v7580_v15 = vmax.f32 %v5888_v18, 0.0 }
 0x3f9   :  { %v1851_v25 = vpack.c.bf16 %v7579_v4, %v7580_v15 }
 0x3fb   :  { %4077 = vmatmul.msk.f32.gmra.mxu3 %vm1140_vm0, %v1123_v9  ;;  %1880 = vmatpush.bf16.msrb.mxu0 %v1853_v53  ;;  %v162_v9 = vld [vmem:[%s7484_s1 + $0x94] sm:$0xff]  }
 0x3fc   :  { %v1126_v0 = vunpack.c.h.bf16 %v162_v9 }
 0x3fe   :  { %v5897_v46 = vpop.f32.mrf.mxu3 }
 0x3ff   :  { %1881 = vmatpush.bf16.msrb.mxu0 %v1852_v51  ;;  %v1125_v51 = vunpack.c.l.bf16 %v162_v9  ;;  %v166_v9 = vld [vmem:[%s7484_s1 + $0xa4] sm:$0xff]  }
 0x400   :  { %v1129_v8 = vunpack.c.l.bf16 %v166_v9  ;;  %v1130_v38 = vunpack.c.h.bf16 %v166_v9  ;;  %v5938_v9 = vpop.f32.mrf.mxu2 }
 0x403   :  { %4078 = vmatmul.msk.f32.gmra.mxu3 %vm1140_vm0, %v1124_v43  ;;  %1882 = vmatpush.bf16.msrb.mxu0 %v1851_v25  ;;  %v164_v43 = vld [vmem:[%s7484_s1 + $0x9c] sm:$0xff]  }
 0x404   :  { %v1127_v17 = vunpack.c.l.bf16 %v164_v43  ;;  %v1128_v50 = vunpack.c.h.bf16 %v164_v43 }
 0x406   :  { %v5908_v53 = vpop.f32.mrf.mxu3  ;;  %1883 = vmatmul.bf16.vlgmr.msrb.gmra.mxu0 %v7760_v36 }
 0x408   :  { %v1353_v30 = vpop.f32.mrf.mxu2 }
 0x40b   :  { %4079 = vmatmul.msk.f32.gmra.mxu3 %vm1140_vm0, %v1125_v51  ;;  %v7762_v51 = vld [vmem:[#allocation29_spill] sm:$0xff] }
 0x40e   :  { %v5912_v61 = vpop.f32.mrf.mxu3 }
 0x410   :  { %v1356_v4 = vpop.f32.mrf.mxu2 }
 0x413   :  { %4080 = vmatmul.msk.f32.gmra.mxu3 %vm1140_vm0, %v1126_v0 }
 0x416   :  { %v5918_v25 = vpop.f32.mrf.mxu3  ;;  %1888 = vmatmul.bf16.gmra.mxu0 %v7761_v28  ;;  %v168_v28 = vld [vmem:[%s7484_s1 + $0xac] sm:$0xff]  }
 0x417   :  { %v1131_v43 = vunpack.c.l.bf16 %v168_v28  ;;  %v1132_v29 = vunpack.c.h.bf16 %v168_v28 }
 0x41b   :  { %4081 = vmatmul.msk.f32.gmra.mxu3 %vm1140_vm0, %v1127_v17 }
 0x41e   :  { %v1676_v36 = vpop.f32.mrf.mxu3 }
 0x423   :  { %4082 = vmatmul.msk.f32.gmra.mxu3 %vm1140_vm0, %v1128_v50  ;;  %v7763_v50 = vld [vmem:[#allocation34_spill] sm:$0xff] }
 0x426   :  { %v1679_v0 = vpop.f32.mrf.mxu3  ;;  %1893 = vmatmul.bf16.gmra.mxu0 %v7762_v51  ;;  %v7764_v51 = vld [vmem:[#allocation39_spill] sm:$0xff] }
 0x42b   :  { %4083 = vmatmul.msk.f32.gmra.mxu3 %vm1140_vm0, %v1129_v8  ;;  %v170_v8 = vld [vmem:[%s7484_s1 + $0xb4] sm:$0xff]  }
 0x42c   :  { %v1133_v60 = vunpack.c.l.bf16 %v170_v8  ;;  %v1134_v52 = vunpack.c.h.bf16 %v170_v8 }
 0x42e   :  { %v1682_v56 = vpop.f32.mrf.mxu3 }
 0x433   :  { %4084 = vmatmul.msk.f32.gmra.mxu3 %vm1140_vm0, %v1130_v38 }
 0x436   :  { %v1685_v17 = vpop.f32.mrf.mxu3  ;;  %1898 = vmatmul.bf16.gmra.mxu0 %v7763_v50 }
 0x43b   :  { %4085 = vmatmul.msk.f32.gmra.mxu3 %vm1140_vm0, %v1131_v43  ;;  %v7765_v43 = vld [vmem:[#allocation44_spill] sm:$0xff] }
 0x43e   :  { %v1688_v27 = vpop.f32.mrf.mxu3 }
 0x43f   :  { %v1689_v7 = vadd.f32 %v1688_v27, %v5600_v2 }
 0x441   :  { %v5970_v2 = vadd.f32 %v5773_v40, %v1689_v7  ;;  %v1677_v7 = vadd.f32 %v1676_v36, %v5580_v14  ;;  %v1671_v14 = vadd.f32 %v5912_v61, %v5570_v42 }
 0x443   :  { %4086 = vmatmul.msk.f32.gmra.mxu3 %vm1140_vm0, %v1132_v29  ;;  %v172_v29 = vld [vmem:[%s7484_s1 + $0xbc] sm:$0xf]  ;;  %7770 = vst [vmem:[#allocation58_spill] sm:$0xff] %v5970_v2  ;;  %v6003_v36 = vadd.f32 %v5773_v40, %v1677_v7 }
 0x444   :  { %v1135_v39 = vunpack.c.l.bf16 %v172_v29 }
 0x445   :  { %7775 = vst [vmem:[#allocation68_spill] sm:$0xff] %v6003_v36 }
 0x446   :  { %v1691_v38 = vpop.f32.mrf.mxu3  ;;  %1903 = vmatmul.bf16.gmra.mxu0 %v7764_v51 }
 0x447   :  { %v1692_v8 = vadd.f32 %v1691_v38, %v5611_v5  ;;  %v1680_v38 = vadd.f32 %v1679_v0, %v5585_v47  ;;  %v1674_v47 = vadd.f32 %v5918_v25, %v5575_v55 }
 0x449   :  { %v5997_v0 = vadd.f32 %v5773_v40, %v1680_v38  ;;  %v7591_v38 = vmax.f32 %v6003_v36, 0.0 }
 0x44b   :  { %4087 = vmatmul.msk.f32.gmra.mxu3 %vm1140_vm0, %v1133_v60  ;;  %7774 = vst [vmem:[#allocation67_spill] sm:$0xff] %v5997_v0  ;;  %v7590_v42 = vmax.f32 %v5997_v0, 0.0  ;;  %v7791_v0 = vld [vmem:[#allocation4_spill] sm:$0xff] }
 0x44e   :  { %v1694_v50 = vpop.f32.mrf.mxu3 }
 0x44f   :  { %v1695_v60 = vadd.f32 %v1694_v50, %v5615_v54  ;;  %v5964_v54 = vadd.f32 %v5773_v40, %v1692_v8 }
 0x451   :  { %7769 = vst [vmem:[#allocation57_spill] sm:$0xff] %v5964_v54 }
 0x453   :  { %4088 = vmatmul.msk.f32.gmra.mxu3 %vm1140_vm0, %v1134_v52 }
 0x456   :  { %v1697_v28 = vpop.f32.mrf.mxu3  ;;  %1908 = vmatmul.bf16.gmra.mxu0 %v7765_v43  ;;  %v5957_v43 = vadd.f32 %v5773_v40, %v1695_v60 }
 0x457   :  { %v1698_v15 = vadd.f32 %v1697_v28, %v5619_v12  ;;  %v1686_v12 = vadd.f32 %v1685_v17, %v5595_v45  ;;  %v7771_v17 = vld [vmem:[#allocation49_spill] sm:$0xff]  ;;  %v7587_v28 = vmax.f32 %v5970_v2, 0.0 }
 0x458   :  { %7767 = vst [vmem:[#allocation52_spill] sm:$0xff] %v5957_v43  ;;  %v7585_v27 = vmax.f32 %v5957_v43, 0.0 }
 0x459   :  { %v5952_v52 = vadd.f32 %v5773_v40, %v1698_v15  ;;  %v1359_v15 = vpop.f32.mrf.mxu2  ;;  %v5982_v50 = vadd.f32 %v5773_v40, %v1686_v12 }
 0x45a   :  { %v1665_v61 = vadd.f32 %v5897_v46, %v1359_v15  ;;  %v1659_v46 = vadd.f32 %v5833_v21, %v1353_v30 }
 0x45b   :  { %4089 = vmatmul.msk.f32.gmra.mxu3 %vm1140_vm0, %v1135_v39  ;;  %7766 = vst [vmem:[#allocation48_spill] sm:$0xff] %v5952_v52  ;;  %v7584_v5 = vmax.f32 %v5952_v52, 0.0 }
 0x45c   :  { %7772 = vst [vmem:[#allocation62_spill] sm:$0xff] %v5982_v50  ;;  %v6033_v15 = vadd.f32 %v5773_v40, %v1665_v61  ;;  %v6050_v30 = vadd.f32 %v5773_v40, %v1659_v46 }
 0x45e   :  { %v1700_v51 = vpop.f32.mrf.mxu3  ;;  %7779 = vst [vmem:[#allocation34_spill] sm:$0xff] %v6033_v15  ;;  %v7595_v61 = vmax.f32 %v6033_v15, 0.0 }
 0x45f   :  { %v1701_v48 = vadd.f32 %v1700_v51, %v5626_v3  ;;  %v1683_v3 = vadd.f32 %v1682_v56, %v5590_v49  ;;  %v7586_v49 = vmax.f32 %v5964_v54, 0.0  ;;  %v7588_v51 = vmax.f32 %v5982_v50, 0.0  ;;  %v7789_v54 = vld [vmem:[#allocation2_spill] sm:$0xff] }
 0x461   :  { %v5960_v29 = vadd.f32 %v5773_v40, %v1701_v48  ;;  %v5987_v56 = vadd.f32 %v5773_v40, %v1683_v3  ;;  %v1865_v60 = vpack.c.bf16 %v7585_v27, %v7586_v49  ;;  %v1864_v12 = vpack.c.bf16 %v7587_v28, %v7588_v51  ;;  %v1362_v55 = vpop.f32.mrf.mxu2  ;;  %v7782_v27 = vld [vmem:[#allocation30_spill] sm:$0xff] }
 0x462   :  { %v1668_v3 = vadd.f32 %v5908_v53, %v1362_v55  ;;  %v1662_v53 = vadd.f32 %v5871_v22, %v1356_v4  ;;  %v7780_v22 = vld [vmem:[#allocation54_spill] sm:$0xff]  ;;  %v1656_v4 = vadd.f32 %v5801_v59, %v5938_v9  ;;  %v7597_v9 = vmax.f32 %v6050_v30, 0.0 }
 0x463   :  { %7768 = vst [vmem:[#allocation53_spill] sm:$0xff] %v5960_v29  ;;  %v7583_v39 = vmax.f32 %v5960_v29, 0.0  ;;  %v7589_v8 = vmax.f32 %v5987_v56, 0.0 }
 0x464   :  { %7773 = vst [vmem:[#allocation63_spill] sm:$0xff] %v5987_v56 }
 0x465   :  { %v1866_v45 = vpack.c.bf16 %v7583_v39, %v7584_v5  ;;  %v1863_v7 = vpack.c.bf16 %v7589_v8, %v7590_v42  ;;  %v7781_v5 = vld [vmem:[#allocation59_spill] sm:$0xff]  ;;  %v7783_v8 = vld [vmem:[#allocation64_spill] sm:$0xff] }
 0x466   :  { %v5977_v48 = vpop.f32.mrf.mxu3  ;;  %1913 = vmatmul.bf16.gmra.mxu0 %v7771_v17  ;;  %v6019_v17 = vadd.f32 %v5773_v40, %v1671_v14  ;;  %v7784_v42 = vld [vmem:[#allocation35_spill] sm:$0xff] }
 0x467   :  { %2004 = vmatpush.bf16.msra.mxu1 %v1866_v45  ;;  %v6014_v45 = vadd.f32 %v5773_v40, %v1674_v47 }
 0x468   :  { %7777 = vst [vmem:[#allocation25_spill] sm:$0xff] %v6019_v17  ;;  %v7593_v14 = vmax.f32 %v6019_v17, 0.0 }
 0x469   :  { %7776 = vst [vmem:[#allocation22_spill] sm:$0xff] %v6014_v45  ;;  %v7592_v47 = vmax.f32 %v6014_v45, 0.0 }
 0x46b   :  { %2005 = vmatpush.bf16.msra.mxu1 %v1865_v60  ;;  %v6028_v60 = vadd.f32 %v5773_v40, %v1668_v3  ;;  %v6046_v3 = vadd.f32 %v5773_v40, %v1662_v53 }
 0x46d   :  { %7778 = vst [vmem:[#allocation29_spill] sm:$0xff] %v6028_v60  ;;  %v7594_v21 = vmax.f32 %v6028_v60, 0.0  ;;  %v7596_v59 = vmax.f32 %v6046_v3, 0.0 }
 0x46e   :  { %v6010_v25 = vpop.f32.mrf.mxu3 }
 0x46f   :  { %2006 = vmatpush.bf16.msra.mxu1 %v1864_v12  ;;  %v1862_v12 = vpack.c.bf16 %v7591_v38, %v7592_v47  ;;  %v1860_v53 = vpack.c.bf16 %v7595_v61, %v7596_v59 }
 0x473   :  { %2007 = vmatpush.bf16.msra.mxu1 %v1863_v7  ;;  %v1861_v7 = vpack.c.bf16 %v7593_v14, %v7594_v21 }
 0x476   :  { %v6040_v55 = vpop.f32.mrf.mxu3  ;;  %1918 = vmatmul.bf16.gmra.mxu0 %v7780_v22  ;;  %v6058_v22 = vadd.f32 %v5773_v40, %v1656_v4 }
 0x477   :  { %2008 = vmatpush.bf16.msra.mxu1 %v1862_v12 }
 0x478   :  { %v7598_v12 = vmax.f32 %v6058_v22, 0.0 }
 0x47a   :  { %v1859_v4 = vpack.c.bf16 %v7597_v9, %v7598_v12  ;;  %v7787_v12 = vld [vmem:[#allocation72_spill] sm:$0xff] }
 0x47b   :  { %2009 = vmatpush.bf16.msra.mxu1 %v1861_v7 }
 0x47e   :  { %v6066_v46 = vpop.f32.mrf.mxu3 }
 0x47f   :  { %2010 = vmatpush.bf16.msra.mxu1 %v1860_v53 }
 0x483   :  { %v6073_v39 = vpop.f32.mrf.mxu0  ;;  %2011 = vmatpush.bf16.msra.mxu1 %v1859_v4 }
 0x486   :  { %v6075_v7 = vpop.f32.mrf.mxu3  ;;  %1923 = vmatmul.bf16.gmra.mxu0 %v7781_v5  ;;  %2012 = vmatmul.bf16.vlgmr.msra.gmra.mxu1 %v7782_v27  ;;  %v7785_v5 = vld [vmem:[#allocation69_spill] sm:$0xff]  ;;  %v7786_v27 = vld [vmem:[#allocation40_spill] sm:$0xff] }
 0x48b   :  { %v6079_v49 = vpop.f32.mrf.mxu0 }
 0x48e   :  { %v6081_v28 = vpop.f32.mrf.mxu3 }
 0x493   :  { %v6083_v51 = vpop.f32.mrf.mxu0 }
 0x496   :  { %v1721_v53 = vpop.f32.mrf.mxu3  ;;  %1928 = vmatmul.bf16.gmra.mxu0 %v7783_v8  ;;  %2017 = vmatmul.bf16.gmra.mxu1 %v7784_v42  ;;  %v7788_v8 = vld [vmem:[#allocation45_spill] sm:$0xff] }
 0x49b   :  { %v6087_v38 = vpop.f32.mrf.mxu0 }
 0x49e   :  { %v1724_v4 = vpop.f32.mrf.mxu3 }
 0x4a3   :  { %v6089_v47 = vpop.f32.mrf.mxu0 }
 0x4a6   :  { %v1727_v14 = vpop.f32.mrf.mxu3  ;;  %1933 = vmatmul.bf16.gmra.mxu0 %v7785_v5  ;;  %2022 = vmatmul.bf16.gmra.mxu1 %v7786_v27  ;;  %v7790_v5 = vld [vmem:[#allocation50_spill] sm:$0xff]  ;;  %v2269_v27 = vld [vmem:[%s7489_s6 + $0x18] sm:$0xff] }
 0x4a7   :  { %2427 = vmatpush.msra.mxu3 %v2269_v27 }
 0x4ab   :  { %v6093_v21 = vpop.f32.mrf.mxu0 }
 0x4ae   :  { %v1730_v61 = vpop.f32.mrf.mxu3 }
 0x4b3   :  { %v6095_v59 = vpop.f32.mrf.mxu0 }
 0x4b6   :  { %v1733_v9 = vpop.f32.mrf.mxu3  ;;  %1938 = vmatmul.bf16.gmra.mxu0 %v7787_v12  ;;  %2027 = vmatmul.bf16.gmra.mxu1 %v7788_v8  ;;  %v2265_v8 = vld [vmem:[%s7490_s5 + $0x18] sm:$0xff] }
 0x4b7   :  { %2732 = vmatpush.msra.mxu0 %v2265_v8 }
 0x4bb   :  { %v6099_v42 = vpop.f32.mrf.mxu0 }
 0x4be   :  { %v1736_v29 = vpop.f32.mrf.mxu3 }
 0x4bf   :  { %v1737_v15 = vadd.f32 %v1736_v29, %v5680_v41 }
 0x4c1   :  { %v6143_v41 = vadd.f32 %v5773_v40, %v1737_v15  ;;  %v1725_v15 = vadd.f32 %v1724_v4, %v5662_v20  ;;  %v7803_v20 = vld [vmem:[#allocation42_spill] sm:$0xff] }
 0x4c2   :  { %v1719_v4 = vadd.f32 %v6081_v28, %v7803_v20  ;;  %v7807_v28 = vld [vmem:[#allocation37_spill] sm:$0xff] }
 0x4c3   :  { %v6101_v52 = vpop.f32.mrf.mxu0  ;;  %7797 = vst [vmem:[#allocation59_spill] sm:$0xff] %v6143_v41 }
 0x4c6   :  { %v1739_v43 = vpop.f32.mrf.mxu3  ;;  %1943 = vmatmul.bf16.gmra.mxu0 %v7789_v54  ;;  %2032 = vmatmul.bf16.gmra.mxu1 %v7790_v5  ;;  %v7792_v54 = vld [vmem:[#allocation55_spill] sm:$0xff] }
 0x4c7   :  { %v1740_v17 = vadd.f32 %v1739_v43, %v5683_v32 }
 0x4cb   :  { %v6108_v2 = vpop.f32.mrf.mxu0 }
 0x4ce   :  { %v1742_v12 = vpop.f32.mrf.mxu3 }
 0x4cf   :  { %v1743_v27 = vadd.f32 %v1742_v12, %v5691_v24  ;;  %v6135_v24 = vadd.f32 %v5773_v40, %v1740_v17  ;;  %v7799_v17 = vld [vmem:[#allocation60_spill] sm:$0xff] }
 0x4d1   :  { %7796 = vst [vmem:[#allocation54_spill] sm:$0xff] %v6135_v24 }
 0x4d3   :  { %v6113_v50 = vpop.f32.mrf.mxu0 }
 0x4d6   :  { %v1745_v56 = vpop.f32.mrf.mxu3  ;;  %1948 = vmatmul.bf16.gmra.mxu0 %v7791_v0  ;;  %2037 = vmatmul.bf16.gmra.mxu1 %v7792_v54  ;;  %v6128_v0 = vadd.f32 %v5773_v40, %v1743_v27 }
 0x4d7   :  { %v1746_v5 = vadd.f32 %v1745_v56, %v5696_v37  ;;  %v1734_v37 = vadd.f32 %v1733_v9, %v5674_v6  ;;  %v1728_v9 = vadd.f32 %v1727_v14, %v5665_v1  ;;  %v1722_v1 = vadd.f32 %v1721_v53, %v5656_v44  ;;  %v7805_v53 = vld [vmem:[#allocation38_spill] sm:$0xff] }
 0x4d8   :  { %7794 = vst [vmem:[#allocation44_spill] sm:$0xff] %v6128_v0  ;;  %v7614_v29 = vmax.f32 %v6128_v0, 0.0 }
 0x4d9   :  { %v6123_v60 = vadd.f32 %v5773_v40, %v1746_v5  ;;  %v6154_v12 = vadd.f32 %v5773_v40, %v1734_v37  ;;  %v7616_v5 = vmax.f32 %v6143_v41, 0.0  ;;  %v6168_v14 = vadd.f32 %v5773_v40, %v1728_v9  ;;  %v7831_v41 = vld [vmem:[#allocation18_spill] sm:$0xff] }
 0x4db   :  { %v6118_v36 = vpop.f32.mrf.mxu0  ;;  %7793 = vst [vmem:[#allocation39_spill] sm:$0xff] %v6123_v60  ;;  %v7613_v32 = vmax.f32 %v6123_v60, 0.0  ;;  %v7619_v9 = vmax.f32 %v6168_v14, 0.0  ;;  %v7830_v60 = vld [vmem:[#allocation77_spill] sm:$0xff] }
 0x4dc   :  { %7800 = vst [vmem:[#allocation30_spill] sm:$0xff] %v6154_v12 }
 0x4dd   :  { %7802 = vst [vmem:[#allocation35_spill] sm:$0xff] %v6168_v14  ;;  %v7836_v14 = vld [vmem:[#allocation13_spill] sm:$0xff] }
 0x4de   :  { %v1748_v45 = vpop.f32.mrf.mxu3 }
 0x4df   :  { %v1749_v8 = vadd.f32 %v1748_v45, %v5704_v33  ;;  %v1731_v33 = vadd.f32 %v1730_v61, %v5671_v57  ;;  %v7798_v45 = vld [vmem:[#allocation6_spill] sm:$0xff]  ;;  %v7615_v57 = vmax.f32 %v6135_v24, 0.0 }
 0x4e1   :  { %v6131_v54 = vadd.f32 %v5773_v40, %v1749_v8  ;;  %v6159_v61 = vadd.f32 %v5773_v40, %v1731_v33  ;;  %v1873_v27 = vpack.c.bf16 %v7614_v29, %v7615_v57  ;;  %v7617_v8 = vmax.f32 %v6154_v12, 0.0  ;;  %v7815_v57 = vld [vmem:[#allocation28_spill] sm:$0xff]  ;;  %v7833_v12 = vld [vmem:[#allocation79_spill] sm:$0xff] }
 0x4e2   :  { %v6176_v33 = vadd.f32 %v5773_v40, %v1725_v15  ;;  %v1713_v15 = vadd.f32 %v6066_v46, %v7807_v28  ;;  %v7811_v46 = vld [vmem:[#allocation32_spill] sm:$0xff] }
 0x4e3   :  { %7795 = vst [vmem:[#allocation49_spill] sm:$0xff] %v6131_v54  ;;  %v7612_v43 = vmax.f32 %v6131_v54, 0.0  ;;  %v6139_v56 = vpop.f32.mrf.mxu0  ;;  %v1872_v44 = vpack.c.bf16 %v7616_v5, %v7617_v8  ;;  %v7819_v8 = vld [vmem:[#allocation10_spill] sm:$0xff] }
 0x4e4   :  { %7801 = vst [vmem:[#allocation64_spill] sm:$0xff] %v6159_v61  ;;  %v7620_v20 = vmax.f32 %v6176_v33, 0.0  ;;  %v6210_v28 = vadd.f32 %v5773_v40, %v1713_v15 }
 0x4e5   :  { %v1874_v6 = vpack.c.bf16 %v7612_v43, %v7613_v32  ;;  %7804 = vst [vmem:[#allocation69_spill] sm:$0xff] %v6176_v33 }
 0x4e6   :  { %1953 = vmatmul.bf16.gmra.mxu0 %v7798_v45  ;;  %2042 = vmatmul.bf16.gmra.mxu1 %v7799_v17  ;;  %v1716_v45 = vadd.f32 %v6075_v7, %v7805_v53  ;;  %v6186_v17 = vadd.f32 %v5773_v40, %v1722_v1  ;;  %v7809_v7 = vld [vmem:[#allocation33_spill] sm:$0xff]  ;;  %7812 = vst [vmem:[#allocation2_spill] sm:$0xff] %v6210_v28 }
 0x4e7   :  { %2133 = vmatpush.bf16.msra.mxu2 %v1874_v6  ;;  %v7618_v6 = vmax.f32 %v6159_v61, 0.0  ;;  %v1710_v1 = vadd.f32 %v6040_v55, %v7809_v7  ;;  %v7814_v7 = vld [vmem:[#allocation65_spill] sm:$0xff] }
 0x4e8   :  { %7806 = vst [vmem:[#allocation40_spill] sm:$0xff] %v6186_v17  ;;  %v6202_v53 = vadd.f32 %v5773_v40, %v1716_v45  ;;  %v7813_v45 = vld [vmem:[#allocation8_spill] sm:$0xff] }
 0x4e9   :  { %v1871_v43 = vpack.c.bf16 %v7618_v6, %v7619_v9  ;;  %v6222_v5 = vadd.f32 %v5773_v40, %v1710_v1  ;;  %v7821_v6 = vld [vmem:[#allocation70_spill] sm:$0xff] }
 0x4ea   :  { %7810 = vst [vmem:[#allocation45_spill] sm:$0xff] %v6202_v53 }
 0x4eb   :  { %v6171_v37 = vpop.f32.mrf.mxu0  ;;  %2134 = vmatpush.bf16.msra.mxu2 %v1873_v27  ;;  %v6192_v27 = vadd.f32 %v5773_v40, %v1719_v4  ;;  %v1707_v4 = vadd.f32 %v6010_v25, %v7811_v46  ;;  %7816 = vst [vmem:[#allocation50_spill] sm:$0xff] %v6222_v5  ;;  %v7623_v25 = vmax.f32 %v6202_v53, 0.0  ;;  %v7624_v46 = vmax.f32 %v6210_v28, 0.0  ;;  %v7841_v53 = vld [vmem:[#allocation15_spill] sm:$0xff] }
 0x4ec   :  { %v2267_v28 = vld [vmem:[%s7489_s6 + $0x8] sm:$0xff] }
 0x4ed   :  { %7808 = vst [vmem:[#allocation72_spill] sm:$0xff] %v6192_v27  ;;  %v7622_v29 = vmax.f32 %v6192_v27, 0.0  ;;  %v6226_v15 = vadd.f32 %v5773_v40, %v1707_v4 }
 0x4ef   :  { %2135 = vmatpush.bf16.msra.mxu2 %v1872_v44  ;;  %v7621_v44 = vmax.f32 %v6186_v17, 0.0  ;;  %7817 = vst [vmem:[#allocation4_spill] sm:$0xff] %v6226_v15  ;;  %v7626_v1 = vmax.f32 %v6226_v15, 0.0  ;;  %v7837_v17 = vld [vmem:[#allocation80_spill] sm:$0xff] }
 0x4f1   :  { %v1870_v55 = vpack.c.bf16 %v7620_v20, %v7621_v44 }
 0x4f3   :  { %v6205_v32 = vpop.f32.mrf.mxu0  ;;  %2136 = vmatpush.bf16.msra.mxu2 %v1871_v43  ;;  %v1704_v43 = vadd.f32 %v5977_v48, %v7815_v57  ;;  %v7625_v48 = vmax.f32 %v6222_v5, 0.0 }
 0x4f5   :  { %v1868_v4 = vpack.c.bf16 %v7624_v46, %v7625_v48  ;;  %v7826_v48 = vld [vmem:[#allocation7_spill] sm:$0xff] }
 0x4f6   :  { %1958 = vmatmul.bf16.gmra.mxu0 %v7813_v45  ;;  %2047 = vmatmul.bf16.gmra.mxu1 %v7814_v7  ;;  %v1869_v45 = vpack.c.bf16 %v7622_v29, %v7623_v25  ;;  %v6234_v7 = vadd.f32 %v5773_v40, %v1704_v43  ;;  %v7823_v29 = vld [vmem:[#allocation5_spill] sm:$0xff] }
 0x4f7   :  { %2137 = vmatpush.bf16.msra.mxu2 %v1870_v55  ;;  %v7824_v25 = vld [vmem:[#allocation73_spill] sm:$0xff] }
 0x4f8   :  { %7818 = vst [vmem:[#allocation55_spill] sm:$0xff] %v6234_v7  ;;  %v7627_v55 = vmax.f32 %v6234_v7, 0.0  ;;  %v7847_v7 = vld [vmem:[#allocation82_spill] sm:$0xff] }
 0x4fa   :  { %v1867_v40 = vpack.c.bf16 %v7626_v1, %v7627_v55  ;;  %v2264_v1 = vld [vmem:[%s7490_s5 + $0x10] sm:$0xff] }
 0x4fb   :  { %v6237_v57 = vpop.f32.mrf.mxu0  ;;  %2138 = vmatpush.bf16.msra.mxu2 %v1869_v45  ;;  %v7820_v45 = vld [vmem:[#allocation3_spill] sm:$0xff]  ;;  %2733 = vmatpush.msra.mxu0 %v2264_v1 }
 0x4fc   :  { %v7832_v1 = vld [vmem:[#allocation11_spill] sm:$0xff] }
 0x4ff   :  { %2139 = vmatpush.bf16.msra.mxu2 %v1868_v4  ;;  %v7822_v4 = vld [vmem:[#allocation12_spill] sm:$0xff] }
 0x503   :  { %v6249_v43 = vpop.f32.mrf.mxu0  ;;  %2140 = vmatpush.bf16.msra.mxu2 %v1867_v40  ;;  %v6256_v20 = vpop.f32.mrf.mxu1 }
 0x506   :  { %1963 = vmatmul.bf16.gmra.mxu0 %v7819_v8  ;;  %2141 = vmatmul.bf16.vlgmr.msra.gmra.mxu2 %v7820_v45 }
 0x507   :  { %2052 = vmatmul.bf16.gmra.mxu1 %v7821_v6  ;;  %v7825_v6 = vld [vmem:[#allocation14_spill] sm:$0xff] }
 0x50b   :  { %v6254_v9 = vpop.f32.mrf.mxu0  ;;  %v6265_v40 = vpop.f32.mrf.mxu1 }
 0x513   :  { %v6258_v44 = vpop.f32.mrf.mxu0  ;;  %v6269_v45 = vpop.f32.mrf.mxu1 }
 0x516   :  { %1968 = vmatmul.bf16.gmra.mxu0 %v7822_v4  ;;  %2146 = vmatmul.bf16.gmra.mxu2 %v7823_v29  ;;  %v2268_v4 = vld [vmem:[%s7489_s6 + $0x10] sm:$0xff]  ;;  %v7827_v29 = vld [vmem:[#allocation75_spill] sm:$0xff] }
 0x517   :  { %2057 = vmatmul.bf16.gmra.mxu1 %v7824_v25  ;;  %2428 = vmatpush.msra.mxu3 %v2268_v4 }
 0x519   :  { %2429 = vmatpush.msra.mxu3 %v2267_v28 }
 0x51b   :  { %v6263_v46 = vpop.f32.mrf.mxu0  ;;  %v6282_v55 = vpop.f32.mrf.mxu1 }
 0x523   :  { %v6267_v8 = vpop.f32.mrf.mxu0  ;;  %v6289_v4 = vpop.f32.mrf.mxu1 }
 0x526   :  { %1973 = vmatmul.bf16.gmra.mxu0 %v7825_v6  ;;  %2151 = vmatmul.bf16.gmra.mxu2 %v7826_v48  ;;  %v7828_v6 = vld [vmem:[#allocation16_spill] sm:$0xff]  ;;  %v7829_v48 = vld [vmem:[#allocation9_spill] sm:$0xff] }
 0x527   :  { %2062 = vmatmul.bf16.gmra.mxu1 %v7827_v29 }
 0x52b   :  { %v6277_v25 = vpop.f32.mrf.mxu0  ;;  %v6295_v24 = vpop.f32.mrf.mxu1 }
 0x533   :  { %v6284_v54 = vpop.f32.mrf.mxu0 }
 0x536   :  { %1978 = vmatmul.bf16.gmra.mxu0 %v7828_v6  ;;  %2156 = vmatmul.bf16.gmra.mxu2 %v7829_v48  ;;  %v6302_v6 = vpop.f32.mrf.mxu1 }
 0x537   :  { %2067 = vmatmul.bf16.gmra.mxu1 %v7830_v60  ;;  %v7835_v60 = vld [vmem:[#allocation20_spill] sm:$0xff] }
 0x53b   :  { %v6291_v29 = vpop.f32.mrf.mxu0 }
 0x53e   :  { %v6308_v33 = vpop.f32.mrf.mxu1 }
 0x543   :  { %v6293_v0 = vpop.f32.mrf.mxu0 }
 0x546   :  { %1983 = vmatmul.bf16.gmra.mxu0 %v7831_v41  ;;  %2161 = vmatmul.bf16.gmra.mxu2 %v7832_v1  ;;  %v6313_v41 = vpop.f32.mrf.mxu1 }
 0x547   :  { %2072 = vmatmul.bf16.gmra.mxu1 %v7833_v12  ;;  %v2263_v12 = vld [vmem:[%s7490_s5 + $0x8] sm:$0xff] }
 0x548   :  { %2734 = vmatpush.msra.mxu0 %v2263_v12  ;;  %v2266_v12 = vld [vmem:[%s7489_s6] sm:$0xff] }
 0x549   :  { %2430 = vmatpush.msra.mxu3 %v2266_v12  ;;  %v7851_v12 = vmax.f32 %v5888_v18, 0.0  ;;  %v2016_v18 = vadd.f32 %v6265_v40, %v6079_v49 }
 0x54b   :  { %v6300_v61 = vpop.f32.mrf.mxu0 }
 0x54e   :  { %v6334_v15 = vpop.f32.mrf.mxu1 }
 0x553   :  { %v6304_v48 = vpop.f32.mrf.mxu0 }
 0x554   :  { %7834 = vst [vmem:[#allocation6_spill] sm:$0xff] %v6304_v48 }
 0x556   :  { %1988 = vmatmul.bf16.gmra.mxu0 %v7835_v60  ;;  %2166 = vmatmul.bf16.gmra.mxu2 %v7836_v14  ;;  %v2262_v60 = vld [vmem:[%s7490_s5] sm:$0xff]  ;;  %v7840_v14 = vld [vmem:[#allocation23_spill] sm:$0xff] }
 0x557   :  { %2077 = vmatmul.bf16.gmra.mxu1 %v7837_v17  ;;  %2735 = vmatpush.msra.mxu0 %v2262_v60  ;;  %v7842_v17 = vld [vmem:[#allocation81_spill] sm:$0xff]  ;;  %v7845_v60 = vld [vmem:[#allocation26_spill] sm:$0xff] }
 0x55b   :  { %v6311_v27 = vpop.f32.mrf.mxu0 }
 0x55c   :  { %7838 = vst [vmem:[#allocation60_spill] sm:$0xff] %v6311_v27  ;;  %v7850_v27 = vld [vmem:[#allocation19_spill] sm:$0xff] }
 0x563   :  { %v6315_v1 = vpop.f32.mrf.mxu0 }
 0x564   :  { %7839 = vst [vmem:[#allocation42_spill] sm:$0xff] %v6315_v1 }
 0x566   :  { %1993 = vmatmul.bf16.gmra.mxu0 %v7840_v14  ;;  %2171 = vmatmul.bf16.gmra.mxu2 %v7841_v53  ;;  %v6338_v53 = vpop.f32.mrf.mxu1 }
 0x567   :  { %2082 = vmatmul.bf16.gmra.mxu1 %v7842_v17  ;;  %v7846_v17 = vld [vmem:[#allocation17_spill] sm:$0xff] }
 0x56b   :  { %v6329_v5 = vpop.f32.mrf.mxu0 }
 0x56c   :  { %7843 = vst [vmem:[#allocation38_spill] sm:$0xff] %v6329_v5 }
 0x56e   :  { %v6345_v5 = vpop.f32.mrf.mxu1 }
 0x573   :  { %v6336_v14 = vpop.f32.mrf.mxu0 }
 0x574   :  { %7844 = vst [vmem:[#allocation37_spill] sm:$0xff] %v6336_v14  ;;  %v7852_v14 = vld [vmem:[#allocation83_spill] sm:$0xff] }
 0x576   :  { %1998 = vmatmul.bf16.gmra.mxu0 %v7845_v60  ;;  %2176 = vmatmul.bf16.gmra.mxu2 %v7846_v17  ;;  %v2014_v60 = vadd.f32 %v6256_v20, %v6073_v39  ;;  %v7854_v20 = vld [vmem:[#allocation21_spill] sm:$0xff] }
 0x577   :  { %2087 = vmatmul.bf16.gmra.mxu1 %v7847_v7  ;;  %v6356_v7 = vpop.f32.mrf.mxu1 }
 0x57b   :  { %v6343_v28 = vpop.f32.mrf.mxu0 }
 0x57c   :  { %7848 = vst [vmem:[#allocation33_spill] sm:$0xff] %v6343_v28 }
 0x57f   :  { %v6368_v39 = vpop.f32.mrf.mxu1 }
 0x583   :  { %v6347_v1 = vpop.f32.mrf.mxu0 }
 0x584   :  { %7849 = vst [vmem:[#allocation32_spill] sm:$0xff] %v6347_v1  ;;  %v7853_v1 = vmax.f32 %v5880_v58, 0.0  ;;  %v7856_v58 = vld [vmem:[#allocation84_spill] sm:$0xff] }
 0x586   :  { %2181 = vmatmul.bf16.gmra.mxu2 %v7850_v27  ;;  %4138 = vmatmul.msk.f32.vlgmr.msra.gmra.mxu0 %vm2270_vm1, %v7851_v12 }
 0x587   :  { %2092 = vmatmul.bf16.gmra.mxu1 %v7852_v14 }
 0x589   :  { %v2142_v17 = vpop.f32.mrf.mxu2 }
 0x58a   :  { %v2143_v28 = vadd.f32 %v2142_v17, %v2014_v60  ;;  %v7855_v60 = vmax.f32 %v5876_v13, 0.0  ;;  %v6381_v17 = vpop.f32.mrf.mxu1  ;;  %v2021_v13 = vadd.f32 %v6282_v55, %v6087_v38 }
 0x58b   :  { %v6358_v48 = vpop.f32.mrf.mxu0 }
 0x58c   :  { %4090 = vmatmul.msk.f32.vlgmr.msra.gmra.mxu3 %vm2270_vm1, %v2143_v28 }
 0x58e   :  { %4139 = vmatmul.msk.f32.gmra.mxu0 %vm2270_vm1, %v7853_v1  ;;  %v2019_v1 = vadd.f32 %v6269_v45, %v6083_v51  ;;  %v7858_v51 = vld [vmem:[#allocation24_spill] sm:$0xff]  ;;  %v7859_v45 = vmax.f32 %v5854_v31, 0.0  ;;  %v2026_v31 = vadd.f32 %v6295_v24, %v6093_v21 }
 0x591   :  { %v2144_v27 = vpop.f32.mrf.mxu2 }
 0x592   :  { %v2145_v14 = vadd.f32 %v2144_v27, %v2016_v18  ;;  %v7857_v18 = vmax.f32 %v5864_v34, 0.0  ;;  %v7860_v34 = vld [vmem:[#allocation85_spill] sm:$0xff] }
 0x593   :  { %v6366_v12 = vpop.f32.mrf.mxu0 }
 0x594   :  { %4091 = vmatmul.msk.f32.gmra.mxu3 %vm2270_vm1, %v2145_v14 }
 0x596   :  { %2186 = vmatmul.bf16.gmra.mxu2 %v7854_v20  ;;  %4140 = vmatmul.msk.f32.gmra.mxu0 %vm2270_vm1, %v7855_v60  ;;  %v6395_v60 = vpop.f32.mrf.mxu1 }
 0x597   :  { %2097 = vmatmul.bf16.gmra.mxu1 %v7856_v58  ;;  %v2024_v58 = vadd.f32 %v6289_v4, %v6089_v47  ;;  %v7862_v47 = vld [vmem:[#allocation27_spill] sm:$0xff]  ;;  %v7863_v4 = vmax.f32 %v5838_v11, 0.0  ;;  %v2031_v11 = vadd.f32 %v6308_v33, %v6099_v42 }
 0x599   :  { %v2147_v49 = vpop.f32.mrf.mxu2 }
 0x59a   :  { %v2148_v40 = vadd.f32 %v2147_v49, %v2019_v1  ;;  %v7861_v49 = vmax.f32 %v5844_v35, 0.0  ;;  %v7864_v35 = vld [vmem:[#allocation86_spill] sm:$0xff] }
 0x59b   :  { %v6378_v28 = vpop.f32.mrf.mxu0 }
 0x59c   :  { %4092 = vmatmul.msk.f32.gmra.mxu3 %vm2270_vm1, %v2148_v40 }
 0x59e   :  { %4141 = vmatmul.msk.f32.gmra.mxu0 %vm2270_vm1, %v7857_v18  ;;  %v6408_v18 = vpop.f32.mrf.mxu1 }
 0x5a1   :  { %v2149_v27 = vpop.f32.mrf.mxu2 }
 0x5a2   :  { %v2150_v14 = vadd.f32 %v2149_v27, %v2021_v13 }
 0x5a3   :  { %v6388_v20 = vpop.f32.mrf.mxu0 }
 0x5a4   :  { %4093 = vmatmul.msk.f32.gmra.mxu3 %vm2270_vm1, %v2150_v14  ;;  %v2029_v14 = vadd.f32 %v6302_v6, %v6095_v59  ;;  %v7866_v6 = vld [vmem:[#allocation31_spill] sm:$0xff] }
 0x5a6   :  { %2191 = vmatmul.bf16.gmra.mxu2 %v7858_v51  ;;  %4142 = vmatmul.msk.f32.gmra.mxu0 %vm2270_vm1, %v7859_v45  ;;  %v6422_v45 = vpop.f32.mrf.mxu1 }
 0x5a7   :  { %2102 = vmatmul.bf16.gmra.mxu1 %v7860_v34  ;;  %v7865_v34 = vmax.f32 %v5826_v16, 0.0  ;;  %v7868_v16 = vld [vmem:[#allocation87_spill] sm:$0xff] }
 0x5a9   :  { %v2152_v38 = vpop.f32.mrf.mxu2 }
 0x5aa   :  { %v2153_v55 = vadd.f32 %v2152_v38, %v2024_v58 }
 0x5ab   :  { %v6400_v1 = vpop.f32.mrf.mxu0 }
 0x5ac   :  { %4094 = vmatmul.msk.f32.gmra.mxu3 %vm2270_vm1, %v2153_v55 }
 0x5ae   :  { %4143 = vmatmul.msk.f32.gmra.mxu0 %vm2270_vm1, %v7861_v49  ;;  %v6433_v59 = vpop.f32.mrf.mxu1  ;;  %v7867_v49 = vmax.f32 %v5819_v63, 0.0  ;;  %v2036_v63 = vadd.f32 %v6334_v15, %v6108_v2 }
 0x5b1   :  { %v2154_v40 = vpop.f32.mrf.mxu2 }
 0x5b2   :  { %v2155_v13 = vadd.f32 %v2154_v40, %v2026_v31  ;;  %v2034_v31 = vadd.f32 %v6313_v41, %v6101_v52  ;;  %v7870_v52 = vld [vmem:[#allocation36_spill] sm:$0xff]  ;;  %v7871_v41 = vmax.f32 %v5804_v23, 0.0  ;;  %v2041_v23 = vadd.f32 %v6345_v5, %v6118_v36 }
 0x5b3   :  { %v6410_v27 = vpop.f32.mrf.mxu0 }
 0x5b4   :  { %4095 = vmatmul.msk.f32.gmra.mxu3 %vm2270_vm1, %v2155_v13  ;;  %v7869_v13 = vmax.f32 %v5809_v26, 0.0  ;;  %v7872_v26 = vld [vmem:[#allocation88_spill] sm:$0xff] }
 0x5b6   :  { %2196 = vmatmul.bf16.gmra.mxu2 %v7862_v47  ;;  %4144 = vmatmul.msk.f32.gmra.mxu0 %vm2270_vm1, %v7863_v4  ;;  %v6448_v47 = vpop.f32.mrf.mxu1 }
 0x5b7   :  { %2107 = vmatmul.bf16.gmra.mxu1 %v7864_v35 }
 0x5b9   :  { %v2157_v21 = vpop.f32.mrf.mxu2 }
 0x5ba   :  { %v2158_v24 = vadd.f32 %v2157_v21, %v2029_v14  ;;  %v2039_v21 = vadd.f32 %v6338_v53, %v6113_v50  ;;  %v7874_v53 = vld [vmem:[#allocation41_spill] sm:$0xff] }
 0x5bb   :  { %v6420_v51 = vpop.f32.mrf.mxu0 }
 0x5bc   :  { %4096 = vmatmul.msk.f32.gmra.mxu3 %vm2270_vm1, %v2158_v24 }
 0x5be   :  { %4145 = vmatmul.msk.f32.gmra.mxu0 %vm2270_vm1, %v7865_v34  ;;  %v6462_v34 = vpop.f32.mrf.mxu1 }
 0x5c1   :  { %v2159_v58 = vpop.f32.mrf.mxu2 }
 0x5c2   :  { %v2160_v38 = vadd.f32 %v2159_v58, %v2031_v11  ;;  %v7873_v11 = vmax.f32 %v5794_v62, 0.0  ;;  %v7876_v62 = vld [vmem:[#allocation89_spill] sm:$0xff] }
 0x5c3   :  { %v6430_v55 = vpop.f32.mrf.mxu0 }
 0x5c4   :  { %4097 = vmatmul.msk.f32.gmra.mxu3 %vm2270_vm1, %v2160_v38 }
 0x5c6   :  { %2201 = vmatmul.bf16.gmra.mxu2 %v7866_v6  ;;  %4146 = vmatmul.msk.f32.gmra.mxu0 %vm2270_vm1, %v7867_v49  ;;  %v6474_v50 = vpop.f32.mrf.mxu1  ;;  %v7875_v49 = vmax.f32 %v5785_v10, 0.0  ;;  %v2046_v10 = vadd.f32 %v6368_v39, %v6171_v37 }
 0x5c7   :  { %2112 = vmatmul.bf16.gmra.mxu1 %v7868_v16  ;;  %v2044_v16 = vadd.f32 %v6356_v7, %v6139_v56  ;;  %v7878_v56 = vld [vmem:[#allocation46_spill] sm:$0xff]  ;;  %v7879_v7 = vld [vmem:[#allocation43_spill] sm:$0xff] }
 0x5c9   :  { %v2162_v42 = vpop.f32.mrf.mxu2 }
 0x5ca   :  { %v2163_v33 = vadd.f32 %v2162_v42, %v2034_v31 }
 0x5cb   :  { %v6442_v40 = vpop.f32.mrf.mxu0 }
 0x5cc   :  { %4098 = vmatmul.msk.f32.gmra.mxu3 %vm2270_vm1, %v2163_v33  ;;  %v7877_v33 = vmax.f32 %v5779_v19, 0.0  ;;  %v7881_v19 = vld [vmem:[#allocation90_spill] sm:$0xff] }
 0x5ce   :  { %4147 = vmatmul.msk.f32.gmra.mxu0 %vm2270_vm1, %v7869_v13  ;;  %v6487_v42 = vpop.f32.mrf.mxu1 }
 0x5d1   :  { %v2164_v4 = vpop.f32.mrf.mxu2 }
 0x5d2   :  { %v2165_v35 = vadd.f32 %v2164_v4, %v2036_v63 }
 0x5d3   :  { %v6452_v14 = vpop.f32.mrf.mxu0 }
 0x5d4   :  { %4099 = vmatmul.msk.f32.gmra.mxu3 %vm2270_vm1, %v2165_v35  ;;  %v7880_v35 = vmax.f32 %v7879_v7, 0.0 }
 0x5d6   :  { %2206 = vmatmul.bf16.gmra.mxu2 %v7870_v52  ;;  %4148 = vmatmul.msk.f32.gmra.mxu0 %vm2270_vm1, %v7871_v41  ;;  %v6501_v52 = vpop.f32.mrf.mxu1  ;;  %v2049_v41 = vadd.f32 %v6381_v17, %v6205_v32  ;;  %v7885_v32 = vmax.f32 %v6058_v22, 0.0  ;;  %v2054_v17 = vadd.f32 %v6408_v18, %v6249_v43 }
 0x5d7   :  { %2117 = vmatmul.bf16.gmra.mxu1 %v7872_v26 }
 0x5d9   :  { %v2167_v24 = vpop.f32.mrf.mxu2 }
 0x5da   :  { %v2168_v2 = vadd.f32 %v2167_v24, %v2039_v21  ;;  %v7882_v21 = vld [vmem:[#allocation47_spill] sm:$0xff] }
 0x5db   :  { %v6464_v15 = vpop.f32.mrf.mxu0  ;;  %v7883_v24 = vmax.f32 %v7882_v21, 0.0 }
 0x5dc   :  { %4100 = vmatmul.msk.f32.gmra.mxu3 %vm2270_vm1, %v2168_v2  ;;  %v2051_v2 = vadd.f32 %v6395_v60, %v6237_v57  ;;  %v7886_v57 = vmax.f32 %v6050_v30, 0.0  ;;  %v6528_v60 = vld [vmem:[%s7491_s7] ss:$0 sm:$0xff] }
 0x5de   :  { %4149 = vmatmul.msk.f32.gmra.mxu0 %vm2270_vm1, %v7873_v11 }
 0x5e1   :  { %v2169_v58 = vpop.f32.mrf.mxu2 }
 0x5e2   :  { %v2170_v38 = vadd.f32 %v2169_v58, %v2041_v23 }
 0x5e3   :  { %v6472_v6 = vpop.f32.mrf.mxu0 }
 0x5e4   :  { %4101 = vmatmul.msk.f32.gmra.mxu3 %vm2270_vm1, %v2170_v38  ;;  %v7884_v38 = vld [vmem:[#allocation51_spill] sm:$0xff] }
 0x5e6   :  { %2211 = vmatmul.bf16.gmra.mxu2 %v7874_v53  ;;  %4150 = vmatmul.msk.f32.gmra.mxu0 %vm2270_vm1, %v7875_v49 }
 0x5e7   :  { %2122 = vmatmul.bf16.gmra.mxu1 %v7876_v62 }
 0x5e9   :  { %v2172_v36 = vpop.f32.mrf.mxu2 }
 0x5ea   :  { %v2173_v5 = vadd.f32 %v2172_v36, %v2044_v16  ;;  %v2056_v16 = vadd.f32 %v6422_v45, %v6254_v9  ;;  %v6542_v45 = vpop.f32.mrf.mxu1 }
 0x5eb   :  { %v6484_v31 = vpop.f32.mrf.mxu0 }
 0x5ec   :  { %4102 = vmatmul.msk.f32.gmra.mxu3 %vm2270_vm1, %v2173_v5 }
 0x5ee   :  { %4151 = vmatmul.msk.f32.gmra.mxu0 %vm2270_vm1, %v7877_v33 }
 0x5f1   :  { %v2174_v13 = vpop.f32.mrf.mxu2 }
 0x5f2   :  { %v2175_v63 = vadd.f32 %v2174_v13, %v2046_v10  ;;  %v7887_v10 = vld [vmem:[#allocation56_spill] sm:$0xff]  ;;  %v7888_v13 = vmax.f32 %v6046_v3, 0.0 }
 0x5f3   :  { %v6494_v4 = vpop.f32.mrf.mxu0 }
 0x5f4   :  { %4103 = vmatmul.msk.f32.gmra.mxu3 %vm2270_vm1, %v2175_v63  ;;  %v2059_v63 = vadd.f32 %v6433_v59, %v6258_v44  ;;  %v2061_v44 = vadd.f32 %v6448_v47, %v6263_v46  ;;  %v2064_v47 = vadd.f32 %v6462_v34, %v6267_v8  ;;  %v2066_v34 = vadd.f32 %v6474_v50, %v6277_v25 }
 0x5f5   :  { %v2069_v50 = vadd.f32 %v6487_v42, %v6284_v54  ;;  %v2071_v54 = vadd.f32 %v6501_v52, %v6291_v29  ;;  %v2074_v52 = vadd.f32 %v6542_v45, %v6293_v0 }
 0x5f6   :  { %2216 = vmatmul.bf16.gmra.mxu2 %v7878_v56  ;;  %4152 = vmatmul.msk.f32.gmra.mxu0 %vm2270_vm1, %v7880_v35 }
 0x5f7   :  { %2127 = vmatmul.bf16.gmra.mxu1 %v7881_v19 }
 0x5f9   :  { %v2177_v37 = vpop.f32.mrf.mxu2 }
 0x5fa   :  { %v2178_v39 = vadd.f32 %v2177_v37, %v2049_v41  ;;  %v7889_v37 = vld [vmem:[#allocation34_spill] sm:$0xff] }
 0x5fb   :  { %v6506_v26 = vpop.f32.mrf.mxu0 }
 0x5fc   :  { %4104 = vmatmul.msk.f32.gmra.mxu3 %vm2270_vm1, %v2178_v39  ;;  %v7890_v39 = vmax.f32 %v7889_v37, 0.0 }
 0x5fe   :  { %4153 = vmatmul.msk.f32.gmra.mxu0 %vm2270_vm1, %v7883_v24 }
 0x601   :  { %v2179_v11 = vpop.f32.mrf.mxu2 }
 0x602   :  { %v2180_v23 = vadd.f32 %v2179_v11, %v2051_v2  ;;  %v6557_v2 = vpop.f32.mrf.mxu1 }
 0x603   :  { %v2737_v58 = vpop.f32.mrf.mxu0  ;;  %v2076_v0 = vadd.f32 %v6557_v2, %v6300_v61  ;;  %v7909_v2 = vld [vmem:[#allocation6_spill] sm:$0xff] }
 0x604   :  { %4105 = vmatmul.msk.f32.gmra.mxu3 %vm2270_vm1, %v2180_v23 }
 0x606   :  { %2221 = vmatmul.bf16.gmra.mxu2 %v7884_v38  ;;  %4154 = vmatmul.msk.f32.gmra.mxu0 %vm2270_vm1, %v7885_v32  ;;  %v7891_v32 = vld [vmem:[#allocation61_spill] sm:$0xff] }
 0x609   :  { %v2182_v53 = vpop.f32.mrf.mxu2 }
 0x60a   :  { %v2183_v49 = vadd.f32 %v2182_v53, %v2054_v17  ;;  %v7892_v17 = vld [vmem:[#allocation29_spill] sm:$0xff] }
 0x60b   :  { %v2740_v62 = vpop.f32.mrf.mxu0  ;;  %v7893_v53 = vmax.f32 %v7892_v17, 0.0 }
 0x60c   :  { %4106 = vmatmul.msk.f32.gmra.mxu3 %vm2270_vm1, %v2183_v49 }
 0x60e   :  { %4155 = vmatmul.msk.f32.gmra.mxu0 %vm2270_vm1, %v7886_v57 }
 0x60f   :  { %v2432_v22 = vpop.f32.mrf.mxu3 }
 0x610   :  { %v2738_v36 = vadd.f32 %v2737_v58, %v2432_v22 }
 0x611   :  { %v2184_v43 = vpop.f32.mrf.mxu2 }
 0x612   :  { %v6533_v18 = vadd.f32 %v6528_v60, %v2738_v36  ;;  %v2185_v5 = vadd.f32 %v2184_v43, %v2056_v16  ;;  %v6574_v36 = vpop.f32.mrf.mxu1 }
 0x613   :  { %v2743_v33 = vpop.f32.mrf.mxu0 }
 0x614   :  { %4107 = vmatmul.msk.f32.gmra.mxu3 %vm2270_vm1, %v2185_v5  ;;  %v2934_v30 = vsel %vm2933_vm2, %v6533_v18, -inf  ;;  %v7894_v5 = vld [vmem:[#allocation25_spill] sm:$0xff] }
 0x615   :  { %2935 = vmax.xlane.f32.xlu0 %v2934_v30 }
 0x616   :  { %2226 = vmatmul.bf16.gmra.mxu2 %v7887_v10  ;;  %4156 = vmatmul.msk.f32.gmra.mxu0 %vm2270_vm1, %v7888_v13 }
 0x617   :  { %v2435_v9 = vpop.f32.mrf.mxu3 }
 0x618   :  { %v2741_v56 = vadd.f32 %v2740_v62, %v2435_v9 }
 0x619   :  { %v2187_v7 = vpop.f32.mrf.mxu2 }
 0x61a   :  { %v6547_v35 = vadd.f32 %v6528_v60, %v2741_v56  ;;  %v2188_v19 = vadd.f32 %v2187_v7, %v2059_v63  ;;  %v6590_v7 = vpop.f32.mrf.mxu1 }
 0x61b   :  { %v2746_v41 = vpop.f32.mrf.mxu0 }
 0x61c   :  { %4108 = vmatmul.msk.f32.gmra.mxu3 %vm2270_vm1, %v2188_v19  ;;  %v2937_v3 = vsel %vm2933_vm2, %v6547_v35, -inf  ;;  %v7896_v19 = vld [vmem:[#allocation66_spill] sm:$0xff] }
 0x61d   :  { %2938 = vmax.xlane.f32.xlu0 %v2937_v3 }
 0x61e   :  { %4157 = vmatmul.msk.f32.gmra.mxu0 %vm2270_vm1, %v7890_v39 }
 0x61f   :  { %v2438_v21 = vpop.f32.mrf.mxu3 }
 0x620   :  { %v2744_v59 = vadd.f32 %v2743_v33, %v2438_v21  ;;  %v7895_v33 = vmax.f32 %v7894_v5, 0.0 }
 0x621   :  { %v2189_v24 = vpop.f32.mrf.mxu2 }
 0x622   :  { %v6560_v11 = vadd.f32 %v6528_v60, %v2744_v59  ;;  %v2190_v23 = vadd.f32 %v2189_v24, %v2061_v44 }
 0x623   :  { %v2749_v58 = vpop.f32.mrf.mxu0 }
 0x624   :  { %4109 = vmatmul.msk.f32.gmra.mxu3 %vm2270_vm1, %v2190_v23  ;;  %v2940_v38 = vsel %vm2933_vm2, %v6560_v11, -inf  ;;  %v7899_v23 = vld [vmem:[#allocation68_spill] sm:$0xff] }
 0x625   :  { %2941 = vmax.xlane.f32.xlu1 %v2940_v38 }
 0x626   :  { %2231 = vmatmul.bf16.gmra.mxu2 %v7891_v32  ;;  %4158 = vmatmul.msk.f32.gmra.mxu0 %vm2270_vm1, %v7893_v53  ;;  %v6607_v32 = vpop.f32.mrf.mxu1 }
 0x627   :  { %v2441_v46 = vpop.f32.mrf.mxu3 }
 0x628   :  { %v2747_v49 = vadd.f32 %v2746_v41, %v2441_v46  ;;  %v7897_v41 = vld [vmem:[#allocation22_spill] sm:$0xff] }
 0x629   :  { %v2192_v62 = vpop.f32.mrf.mxu2  ;;  %v7898_v3 = vmax.f32 %v7897_v41, 0.0 }
 0x62a   :  { %v6572_v57 = vadd.f32 %v6528_v60, %v2747_v49  ;;  %v2193_v22 = vadd.f32 %v2192_v62, %v2064_v47  ;;  %v7901_v62 = vld [vmem:[#allocation71_spill] sm:$0xff] }
 0x62b   :  { %v2752_v16 = vpop.f32.mrf.mxu0 }
 0x62c   :  { %4110 = vmatmul.msk.f32.gmra.mxu3 %vm2270_vm1, %v2193_v22  ;;  %v2943_v43 = vsel %vm2933_vm2, %v6572_v57, -inf  ;;  %v7902_v22 = vld [vmem:[#allocation67_spill] sm:$0xff] }
 0x62d   :  { %2944 = vmax.xlane.f32.xlu1 %v2943_v43 }
 0x62e   :  { %4159 = vmatmul.msk.f32.gmra.mxu0 %vm2270_vm1, %v7895_v33  ;;  %v2085_v33 = vpop.f32.mrf.mxu1 }
 0x62f   :  { %v2444_v8 = vpop.f32.mrf.mxu3 }
 0x630   :  { %v2750_v30 = vadd.f32 %v2749_v58, %v2444_v8  ;;  %v7900_v58 = vmax.f32 %v7899_v23, 0.0 }
 0x631   :  { %v2194_v10 = vpop.f32.mrf.mxu2 }
 0x632   :  { %v6585_v13 = vadd.f32 %v6528_v60, %v2750_v30  ;;  %v2195_v9 = vadd.f32 %v2194_v10, %v2066_v34 }
 0x633   :  { %v2755_v63 = vpop.f32.mrf.mxu0 }
 0x634   :  { %4111 = vmatmul.msk.f32.gmra.mxu3 %vm2270_vm1, %v2195_v9  ;;  %v2946_v56 = vsel %vm2933_vm2, %v6585_v13, -inf  ;;  %v7904_v9 = vld [vmem:[#allocation63_spill] sm:$0xff] }
 0x635   :  { %2947 = vmax.xlane.f32.xlu2 %v2946_v56 }
 0x636   :  { %2236 = vmatmul.bf16.gmra.mxu2 %v7896_v19  ;;  %4160 = vmatmul.msk.f32.gmra.mxu0 %vm2270_vm1, %v7898_v3 }
 0x637   :  { %v2447_v25 = vpop.f32.mrf.mxu3 }
 0x638   :  { %v2753_v37 = vadd.f32 %v2752_v16, %v2447_v25  ;;  %v7903_v16 = vmax.f32 %v7902_v22, 0.0 }
 0x639   :  { %v2197_v39 = vpop.f32.mrf.mxu2 }
 0x63a   :  { %v6599_v21 = vadd.f32 %v6528_v60, %v2753_v37  ;;  %v2198_v44 = vadd.f32 %v2197_v39, %v2069_v50  ;;  %v2088_v50 = vpop.f32.mrf.mxu1  ;;  %v7906_v39 = vld [vmem:[#allocation74_spill] sm:$0xff] }
 0x63b   :  { %v2758_v59 = vpop.f32.mrf.mxu0 }
 0x63c   :  { %4112 = vmatmul.msk.f32.gmra.mxu3 %vm2270_vm1, %v2198_v44  ;;  %v2949_v24 = vsel %vm2933_vm2, %v6599_v21, -inf  ;;  %v7907_v44 = vld [vmem:[#allocation62_spill] sm:$0xff] }
 0x63d   :  { %2950 = vmax.xlane.f32.xlu2 %v2949_v24  ;;  %v2079_v24 = vadd.f32 %v6574_v36, %v7909_v2  ;;  %v7912_v36 = vld [vmem:[#allocation60_spill] sm:$0xff]  ;;  %v7919_v2 = vld [vmem:[#allocation38_spill] sm:$0xff] }
 0x63e   :  { %4161 = vmatmul.msk.f32.gmra.mxu0 %vm2270_vm1, %v7900_v58  ;;  %v2081_v22 = vadd.f32 %v6590_v7, %v7912_v36 }
 0x63f   :  { %v2450_v38 = vpop.f32.mrf.mxu3 }
 0x640   :  { %v2756_v42 = vadd.f32 %v2755_v63, %v2450_v38  ;;  %v7905_v63 = vmax.f32 %v7904_v9, 0.0 }
 0x641   :  { %v2199_v17 = vpop.f32.mrf.mxu2 }
 0x642   :  { %v6612_v53 = vadd.f32 %v6528_v60, %v2756_v42  ;;  %v2200_v46 = vadd.f32 %v2199_v17, %v2071_v54 }
 0x643   :  { %v2761_v47 = vpop.f32.mrf.mxu0 }
 0x644   :  { %4113 = vmatmul.msk.f32.gmra.mxu3 %vm2270_vm1, %v2200_v46  ;;  %v2952_v49 = vsel %vm2933_vm2, %v6612_v53, -inf  ;;  %v2090_v46 = vpop.f32.mrf.mxu1 }
 0x645   :  { %2953 = vmax.xlane.f32.xlu0 %v2952_v49 }
 0x646   :  { %2241 = vmatmul.bf16.gmra.mxu2 %v7901_v62  ;;  %4162 = vmatmul.msk.f32.gmra.mxu0 %vm2270_vm1, %v7903_v16 }
 0x647   :  { %v2453_v29 = vpop.f32.mrf.mxu3 }
 0x648   :  { %v2759_v43 = vadd.f32 %v2758_v59, %v2453_v29  ;;  %v7908_v59 = vmax.f32 %v7907_v44, 0.0  ;;  %v7917_v44 = vld [vmem:[#allocation52_spill] sm:$0xff] }
 0x649   :  { %v2202_v5 = vpop.f32.mrf.mxu2 }
 0x64a   :  { %v6624_v8 = vadd.f32 %v6528_v60, %v2759_v43  ;;  %v2203_v34 = vadd.f32 %v2202_v5, %v2074_v52 }
 0x64b   :  { %v2764_v30 = vpop.f32.mrf.mxu0 }
 0x64c   :  { %4114 = vmatmul.msk.f32.gmra.mxu3 %vm2270_vm1, %v2203_v34  ;;  %v2955_v10 = vsel %vm2933_vm2, %v6624_v8, -inf  ;;  %v2093_v7 = vpop.f32.mrf.mxu1 }
 0x64d   :  { %2956 = vmax.xlane.f32.xlu1 %v2955_v10  ;;  %v7914_v10 = vld [vmem:[#allocation57_spill] sm:$0xff] }
 0x64e   :  { %4163 = vmatmul.msk.f32.gmra.mxu0 %vm2270_vm1, %v7905_v63  ;;  %v7915_v9 = vmax.f32 %v7914_v10, 0.0 }
 0x64f   :  { %v2456_v56 = vpop.f32.mrf.mxu3 }
 0x650   :  { %v2762_v45 = vadd.f32 %v2761_v47, %v2456_v56  ;;  %v7910_v47 = vld [vmem:[#allocation58_spill] sm:$0xff] }
 0x651   :  { %v2204_v19 = vpop.f32.mrf.mxu2  ;;  %v7911_v49 = vmax.f32 %v7910_v47, 0.0  ;;  %v7916_v56 = vld [vmem:[#allocation42_spill] sm:$0xff] }
 0x652   :  { %v6635_v41 = vadd.f32 %v6528_v60, %v2762_v45  ;;  %v2205_v3 = vadd.f32 %v2204_v19, %v2076_v0  ;;  %v2084_v0 = vadd.f32 %v6607_v32, %v7916_v56  ;;  %v2086_v32 = vadd.f32 %v2085_v33, %v7919_v2  ;;  %v7927_v2 = vld [vmem:[#allocation55_spill] sm:$0xff] }
 0x653   :  { %v2767_v25 = vpop.f32.mrf.mxu0 }
 0x654   :  { %4115 = vmatmul.msk.f32.gmra.mxu3 %vm2270_vm1, %v2205_v3  ;;  %v2958_v37 = vsel %vm2933_vm2, %v6635_v41, -inf }
 0x655   :  { %2959 = vmax.xlane.f32.xlu2 %v2958_v37 }
 0x656   :  { %2246 = vmatmul.bf16.gmra.mxu2 %v7906_v39  ;;  %4164 = vmatmul.msk.f32.gmra.mxu0 %vm2270_vm1, %v7908_v59  ;;  %v7918_v59 = vmax.f32 %v7917_v44, 0.0 }
 0x657   :  { %v2459_v61 = vpop.f32.mrf.mxu3 }
 0x658   :  { %v2765_v23 = vadd.f32 %v2764_v30, %v2459_v61  ;;  %v7913_v30 = vld [vmem:[#allocation76_spill] sm:$0xff] }
 0x659   :  { %v2207_v58 = vpop.f32.mrf.mxu2 }
 0x65a   :  { %v6647_v38 = vadd.f32 %v6528_v60, %v2765_v23  ;;  %v2208_v54 = vadd.f32 %v2207_v58, %v2079_v24  ;;  %v2095_v23 = vpop.f32.mrf.mxu1 }
 0x65b   :  { %v2770_v42 = vpop.f32.mrf.mxu0 }
 0x65c   :  { %4116 = vmatmul.msk.f32.gmra.mxu3 %vm2270_vm1, %v2208_v54  ;;  %v2961_v17 = vsel %vm2933_vm2, %v6647_v38, -inf }
 0x65d   :  { %2962 = vmax.xlane.f32.xlu0 %v2961_v17 }
 0x65e   :  { %4165 = vmatmul.msk.f32.gmra.mxu0 %vm2270_vm1, %v7911_v49  ;;  %v7920_v49 = vld [vmem:[#allocation78_spill] sm:$0xff] }
 0x65f   :  { %v2462_v62 = vpop.f32.mrf.mxu3 }
 0x660   :  { %v2768_v16 = vadd.f32 %v2767_v25, %v2462_v62  ;;  %v7921_v62 = vld [vmem:[#allocation48_spill] sm:$0xff] }
 0x661   :  { %v2209_v29 = vpop.f32.mrf.mxu2  ;;  %v7922_v36 = vmax.f32 %v7921_v62, 0.0 }
 0x662   :  { %v6658_v52 = vadd.f32 %v6528_v60, %v2768_v16  ;;  %v2210_v43 = vadd.f32 %v2209_v29, %v2081_v22  ;;  %v7923_v22 = vld [vmem:[#allocation37_spill] sm:$0xff] }
 0x663   :  { %v2773_v5 = vpop.f32.mrf.mxu0  ;;  %v2089_v16 = vadd.f32 %v2088_v50, %v7923_v22  ;;  %v7926_v50 = vld [vmem:[#allocation33_spill] sm:$0xff] }
 0x664   :  { %4117 = vmatmul.msk.f32.gmra.mxu3 %vm2270_vm1, %v2210_v43  ;;  %v2964_v34 = vsel %vm2933_vm2, %v6658_v52, -inf }
 0x665   :  { %2965 = vmax.xlane.f32.xlu1 %v2964_v34 }
 0x666   :  { %2251 = vmatmul.bf16.gmra.mxu2 %v7913_v30  ;;  %4166 = vmatmul.msk.f32.gmra.mxu0 %vm2270_vm1, %v7915_v9  ;;  %v2098_v30 = vpop.f32.mrf.mxu1 }
 0x667   :  { %v2465_v63 = vpop.f32.mrf.mxu3 }
 0x668   :  { %v2771_v45 = vadd.f32 %v2770_v42, %v2465_v63  ;;  %v7924_v63 = vld [vmem:[#allocation53_spill] sm:$0xff] }
 0x669   :  { %v2212_v19 = vpop.f32.mrf.mxu2  ;;  %v7925_v56 = vmax.f32 %v7924_v63, 0.0 }
 0x66a   :  { %v6670_v3 = vadd.f32 %v6528_v60, %v2771_v45  ;;  %v2213_v25 = vadd.f32 %v2212_v19, %v2084_v0  ;;  %v2091_v45 = vadd.f32 %v2090_v46, %v7926_v50  ;;  %v7929_v46 = vld [vmem:[#allocation32_spill] sm:$0xff] }
 0x66b   :  { %v2776_v37 = vpop.f32.mrf.mxu0 }
 0x66c   :  { %4118 = vmatmul.msk.f32.gmra.mxu3 %vm2270_vm1, %v2213_v25  ;;  %v2967_v39 = vsel %vm2933_vm2, %v6670_v3, -inf }
 0x66d   :  { %2968 = vmax.xlane.f32.xlu2 %v2967_v39 }
 0x66e   :  { %4167 = vmatmul.msk.f32.gmra.mxu0 %vm2270_vm1, %v7918_v59 }
 0x66f   :  { %v2468_v61 = vpop.f32.mrf.mxu3 }
 0x670   :  { %v2774_v24 = vadd.f32 %v2773_v5, %v2468_v61  ;;  %v2100_v61 = vpop.f32.mrf.mxu1 }
 0x671   :  { %v2214_v58 = vpop.f32.mrf.mxu2 }
 0x672   :  { %v6680_v54 = vadd.f32 %v6528_v60, %v2774_v24  ;;  %v2215_v42 = vadd.f32 %v2214_v58, %v2086_v32  ;;  %v7928_v32 = vmax.f32 %v7927_v2, 0.0  ;;  %v2094_v58 = vadd.f32 %v2093_v7, %v7929_v46  ;;  %v7930_v7 = vld [vmem:[#allocation4_spill] sm:$0xff] }
 0x673   :  { %v2779_v17 = vpop.f32.mrf.mxu0 }
 0x674   :  { %4119 = vmatmul.msk.f32.gmra.mxu3 %vm2270_vm1, %v2215_v42  ;;  %v2970_v47 = vsel %vm2933_vm2, %v6680_v54, -inf }
 0x675   :  { %2971 = vmax.xlane.f32.xlu0 %v2970_v47 }
 0x676   :  { %2256 = vmatmul.bf16.gmra.mxu2 %v7920_v49  ;;  %4168 = vmatmul.msk.f32.gmra.mxu0 %vm2270_vm1, %v7922_v36 }
 0x677   :  { %v2471_v33 = vpop.f32.mrf.mxu3 }
 0x678   :  { %v2777_v29 = vadd.f32 %v2776_v37, %v2471_v33 }
 0x679   :  { %v2217_v43 = vpop.f32.mrf.mxu2 }
 0x67a   :  { %v6691_v5 = vadd.f32 %v6528_v60, %v2777_v29  ;;  %v2218_v34 = vadd.f32 %v2217_v43, %v2089_v16  ;;  %v7931_v29 = vmax.f32 %v7930_v7, 0.0  ;;  %v2103_v43 = vpop.f32.mrf.mxu1 }
 0x67b   :  { %v2782_v10 = vpop.f32.mrf.mxu0 }
 0x67c   :  { %4120 = vmatmul.msk.f32.gmra.mxu3 %vm2270_vm1, %v2218_v34  ;;  %v2973_v9 = vsel %vm2933_vm2, %v6691_v5, -inf }
 0x67d   :  { %2974 = vmax.xlane.f32.xlu1 %v2973_v9 }
 0x67e   :  { %4169 = vmatmul.msk.f32.gmra.mxu0 %vm2270_vm1, %v7925_v56 }
 0x67f   :  { %v2474_v0 = vpop.f32.mrf.mxu3 }
 0x680   :  { %v2780_v19 = vadd.f32 %v2779_v17, %v2474_v0 }
 0x681   :  { %v2219_v25 = vpop.f32.mrf.mxu2 }
 0x682   :  { %v6701_v37 = vadd.f32 %v6528_v60, %v2780_v19  ;;  %v2220_v39 = vadd.f32 %v2219_v25, %v2091_v45 }
 0x683   :  { %v2785_v44 = vpop.f32.mrf.mxu0 }
 0x684   :  { %4121 = vmatmul.msk.f32.gmra.mxu3 %vm2270_vm1, %v2220_v39  ;;  %v2976_v59 = vsel %vm2933_vm2, %v6701_v37, -inf }
 0x685   :  { %2977 = vmax.xlane.f32.xlu2 %v2976_v59 }
 0x686   :  { %4170 = vmatmul.msk.f32.gmra.mxu0 %vm2270_vm1, %v7928_v32  ;;  %v2099_v32 = vadd.f32 %v2098_v30, %v6366_v12  ;;  %v7935_v30 = vld [vmem:[#allocation2_spill] sm:$0xff] }
 0x687   :  { %v2477_v24 = vpop.f32.mrf.mxu3 }
 0x688   :  { %v2783_v42 = vadd.f32 %v2782_v10, %v2477_v24  ;;  %v6710_v17 = vpop.xlane.xlu0 %2935  ;;  %v2096_v10 = vadd.f32 %v2095_v23, %v6358_v48  ;;  %v7933_v23 = vld [vmem:[#allocation50_spill] sm:$0xff] }
 0x689   :  { %v3078_v47 = vsub.f32 %v6533_v18, %v6710_v17  ;;  %v2222_v49 = vpop.f32.mrf.mxu2 }
 0x68a   :  { %v6715_v62 = vadd.f32 %v6528_v60, %v2783_v42  ;;  %v2223_v36 = vadd.f32 %v2222_v49, %v2094_v58  ;;  %v2105_v58 = vpop.f32.mrf.mxu1 }
 0x68b   :  { %v3126_v33 = vmul.f32 1.442695, %v3078_v47  ;;  %v2788_v22 = vpop.f32.mrf.mxu0 }
 0x68c   :  { %4122 = vmatmul.msk.f32.gmra.mxu3 %vm2270_vm1, %v2223_v36  ;;  %v2979_v16 = vsel %vm2933_vm2, %v6715_v62, -inf }
 0x68d   :  { %4294 = vpow2.f32 %v3126_v33  ;;  %2980 = vmax.xlane.f32.xlu0 %v2979_v16 }
 0x68e   :  { %4171 = vmatmul.msk.f32.gmra.mxu0 %vm2270_vm1, %v7931_v29 }
 0x68f   :  { %v2480_v34 = vpop.f32.mrf.mxu3 }
 0x690   :  { %v2786_v9 = vadd.f32 %v2785_v44, %v2480_v34  ;;  %v6724_v63 = vpop.xlane.xlu0 %2938  ;;  %v7934_v44 = vmax.f32 %v7933_v23, 0.0 }
 0x691   :  { %v3079_v56 = vsub.f32 %v6547_v35, %v6724_v63  ;;  %v2224_v0 = vpop.f32.mrf.mxu2 }
 0x692   :  { %v6729_v50 = vadd.f32 %v6528_v60, %v2786_v9  ;;  %v2225_v45 = vadd.f32 %v2224_v0, %v2096_v10  ;;  %v2101_v10 = vadd.f32 %v2100_v61, %v6378_v28  ;;  %v7937_v61 = vld [vmem:[#allocation45_spill] sm:$0xff] }
 0x693   :  { %v4295_v19 = vpop.eup %4294  ;;  %v3128_v25 = vmul.f32 1.442695, %v3079_v56  ;;  %v2791_v39 = vpop.f32.mrf.mxu0 }
 0x694   :  { %7932 = vst [vmem:[#allocation8_spill] sm:$0xff] %v6729_v50  ;;  %4123 = vmatmul.msk.f32.gmra.mxu3 %vm2270_vm1, %v2225_v45  ;;  %v3222_v59 = vsel %vm2933_vm2, %v4295_v19, 0.0  ;;  %v2982_v48 = vsel %vm2933_vm2, %v6729_v50, -inf }
 0x695   :  { %4296 = vpow2.f32 %v3128_v25  ;;  %3223 = vadd.xlane.f32.xlu0 %v3222_v59  ;;  %2983 = vmax.xlane.f32.xlu1 %v2982_v48  ;;  %v2108_v48 = vpop.f32.mrf.mxu1 }
 0x696   :  { %4172 = vmatmul.msk.f32.gmra.mxu0 %vm2270_vm1, %v7934_v44 }
 0x697   :  { %v2483_v2 = vpop.f32.mrf.mxu3 }
 0x698   :  { %v2789_v24 = vadd.f32 %v2788_v22, %v2483_v2  ;;  %v6739_v46 = vpop.xlane.xlu1 %2941  ;;  %v7936_v22 = vmax.f32 %v7935_v30, 0.0 }
 0x699   :  { %v3080_v42 = vsub.f32 %v6560_v11, %v6739_v46  ;;  %v2227_v47 = vpop.f32.mrf.mxu2 }
 0x69a   :  { %v6744_v49 = vadd.f32 %v6528_v60, %v2789_v24  ;;  %v2228_v36 = vadd.f32 %v2227_v47, %v2099_v32  ;;  %v2104_v24 = vadd.f32 %v2103_v43, %v6388_v20 }
 0x69b   :  { %v4297_v33 = vpop.eup %4296  ;;  %v3130_v16 = vmul.f32 1.442695, %v3080_v42  ;;  %v2794_v7 = vpop.f32.mrf.mxu0 }
 0x69c   :  { %4124 = vmatmul.msk.f32.gmra.mxu3 %vm2270_vm1, %v2228_v36  ;;  %v3225_v29 = vsel %vm2933_vm2, %v4297_v33, 0.0  ;;  %v2985_v12 = vsel %vm2933_vm2, %v6744_v49, -inf }
 0x69d   :  { %4298 = vpow2.f32 %v3130_v16  ;;  %3226 = vadd.xlane.f32.xlu1 %v3225_v29  ;;  %2986 = vmax.xlane.f32.xlu2 %v2985_v12  ;;  %v2110_v43 = vpop.f32.mrf.mxu1 }
 0x69e   :  { %4173 = vmatmul.msk.f32.gmra.mxu0 %vm2270_vm1, %v7936_v22 }
 0x69f   :  { %v2486_v34 = vpop.f32.mrf.mxu3 }
 0x6a0   :  { %v2792_v9 = vadd.f32 %v2791_v39, %v2486_v34  ;;  %v6754_v56 = vpop.xlane.xlu1 %2944  ;;  %v7938_v39 = vmax.f32 %v7937_v61, 0.0 }
 0x6a1   :  { %v3081_v0 = vsub.f32 %v6572_v57, %v6754_v56  ;;  %v2229_v45 = vpop.f32.mrf.mxu2 }
 0x6a2   :  { %v6759_v19 = vadd.f32 %v6528_v60, %v2792_v9  ;;  %v2230_v25 = vadd.f32 %v2229_v45, %v2101_v10 }
 0x6a3   :  { %v4299_v59 = vpop.eup %4298  ;;  %v3132_v23 = vmul.f32 1.442695, %v3081_v0  ;;  %v2797_v44 = vpop.f32.mrf.mxu0  ;;  %v2106_v0 = vadd.f32 %v2105_v58, %v6400_v1  ;;  %v7941_v58 = vld [vmem:[#allocation40_spill] sm:$0xff] }
 0x6a4   :  { %4125 = vmatmul.msk.f32.gmra.mxu3 %vm2270_vm1, %v2230_v25  ;;  %v3228_v2 = vsel %vm2933_vm2, %v4299_v59, 0.0  ;;  %v2988_v28 = vsel %vm2933_vm2, %v6759_v19, -inf }
 0x6a5   :  { %4300 = vpow2.f32 %v3132_v23  ;;  %3229 = vadd.xlane.f32.xlu2 %v3228_v2  ;;  %2989 = vmax.xlane.f32.xlu0 %v2988_v28 }
 0x6a6   :  { %4174 = vmatmul.msk.f32.gmra.mxu0 %vm2270_vm1, %v7938_v39 }
 0x6a7   :  { %v2489_v32 = vpop.f32.mrf.mxu3 }
 0x6a8   :  { %v2795_v42 = vadd.f32 %v2794_v7, %v2489_v32  ;;  %v6769_v47 = vpop.xlane.xlu2 %2947  ;;  %v7939_v7 = vld [vmem:[#allocation72_spill] sm:$0xff] }
 0x6a9   :  { %v3082_v36 = vsub.f32 %v6585_v13, %v6769_v47  ;;  %v2232_v33 = vpop.f32.mrf.mxu2  ;;  %v7940_v10 = vmax.f32 %v7939_v7, 0.0 }
 0x6aa   :  { %v6774_v16 = vadd.f32 %v6528_v60, %v2795_v42  ;;  %v2233_v29 = vadd.f32 %v2232_v33, %v2104_v24  ;;  %v2113_v42 = vpop.f32.mrf.mxu1  ;;  %v2109_v33 = vadd.f32 %v2108_v48, %v6410_v27  ;;  %v7943_v48 = vld [vmem:[#allocation69_spill] sm:$0xff] }
 0x6ab   :  { %v4301_v12 = vpop.eup %4300  ;;  %v3134_v30 = vmul.f32 1.442695, %v3082_v36  ;;  %v2800_v22 = vpop.f32.mrf.mxu0 }
 0x6ac   :  { %4126 = vmatmul.msk.f32.gmra.mxu3 %vm2270_vm1, %v2233_v29  ;;  %v3231_v34 = vsel %vm2933_vm2, %v4301_v12, 0.0  ;;  %v2991_v20 = vsel %vm2933_vm2, %v6774_v16, -inf }
 0x6ad   :  { %4302 = vpow2.f32 %v3134_v30  ;;  %3232 = vadd.xlane.f32.xlu0 %v3231_v34  ;;  %2992 = vmax.xlane.f32.xlu1 %v2991_v20 }
 0x6ae   :  { %4175 = vmatmul.msk.f32.gmra.mxu0 %vm2270_vm1, %v7940_v10 }
 0x6af   :  { %v2492_v9 = vpop.f32.mrf.mxu3 }
 0x6b0   :  { %v2798_v45 = vadd.f32 %v2797_v44, %v2492_v9  ;;  %v6784_v25 = vpop.xlane.xlu2 %2950  ;;  %v7942_v44 = vmax.f32 %v7941_v58, 0.0 }
 0x6b1   :  { %v3083_v59 = vsub.f32 %v6599_v21, %v6784_v25  ;;  %v2234_v23 = vpop.f32.mrf.mxu2 }
 0x6b2   :  { %v6789_v2 = vadd.f32 %v6528_v60, %v2798_v45  ;;  %v2235_v28 = vadd.f32 %v2234_v23, %v2106_v0  ;;  %v2111_v23 = vadd.f32 %v2110_v43, %v6420_v51  ;;  %v7945_v43 = vld [vmem:[#allocation35_spill] sm:$0xff] }
 0x6b3   :  { %v4303_v61 = vpop.eup %4302  ;;  %v3136_v39 = vmul.f32 1.442695, %v3083_v59  ;;  %v2803_v32 = vpop.f32.mrf.mxu0 }
 0x6b4   :  { %4127 = vmatmul.msk.f32.gmra.mxu3 %vm2270_vm1, %v2235_v28  ;;  %v3234_v24 = vsel %vm2933_vm2, %v4303_v61, 0.0  ;;  %v2994_v1 = vsel %vm2933_vm2, %v6789_v2, -inf }
 0x6b5   :  { %4304 = vpow2.f32 %v3136_v39  ;;  %3235 = vadd.xlane.f32.xlu1 %v3234_v24  ;;  %2995 = vmax.xlane.f32.xlu2 %v2994_v1  ;;  %v2115_v39 = vpop.f32.mrf.mxu1 }
 0x6b6   :  { %4176 = vmatmul.msk.f32.gmra.mxu0 %vm2270_vm1, %v7942_v44 }
 0x6b7   :  { %v2495_v36 = vpop.f32.mrf.mxu3 }
 0x6b8   :  { %v2801_v29 = vadd.f32 %v2800_v22, %v2495_v36  ;;  %v6799_v12 = vpop.xlane.xlu0 %2953  ;;  %v7944_v22 = vmax.f32 %v7943_v48, 0.0 }
 0x6b9   :  { %v3084_v30 = vsub.f32 %v6612_v53, %v6799_v12  ;;  %v2237_v34 = vpop.f32.mrf.mxu2 }
 0x6ba   :  { %v6804_v20 = vadd.f32 %v6528_v60, %v2801_v29  ;;  %v2238_v7 = vadd.f32 %v2237_v34, %v2109_v33 }
 0x6bb   :  { %v4305_v10 = vpop.eup %4304  ;;  %v3138_v9 = vmul.f32 1.442695, %v3084_v30  ;;  %v2806_v0 = vpop.f32.mrf.mxu0 }
 0x6bc   :  { %4128 = vmatmul.msk.f32.gmra.mxu3 %vm2270_vm1, %v2238_v7  ;;  %v3237_v45 = vsel %vm2933_vm2, %v4305_v10, 0.0  ;;  %v2997_v27 = vsel %vm2933_vm2, %v6804_v20, -inf  ;;  %v2114_v7 = vadd.f32 %v2113_v42, %v6430_v55  ;;  %v7947_v42 = vld [vmem:[#allocation64_spill] sm:$0xff] }
 0x6bd   :  { %4306 = vpow2.f32 %v3138_v9  ;;  %3238 = vadd.xlane.f32.xlu2 %v3237_v45  ;;  %2998 = vmax.xlane.f32.xlu0 %v2997_v27 }
 0x6be   :  { %4177 = vmatmul.msk.f32.gmra.mxu0 %vm2270_vm1, %v7944_v22 }
 0x6bf   :  { %v2498_v59 = vpop.f32.mrf.mxu3 }
 0x6c0   :  { %v2804_v28 = vadd.f32 %v2803_v32, %v2498_v59  ;;  %v6814_v61 = vpop.xlane.xlu1 %2956  ;;  %v7946_v32 = vmax.f32 %v7945_v43, 0.0 }
 0x6c1   :  { %v3085_v24 = vsub.f32 %v6624_v8, %v6814_v61  ;;  %v2239_v1 = vpop.f32.mrf.mxu2 }
 0x6c2   :  { %v6819_v58 = vadd.f32 %v6528_v60, %v2804_v28  ;;  %v2240_v44 = vadd.f32 %v2239_v1, %v2111_v23  ;;  %v2118_v23 = vpop.f32.mrf.mxu1 }
 0x6c3   :  { %v4307_v36 = vpop.eup %4306  ;;  %v3140_v33 = vmul.f32 1.442695, %v3085_v24  ;;  %v2809_v29 = vpop.f32.mrf.mxu0 }
 0x6c4   :  { %4129 = vmatmul.msk.f32.gmra.mxu3 %vm2270_vm1, %v2240_v44  ;;  %v3240_v30 = vsel %vm2933_vm2, %v4307_v36, 0.0  ;;  %v3000_v51 = vsel %vm2933_vm2, %v6819_v58, -inf  ;;  %v2116_v36 = vadd.f32 %v2115_v39, %v6442_v40 }
 0x6c5   :  { %4308 = vpow2.f32 %v3140_v33  ;;  %3241 = vadd.xlane.f32.xlu0 %v3240_v30  ;;  %3001 = vmax.xlane.f32.xlu1 %v3000_v51 }
 0x6c6   :  { %4178 = vmatmul.msk.f32.gmra.mxu0 %vm2270_vm1, %v7946_v32 }
 0x6c7   :  { %v2501_v34 = vpop.f32.mrf.mxu3 }
 0x6c8   :  { %v2807_v10 = vadd.f32 %v2806_v0, %v2501_v34  ;;  %v6829_v9 = vpop.xlane.xlu2 %2959  ;;  %v7948_v0 = vmax.f32 %v7947_v42, 0.0 }
 0x6c9   :  { %v3086_v45 = vsub.f32 %v6635_v41, %v6829_v9  ;;  %v2242_v27 = vpop.f32.mrf.mxu2 }
 0x6ca   :  { %v6834_v48 = vadd.f32 %v6528_v60, %v2807_v10  ;;  %v2243_v22 = vadd.f32 %v2242_v27, %v2114_v7  ;;  %v2120_v39 = vpop.f32.mrf.mxu1 }
 0x6cb   :  { %v4309_v59 = vpop.eup %4308  ;;  %v3142_v28 = vmul.f32 1.442695, %v3086_v45  ;;  %v2812_v24 = vpop.f32.mrf.mxu0 }
 0x6cc   :  { %4130 = vmatmul.msk.f32.gmra.mxu3 %vm2270_vm1, %v2243_v22  ;;  %v3243_v1 = vsel %vm2933_vm2, %v4309_v59, 0.0  ;;  %v3003_v55 = vsel %vm2933_vm2, %v6834_v48, -inf }
 0x6cd   :  { %4310 = vpow2.f32 %v3142_v28  ;;  %3244 = vadd.xlane.f32.xlu1 %v3243_v1  ;;  %3004 = vmax.xlane.f32.xlu2 %v3003_v55  ;;  %v2119_v28 = vadd.f32 %v2118_v23, %v6452_v14  ;;  %v7951_v23 = vld [vmem:[#allocation59_spill] sm:$0xff] }
 0x6ce   :  { %4179 = vmatmul.msk.f32.gmra.mxu0 %vm2270_vm1, %v7948_v0 }
 0x6cf   :  { %v2504_v44 = vpop.f32.mrf.mxu3 }
 0x6d0   :  { %v2810_v33 = vadd.f32 %v2809_v29, %v2504_v44  ;;  %v6844_v30 = vpop.xlane.xlu0 %2962  ;;  %v7949_v29 = vld [vmem:[#allocation30_spill] sm:$0xff] }
 0x6d1   :  { %v3087_v51 = vsub.f32 %v6647_v38, %v6844_v30  ;;  %v2244_v43 = vpop.f32.mrf.mxu2  ;;  %v7950_v22 = vmax.f32 %v7949_v29, 0.0 }
 0x6d2   :  { %v6849_v32 = vadd.f32 %v6528_v60, %v2810_v33  ;;  %v2245_v34 = vadd.f32 %v2244_v43, %v2116_v36 }
 0x6d3   :  { %v4311_v7 = vpop.eup %4310  ;;  %v3144_v10 = vmul.f32 1.442695, %v3087_v51  ;;  %v2815_v45 = vpop.f32.mrf.mxu0 }
 0x6d4   :  { %4131 = vmatmul.msk.f32.gmra.mxu3 %vm2270_vm1, %v2245_v34  ;;  %v3246_v27 = vsel %vm2933_vm2, %v4311_v7, 0.0  ;;  %v3006_v40 = vsel %vm2933_vm2, %v6849_v32, -inf  ;;  %v2123_v7 = vpop.f32.mrf.mxu1 }
 0x6d5   :  { %4312 = vpow2.f32 %v3144_v10  ;;  %3247 = vadd.xlane.f32.xlu2 %v3246_v27  ;;  %3007 = vmax.xlane.f32.xlu0 %v3006_v40  ;;  %v2121_v27 = vadd.f32 %v2120_v39, %v6464_v15 }
 0x6d6   :  { %4180 = vmatmul.msk.f32.gmra.mxu0 %vm2270_vm1, %v7950_v22 }
 0x6d7   :  { %v2507_v59 = vpop.f32.mrf.mxu3 }
 0x6d8   :  { %v2813_v1 = vadd.f32 %v2812_v24, %v2507_v59  ;;  %v6859_v55 = vpop.xlane.xlu1 %2965  ;;  %v7952_v24 = vmax.f32 %v7951_v23, 0.0 }
 0x6d9   :  { %v3088_v42 = vsub.f32 %v6658_v52, %v6859_v55  ;;  %v2247_v0 = vpop.f32.mrf.mxu2 }
 0x6da   :  { %v6864_v44 = vadd.f32 %v6528_v60, %v2813_v1  ;;  %v2248_v36 = vadd.f32 %v2247_v0, %v2119_v28 }
 0x6db   :  { %v4313_v33 = vpop.eup %4312  ;;  %v3146_v51 = vmul.f32 1.442695, %v3088_v42  ;;  %v2818_v43 = vpop.f32.mrf.mxu0 }
 0x6dc   :  { %4132 = vmatmul.msk.f32.gmra.mxu3 %vm2270_vm1, %v2248_v36  ;;  %v3249_v34 = vsel %vm2933_vm2, %v4313_v33, 0.0  ;;  %v3009_v14 = vsel %vm2933_vm2, %v6864_v44, -inf }
 0x6dd   :  { %4314 = vpow2.f32 %v3146_v51  ;;  %3250 = vadd.xlane.f32.xlu0 %v3249_v34  ;;  %3010 = vmax.xlane.f32.xlu1 %v3009_v14  ;;  %v2124_v34 = vadd.f32 %v2123_v7, %v6472_v6 }
 0x6de   :  { %4181 = vmatmul.msk.f32.gmra.mxu0 %vm2270_vm1, %v7952_v24  ;;  %v2125_v24 = vpop.f32.mrf.mxu1 }
 0x6df   :  { %v2510_v10 = vpop.f32.mrf.mxu3 }
 0x6e0   :  { %v2816_v40 = vadd.f32 %v2815_v45, %v2510_v10  ;;  %v6874_v29 = vpop.xlane.xlu2 %2968  ;;  %v7953_v45 = vld [vmem:[#allocation54_spill] sm:$0xff] }
 0x6e1   :  { %v3089_v22 = vsub.f32 %v6670_v3, %v6874_v29  ;;  %v2249_v59 = vpop.f32.mrf.mxu2  ;;  %v7954_v39 = vmax.f32 %v7953_v45, 0.0 }
 0x6e2   :  { %v6879_v28 = vadd.f32 %v6528_v60, %v2816_v40  ;;  %v2250_v1 = vadd.f32 %v2249_v59, %v2121_v27 }
 0x6e3   :  { %v4315_v42 = vpop.eup %4314  ;;  %v3148_v0 = vmul.f32 1.442695, %v3089_v22  ;;  %v2821_v36 = vpop.f32.mrf.mxu0 }
 0x6e4   :  { %4133 = vmatmul.msk.f32.gmra.mxu3 %vm2270_vm1, %v2250_v1  ;;  %v3252_v33 = vsel %vm2933_vm2, %v4315_v42, 0.0  ;;  %v3012_v15 = vsel %vm2933_vm2, %v6879_v28, -inf }
 0x6e5   :  { %4316 = vpow2.f32 %v3148_v0  ;;  %3253 = vadd.xlane.f32.xlu1 %v3252_v33  ;;  %3013 = vmax.xlane.f32.xlu2 %v3012_v15  ;;  %v2126_v15 = vadd.f32 %v2125_v24, %v6484_v31 }
 0x6e6   :  { %4182 = vmatmul.msk.f32.gmra.mxu0 %vm2270_vm1, %v7954_v39 }
 0x6e7   :  { %v2513_v51 = vpop.f32.mrf.mxu3 }
 0x6e8   :  { %v2819_v14 = vadd.f32 %v2818_v43, %v2513_v51  ;;  %v6889_v23 = vpop.xlane.xlu0 %2971  ;;  %v7955_v43 = vld [vmem:[#allocation44_spill] sm:$0xff] }
 0x6e9   :  { %v3090_v10 = vsub.f32 %v6680_v54, %v6889_v23  ;;  %v2252_v27 = vpop.f32.mrf.mxu2  ;;  %v7956_v7 = vmax.f32 %v7955_v43, 0.0 }
 0x6ea   :  { %v6894_v40 = vadd.f32 %v6528_v60, %v2819_v14  ;;  %v2253_v22 = vadd.f32 %v2252_v27, %v2124_v34 }
 0x6eb   :  { %v4317_v59 = vpop.eup %4316  ;;  %v3150_v1 = vmul.f32 1.442695, %v3090_v10  ;;  %v2824_v42 = vpop.f32.mrf.mxu0 }
 0x6ec   :  { %4134 = vmatmul.msk.f32.gmra.mxu3 %vm2270_vm1, %v2253_v22  ;;  %v3255_v0 = vsel %vm2933_vm2, %v4317_v59, 0.0  ;;  %v3015_v6 = vsel %vm2933_vm2, %v6894_v40, -inf  ;;  %v2128_v22 = vpop.f32.mrf.mxu1 }
 0x6ed   :  { %4318 = vpow2.f32 %v3150_v1  ;;  %3256 = vadd.xlane.f32.xlu2 %v3255_v0  ;;  %3016 = vmax.xlane.f32.xlu0 %v3015_v6  ;;  %v2129_v43 = vadd.f32 %v2128_v22, %v6494_v4  ;;  %v7960_v22 = vld [vmem:[#allocation49_spill] sm:$0xff] }
 0x6ee   :  { %4183 = vmatmul.msk.f32.gmra.mxu0 %vm2270_vm1, %v7956_v7 }
 0x6ef   :  { %v2516_v33 = vpop.f32.mrf.mxu3 }
 0x6f0   :  { %v2822_v45 = vadd.f32 %v2821_v36, %v2516_v33  ;;  %v6904_v39 = vpop.xlane.xlu1 %2974  ;;  %v7957_v36 = vld [vmem:[#allocation39_spill] sm:$0xff] }
 0x6f1   :  { %v3091_v51 = vsub.f32 %v6691_v5, %v6904_v39  ;;  %v2254_v34 = vpop.f32.mrf.mxu2  ;;  %v7958_v24 = vmax.f32 %v7957_v36, 0.0 }
 0x6f2   :  { %v6909_v14 = vadd.f32 %v6528_v60, %v2822_v45  ;;  %v2255_v10 = vadd.f32 %v2254_v34, %v2126_v15 }
 0x6f3   :  { %v4319_v27 = vpop.eup %4318  ;;  %v3152_v59 = vmul.f32 1.442695, %v3091_v51  ;;  %v2827_v1 = vpop.f32.mrf.mxu0 }
 0x6f4   :  { %4135 = vmatmul.msk.f32.gmra.mxu3 %vm2270_vm1, %v2255_v10  ;;  %v3258_v0 = vsel %vm2933_vm2, %v4319_v27, 0.0  ;;  %v3018_v31 = vsel %vm2933_vm2, %v6909_v14, -inf }
 0x6f5   :  { %4320 = vpow2.f32 %v3152_v59  ;;  %3259 = vadd.xlane.f32.xlu0 %v3258_v0  ;;  %3019 = vmax.xlane.f32.xlu1 %v3018_v31  ;;  %v7961_v31 = vmax.f32 %v7960_v22, 0.0 }
 0x6f6   :  { %4184 = vmatmul.msk.f32.gmra.mxu0 %vm2270_vm1, %v7958_v24 }
 0x6f7   :  { %v2519_v6 = vpop.f32.mrf.mxu3 }
 0x6f8   :  { %v2825_v7 = vadd.f32 %v2824_v42, %v2519_v6  ;;  %v6919_v33 = vpop.xlane.xlu2 %2977  ;;  %v2130_v42 = vpop.f32.mrf.mxu1 }
 0x6f9   :  { %v3092_v15 = vsub.f32 %v6701_v37, %v6919_v33  ;;  %v2257_v45 = vpop.f32.mrf.mxu2  ;;  %v2131_v24 = vadd.f32 %v2130_v42, %v6506_v26 }
 0x6fa   :  { %v6924_v51 = vadd.f32 %v6528_v60, %v2825_v7  ;;  %v2258_v34 = vadd.f32 %v2257_v45, %v2129_v43 }
 0x6fb   :  { %v4321_v10 = vpop.eup %4320  ;;  %v3154_v27 = vmul.f32 1.442695, %v3092_v15  ;;  %v2830_v59 = vpop.f32.mrf.mxu0 }
 0x6fc   :  { %7959 = vst [vmem:[#allocation65_spill] sm:$0xff] %v6924_v51  ;;  %4136 = vmatmul.msk.f32.gmra.mxu3 %vm2270_vm1, %v2258_v34  ;;  %v3261_v0 = vsel %vm2933_vm2, %v4321_v10, 0.0  ;;  %v3021_v4 = vsel %vm2933_vm2, %v6924_v51, -inf }
 0x6fd   :  { %4322 = vpow2.f32 %v3154_v27  ;;  %3262 = vadd.xlane.f32.xlu1 %v3261_v0  ;;  %3022 = vmax.xlane.f32.xlu2 %v3021_v4 }
 0x6fe   :  { %4185 = vmatmul.msk.f32.gmra.mxu0 %vm2270_vm1, %v7961_v31 }
 0x6ff   :  { %v2522_v36 = vpop.f32.mrf.mxu3 }
 0x700   :  { %v2828_v6 = vadd.f32 %v2827_v1, %v2522_v36  ;;  %v6934_v43 = vpop.xlane.xlu0 %2980 }
 0x701   :  { %v3093_v7 = vsub.f32 %v6715_v62, %v6934_v43  ;;  %v2259_v15 = vpop.f32.mrf.mxu2 }
 0x702   :  { %v6939_v45 = vadd.f32 %v6528_v60, %v2828_v6  ;;  %v2260_v34 = vadd.f32 %v2259_v15, %v2131_v24 }
 0x703   :  { %v4323_v10 = vpop.eup %4322  ;;  %v3156_v27 = vmul.f32 1.442695, %v3093_v7  ;;  %v2833_v0 = vpop.f32.mrf.mxu0 }
 0x704   :  { %4137 = vmatmul.msk.f32.gmra.mxu3 %vm2270_vm1, %v2260_v34  ;;  %v3264_v4 = vsel %vm2933_vm2, %v4323_v10, 0.0  ;;  %v3024_v26 = vsel %vm2933_vm2, %v6939_v45, -inf }
 0x705   :  { %4324 = vpow2.f32 %v3156_v27  ;;  %3265 = vadd.xlane.f32.xlu2 %v3264_v4  ;;  %3025 = vmax.xlane.f32.xlu0 %v3024_v26 }
 0x707   :  { %v2525_v1 = vpop.f32.mrf.mxu3 }
 0x708   :  { %v2831_v42 = vadd.f32 %v2830_v59, %v2525_v1  ;;  %v3224_v22 = vpop.xlane.xlu0 %3223  ;;  %v6945_v31 = vpop.xlane.xlu1 %2983 }
 0x709   :  { %4326 = vlog2.f32 %v3224_v22  ;;  %v3094_v36 = vsub.f32 %v6729_v50, %v6945_v31 }
 0x70a   :  { %v6950_v24 = vadd.f32 %v6528_v60, %v2831_v42 }
 0x70b   :  { %v4325_v6 = vpop.eup %4324  ;;  %v3158_v7 = vmul.f32 1.442695, %v3094_v36  ;;  %v2836_v15 = vpop.f32.mrf.mxu0 }
 0x70c   :  { %v3267_v34 = vsel %vm2933_vm2, %v4325_v6, 0.0  ;;  %v3027_v10 = vsel %vm2933_vm2, %v6950_v24, -inf }
 0x70d   :  { %4328 = vpow2.f32 %v3158_v7  ;;  %3268 = vadd.xlane.f32.xlu0 %v3267_v34  ;;  %3028 = vmax.xlane.f32.xlu1 %v3027_v10 }
 0x70f   :  { %v4327_v59 = vpop.eup %4326  ;;  %v2528_v27 = vpop.f32.mrf.mxu3 }
 0x710   :  { %v3367_v4 = vmul.f32 0.6931472, %v4327_v59  ;;  %v2834_v26 = vadd.f32 %v2833_v0, %v2528_v27  ;;  %v3227_v1 = vpop.xlane.xlu1 %3226  ;;  %v6955_v22 = vpop.xlane.xlu2 %2986 }
 0x711   :  { %4330 = vlog2.f32 %v3227_v1  ;;  %v3095_v42 = vsub.f32 %v6744_v49, %v6955_v22 }
 0x712   :  { %v3462_v36 = vadd.f32 %v3367_v4, %v6710_v17  ;;  %v6961_v6 = vadd.f32 %v6528_v60, %v2834_v26 }
 0x713   :  { %v4329_v50 = vpop.eup %4328  ;;  %v3160_v7 = vmul.f32 1.442695, %v3095_v42  ;;  %v2839_v34 = vpop.f32.mrf.mxu0  ;;  %v6979_v42 = vld [vmem:[%s7491_s7] ss:$0 sm:$0xff] }
 0x714   :  { %v3510_v10 = vsub.f32 %v6533_v18, %v3462_v36  ;;  %v3270_v59 = vsel %vm2933_vm2, %v4329_v50, 0.0  ;;  %v3030_v0 = vsel %vm2933_vm2, %v6961_v6, -inf }
 0x715   :  { %4332 = vpow2.f32 %v3160_v7  ;;  %3271 = vadd.xlane.f32.xlu1 %v3270_v59  ;;  %3031 = vmax.xlane.f32.xlu2 %v3030_v0 }
 0x716   :  { %3558 = vst.msk [vmem:[%s7492_s8] sm:$0xff] %vm2933_vm2, %v3510_v10 }
 0x717   :  { %v4331_v60 = vpop.eup %4330  ;;  %v2531_v17 = vpop.f32.mrf.mxu3 }
 0x718   :  { %v3369_v27 = vmul.f32 0.6931472, %v4331_v60  ;;  %v2837_v4 = vadd.f32 %v2836_v15, %v2531_v17  ;;  %v3230_v26 = vpop.xlane.xlu2 %3229  ;;  %v6971_v1 = vpop.xlane.xlu0 %2989 }
 0x719   :  { %4334 = vlog2.f32 %v3230_v26  ;;  %v3096_v18 = vsub.f32 %v6759_v19, %v6971_v1 }
 0x71a   :  { %v3463_v50 = vadd.f32 %v3369_v27, %v6724_v63  ;;  %v6982_v36 = vadd.f32 %v6979_v42, %v2837_v4 }
 0x71b   :  { %v4333_v7 = vpop.eup %4332  ;;  %v3162_v10 = vmul.f32 1.442695, %v3096_v18  ;;  %v2842_v15 = vpop.f32.mrf.mxu0 }
 0x71c   :  { %v3511_v59 = vsub.f32 %v6547_v35, %v3463_v50  ;;  %v3273_v0 = vsel %vm2933_vm2, %v4333_v7, 0.0  ;;  %v3033_v60 = vsel %vm2933_vm2, %v6982_v36, -inf }
 0x71d   :  { %4336 = vpow2.f32 %v3162_v10  ;;  %3274 = vadd.xlane.f32.xlu2 %v3273_v0  ;;  %3034 = vmax.xlane.f32.xlu0 %v3033_v60 }
 0x71e   :  { %3559 = vst.msk [vmem:[%s7492_s8 + $0x8] sm:$0xff] %vm2933_vm2, %v3511_v59 }
 0x71f   :  { %v4335_v63 = vpop.eup %4334  ;;  %v2534_v17 = vpop.f32.mrf.mxu3 }
 0x720   :  { %v3371_v27 = vmul.f32 0.6931472, %v4335_v63  ;;  %v2840_v4 = vadd.f32 %v2839_v34, %v2534_v17  ;;  %v3233_v26 = vpop.xlane.xlu0 %3232  ;;  %v6992_v18 = vpop.xlane.xlu1 %2992 }
 0x721   :  { %4338 = vlog2.f32 %v3233_v26  ;;  %v3097_v35 = vsub.f32 %v6774_v16, %v6992_v18 }
 0x722   :  { %v3464_v50 = vadd.f32 %v3371_v27, %v6739_v46  ;;  %v6998_v7 = vadd.f32 %v6979_v42, %v2840_v4 }
 0x723   :  { %v4337_v10 = vpop.eup %4336  ;;  %v3164_v0 = vmul.f32 1.442695, %v3097_v35  ;;  %v2845_v60 = vpop.f32.mrf.mxu0 }
 0x724   :  { %v3512_v59 = vsub.f32 %v6560_v11, %v3464_v50  ;;  %v3276_v63 = vsel %vm2933_vm2, %v4337_v10, 0.0  ;;  %v3036_v34 = vsel %vm2933_vm2, %v6998_v7, -inf }
 0x725   :  { %4340 = vpow2.f32 %v3164_v0  ;;  %3277 = vadd.xlane.f32.xlu0 %v3276_v63  ;;  %3037 = vmax.xlane.f32.xlu1 %v3036_v34 }
 0x726   :  { %3560 = vst.msk [vmem:[%s7492_s8 + $0x10] sm:$0xff] %vm2933_vm2, %v3512_v59 }
 0x727   :  { %v4339_v46 = vpop.eup %4338  ;;  %v2537_v17 = vpop.f32.mrf.mxu3 }
 0x728   :  { %v3373_v27 = vmul.f32 0.6931472, %v4339_v46  ;;  %v2843_v4 = vadd.f32 %v2842_v15, %v2537_v17  ;;  %v3236_v26 = vpop.xlane.xlu1 %3235  ;;  %v7008_v35 = vpop.xlane.xlu2 %2995 }
 0x729   :  { %4342 = vlog2.f32 %v3236_v26  ;;  %v3098_v11 = vsub.f32 %v6789_v2, %v7008_v35 }
 0x72a   :  { %v3465_v50 = vadd.f32 %v3373_v27, %v6754_v56  ;;  %v7014_v10 = vadd.f32 %v6979_v42, %v2843_v4 }
 0x72b   :  { %v4341_v0 = vpop.eup %4340  ;;  %v3166_v63 = vmul.f32 1.442695, %v3098_v11  ;;  %v2848_v34 = vpop.f32.mrf.mxu0 }
 0x72c   :  { %v3513_v59 = vsub.f32 %v6572_v57, %v3465_v50  ;;  %v3279_v46 = vsel %vm2933_vm2, %v4341_v0, 0.0  ;;  %v3039_v15 = vsel %vm2933_vm2, %v7014_v10, -inf }
 0x72d   :  { %4344 = vpow2.f32 %v3166_v63  ;;  %3280 = vadd.xlane.f32.xlu1 %v3279_v46  ;;  %3040 = vmax.xlane.f32.xlu2 %v3039_v15 }
 0x72e   :  { %3561 = vst.msk [vmem:[%s7492_s8 + $0x18] sm:$0xff] %vm2933_vm2, %v3513_v59 }
 0x72f   :  { %v4343_v56 = vpop.eup %4342  ;;  %v2540_v17 = vpop.f32.mrf.mxu3 }
 0x730   :  { %v3375_v27 = vmul.f32 0.6931472, %v4343_v56  ;;  %v2846_v4 = vadd.f32 %v2845_v60, %v2540_v17  ;;  %v3239_v26 = vpop.xlane.xlu2 %3238  ;;  %v7024_v11 = vpop.xlane.xlu0 %2998 }
 0x731   :  { %4346 = vlog2.f32 %v3239_v26  ;;  %v3099_v57 = vsub.f32 %v6804_v20, %v7024_v11 }
 0x732   :  { %v3466_v50 = vadd.f32 %v3375_v27, %v6769_v47  ;;  %v7030_v0 = vadd.f32 %v6979_v42, %v2846_v4 }
 0x733   :  { %v4345_v63 = vpop.eup %4344  ;;  %v3168_v46 = vmul.f32 1.442695, %v3099_v57  ;;  %v2851_v15 = vpop.f32.mrf.mxu0 }
 0x734   :  { %v3514_v59 = vsub.f32 %v6585_v13, %v3466_v50  ;;  %v3282_v56 = vsel %vm2933_vm2, %v4345_v63, 0.0  ;;  %v3042_v60 = vsel %vm2933_vm2, %v7030_v0, -inf }
 0x735   :  { %4348 = vpow2.f32 %v3168_v46  ;;  %3283 = vadd.xlane.f32.xlu2 %v3282_v56  ;;  %3043 = vmax.xlane.f32.xlu0 %v3042_v60 }
 0x736   :  { %3562 = vst.msk [vmem:[%s7492_s8 + $0x20] sm:$0xff] %vm2933_vm2, %v3514_v59 }
 0x737   :  { %v4347_v47 = vpop.eup %4346  ;;  %v2543_v17 = vpop.f32.mrf.mxu3 }
 0x738   :  { %v3377_v27 = vmul.f32 0.6931472, %v4347_v47  ;;  %v2849_v4 = vadd.f32 %v2848_v34, %v2543_v17  ;;  %v3242_v26 = vpop.xlane.xlu0 %3241  ;;  %v7040_v57 = vpop.xlane.xlu1 %3001 }
 0x739   :  { %4350 = vlog2.f32 %v3242_v26  ;;  %v3100_v13 = vsub.f32 %v6819_v58, %v7040_v57 }
 0x73a   :  { %v3467_v50 = vadd.f32 %v3377_v27, %v6784_v25  ;;  %v7046_v63 = vadd.f32 %v6979_v42, %v2849_v4 }
 0x73b   :  { %v4349_v46 = vpop.eup %4348  ;;  %v3170_v56 = vmul.f32 1.442695, %v3100_v13  ;;  %v2854_v60 = vpop.f32.mrf.mxu0 }
 0x73c   :  { %v3515_v59 = vsub.f32 %v6599_v21, %v3467_v50  ;;  %v3285_v47 = vsel %vm2933_vm2, %v4349_v46, 0.0  ;;  %v3045_v34 = vsel %vm2933_vm2, %v7046_v63, -inf }
 0x73d   :  { %4352 = vpow2.f32 %v3170_v56  ;;  %3286 = vadd.xlane.f32.xlu0 %v3285_v47  ;;  %3046 = vmax.xlane.f32.xlu1 %v3045_v34 }
 0x73e   :  { %3563 = vst.msk [vmem:[%s7492_s8 + $0x28] sm:$0xff] %vm2933_vm2, %v3515_v59 }
 0x73f   :  { %v4351_v25 = vpop.eup %4350  ;;  %v2546_v17 = vpop.f32.mrf.mxu3 }
 0x740   :  { %v3379_v27 = vmul.f32 0.6931472, %v4351_v25  ;;  %v2852_v4 = vadd.f32 %v2851_v15, %v2546_v17  ;;  %v3245_v26 = vpop.xlane.xlu1 %3244  ;;  %v7056_v13 = vpop.xlane.xlu2 %3004 }
 0x741   :  { %4354 = vlog2.f32 %v3245_v26  ;;  %v3101_v21 = vsub.f32 %v6834_v48, %v7056_v13 }
 0x742   :  { %v3468_v50 = vadd.f32 %v3379_v27, %v6799_v12  ;;  %v7062_v46 = vadd.f32 %v6979_v42, %v2852_v4 }
 0x743   :  { %v4353_v56 = vpop.eup %4352  ;;  %v3172_v47 = vmul.f32 1.442695, %v3101_v21  ;;  %v2857_v34 = vpop.f32.mrf.mxu0 }
 0x744   :  { %v3516_v59 = vsub.f32 %v6612_v53, %v3468_v50  ;;  %v3288_v25 = vsel %vm2933_vm2, %v4353_v56, 0.0  ;;  %v3048_v15 = vsel %vm2933_vm2, %v7062_v46, -inf }
 0x745   :  { %4356 = vpow2.f32 %v3172_v47  ;;  %3289 = vadd.xlane.f32.xlu1 %v3288_v25  ;;  %3049 = vmax.xlane.f32.xlu2 %v3048_v15 }
 0x746   :  { %3564 = vst.msk [vmem:[%s7492_s8 + $0x30] sm:$0xff] %vm2933_vm2, %v3516_v59 }
 0x747   :  { %v4355_v12 = vpop.eup %4354  ;;  %v2549_v17 = vpop.f32.mrf.mxu3 }
 0x748   :  { %v3381_v27 = vmul.f32 0.6931472, %v4355_v12  ;;  %v2855_v4 = vadd.f32 %v2854_v60, %v2549_v17  ;;  %v3248_v26 = vpop.xlane.xlu2 %3247  ;;  %v7072_v21 = vpop.xlane.xlu0 %3007 }
 0x749   :  { %4358 = vlog2.f32 %v3248_v26  ;;  %v3102_v53 = vsub.f32 %v6849_v32, %v7072_v21 }
 0x74a   :  { %v3469_v50 = vadd.f32 %v3381_v27, %v6814_v61  ;;  %v7078_v56 = vadd.f32 %v6979_v42, %v2855_v4 }
 0x74b   :  { %v4357_v47 = vpop.eup %4356  ;;  %v3174_v25 = vmul.f32 1.442695, %v3102_v53  ;;  %v2860_v15 = vpop.f32.mrf.mxu0 }
 0x74c   :  { %v3517_v59 = vsub.f32 %v6624_v8, %v3469_v50  ;;  %v3291_v12 = vsel %vm2933_vm2, %v4357_v47, 0.0  ;;  %v3051_v60 = vsel %vm2933_vm2, %v7078_v56, -inf }
 0x74d   :  { %4360 = vpow2.f32 %v3174_v25  ;;  %3292 = vadd.xlane.f32.xlu2 %v3291_v12  ;;  %3052 = vmax.xlane.f32.xlu0 %v3051_v60 }
 0x74e   :  { %3565 = vst.msk [vmem:[%s7492_s8 + $0x38] sm:$0xff] %vm2933_vm2, %v3517_v59 }
 0x74f   :  { %v4359_v61 = vpop.eup %4358  ;;  %v2552_v17 = vpop.f32.mrf.mxu3 }
 0x750   :  { %v3383_v27 = vmul.f32 0.6931472, %v4359_v61  ;;  %v2858_v4 = vadd.f32 %v2857_v34, %v2552_v17  ;;  %v3251_v26 = vpop.xlane.xlu0 %3250  ;;  %v7088_v53 = vpop.xlane.xlu1 %3010 }
 0x751   :  { %4362 = vlog2.f32 %v3251_v26  ;;  %v3103_v8 = vsub.f32 %v6864_v44, %v7088_v53 }
 0x752   :  { %v3470_v50 = vadd.f32 %v3383_v27, %v6829_v9  ;;  %v7094_v47 = vadd.f32 %v6979_v42, %v2858_v4 }
 0x753   :  { %v4361_v25 = vpop.eup %4360  ;;  %v3176_v12 = vmul.f32 1.442695, %v3103_v8  ;;  %v2863_v61 = vpop.f32.mrf.mxu0 }
 0x754   :  { %v3518_v59 = vsub.f32 %v6635_v41, %v3470_v50  ;;  %v3294_v60 = vsel %vm2933_vm2, %v4361_v25, 0.0  ;;  %v3054_v34 = vsel %vm2933_vm2, %v7094_v47, -inf }
 0x755   :  { %4364 = vpow2.f32 %v3176_v12  ;;  %3295 = vadd.xlane.f32.xlu0 %v3294_v60  ;;  %3055 = vmax.xlane.f32.xlu1 %v3054_v34 }
 0x756   :  { %3566 = vst.msk [vmem:[%s7492_s8 + $0x40] sm:$0xff] %vm2933_vm2, %v3518_v59 }
 0x757   :  { %v4363_v9 = vpop.eup %4362  ;;  %v2555_v17 = vpop.f32.mrf.mxu3 }
 0x758   :  { %v3385_v27 = vmul.f32 0.6931472, %v4363_v9  ;;  %v2861_v4 = vadd.f32 %v2860_v15, %v2555_v17  ;;  %v3254_v26 = vpop.xlane.xlu1 %3253  ;;  %v7104_v41 = vpop.xlane.xlu2 %3013 }
 0x759   :  { %4366 = vlog2.f32 %v3254_v26  ;;  %v3104_v8 = vsub.f32 %v6879_v28, %v7104_v41 }
 0x75a   :  { %v3471_v50 = vadd.f32 %v3385_v27, %v6844_v30  ;;  %v7110_v25 = vadd.f32 %v6979_v42, %v2861_v4 }
 0x75b   :  { %v4365_v12 = vpop.eup %4364  ;;  %v3178_v60 = vmul.f32 1.442695, %v3104_v8  ;;  %v2866_v9 = vpop.f32.mrf.mxu0 }
 0x75c   :  { %v3519_v59 = vsub.f32 %v6647_v38, %v3471_v50  ;;  %v3297_v34 = vsel %vm2933_vm2, %v4365_v12, 0.0  ;;  %v3057_v15 = vsel %vm2933_vm2, %v7110_v25, -inf }
 0x75d   :  { %4368 = vpow2.f32 %v3178_v60  ;;  %3298 = vadd.xlane.f32.xlu1 %v3297_v34  ;;  %3058 = vmax.xlane.f32.xlu2 %v3057_v15 }
 0x75e   :  { %3567 = vst.msk [vmem:[%s7492_s8 + $0x48] sm:$0xff] %vm2933_vm2, %v3519_v59 }
 0x75f   :  { %v4367_v30 = vpop.eup %4366  ;;  %v2558_v17 = vpop.f32.mrf.mxu3 }
 0x760   :  { %v3387_v27 = vmul.f32 0.6931472, %v4367_v30  ;;  %v2864_v4 = vadd.f32 %v2863_v61, %v2558_v17  ;;  %v3257_v26 = vpop.xlane.xlu2 %3256  ;;  %v7120_v38 = vpop.xlane.xlu0 %3016 }
 0x761   :  { %4370 = vlog2.f32 %v3257_v26 }
 0x762   :  { %v3472_v8 = vadd.f32 %v3387_v27, %v6859_v55  ;;  %v7124_v50 = vadd.f32 %v6979_v42, %v2864_v4 }
 0x763   :  { %v4369_v12 = vpop.eup %4368 }
 0x764   :  { %v3520_v60 = vsub.f32 %v6658_v52, %v3472_v8  ;;  %v3300_v34 = vsel %vm2933_vm2, %v4369_v12, 0.0  ;;  %v3060_v59 = vsel %vm2933_vm2, %v7124_v50, -inf  ;;  %v2869_v52 = vpop.f32.mrf.mxu0 }
 0x765   :  { %3301 = vadd.xlane.f32.xlu2 %v3300_v34  ;;  %3061 = vmax.xlane.f32.xlu0 %v3060_v59 }
 0x766   :  { %3568 = vst.msk [vmem:[%s7492_s8 + $0x50] sm:$0xff] %vm2933_vm2, %v3520_v60 }
 0x767   :  { %v4371_v61 = vpop.eup %4370  ;;  %v2561_v55 = vpop.f32.mrf.mxu3 }
 0x768   :  { %v3389_v15 = vmul.f32 0.6931472, %v4371_v61  ;;  %v2867_v30 = vadd.f32 %v2866_v9, %v2561_v55  ;;  %v3260_v17 = vpop.xlane.xlu0 %3259  ;;  %v7134_v27 = vpop.xlane.xlu1 %3019 }
 0x769   :  { %4372 = vlog2.f32 %v3260_v17 }
 0x76a   :  { %v3473_v4 = vadd.f32 %v3389_v15, %v6874_v29  ;;  %v7138_v26 = vadd.f32 %v6979_v42, %v2867_v30  ;;  %v3105_v15 = vsub.f32 %v6894_v40, %v7120_v38 }
 0x76c   :  { %v3521_v8 = vsub.f32 %v6670_v3, %v3473_v4  ;;  %v3063_v12 = vsel %vm2933_vm2, %v7138_v26, -inf  ;;  %v2872_v30 = vpop.f32.mrf.mxu0 }
 0x76d   :  { %3064 = vmax.xlane.f32.xlu1 %v3063_v12 }
 0x76e   :  { %3569 = vst.msk [vmem:[%s7492_s8 + $0x58] sm:$0xff] %vm2933_vm2, %v3521_v8 }
 0x76f   :  { %v4373_v9 = vpop.eup %4372  ;;  %v2564_v60 = vpop.f32.mrf.mxu3 }
 0x770   :  { %v3391_v34 = vmul.f32 0.6931472, %v4373_v9  ;;  %v2870_v59 = vadd.f32 %v2869_v52, %v2564_v60  ;;  %v3263_v61 = vpop.xlane.xlu1 %3262  ;;  %v7147_v29 = vpop.xlane.xlu2 %3022 }
 0x771   :  { %4374 = vlog2.f32 %v3263_v61 }
 0x772   :  { %v3474_v55 = vadd.f32 %v3391_v34, %v6889_v23  ;;  %v7151_v3 = vadd.f32 %v6979_v42, %v2870_v59  ;;  %v3180_v23 = vmul.f32 1.442695, %v3105_v15 }
 0x774   :  { %v3522_v17 = vsub.f32 %v6680_v54, %v3474_v55  ;;  %v3066_v4 = vsel %vm2933_vm2, %v7151_v3, -inf  ;;  %v3106_v54 = vsub.f32 %v6909_v14, %v7134_v27 }
 0x775   :  { %3067 = vmax.xlane.f32.xlu2 %v3066_v4 }
 0x776   :  { %3570 = vst.msk [vmem:[%s7492_s8 + $0x60] sm:$0xff] %vm2933_vm2, %v3522_v17  ;;  %v2875_v17 = vpop.f32.mrf.mxu0  ;;  %v3182_v4 = vmul.f32 1.442695, %v3106_v54 }
 0x777   :  { %v4375_v52 = vpop.eup %4374  ;;  %v2567_v8 = vpop.f32.mrf.mxu3 }
 0x778   :  { %v3393_v12 = vmul.f32 0.6931472, %v4375_v52  ;;  %v2873_v9 = vadd.f32 %v2872_v30, %v2567_v8  ;;  %v3266_v60 = vpop.xlane.xlu2 %3265  ;;  %v7162_v34 = vpop.xlane.xlu0 %3025 }
 0x779   :  { %4376 = vlog2.f32 %v3266_v60  ;;  %v3108_v55 = vsub.f32 %v6939_v45, %v7162_v34 }
 0x77a   :  { %v3475_v59 = vadd.f32 %v3393_v12, %v6904_v39  ;;  %v7168_v61 = vadd.f32 %v6979_v42, %v2873_v9  ;;  %4378 = vpow2.f32 %v3180_v23 }
 0x77b   :  { %v3186_v52 = vmul.f32 1.442695, %v3108_v55 }
 0x77c   :  { %v3523_v15 = vsub.f32 %v6691_v5, %v3475_v59  ;;  %v3069_v30 = vsel %vm2933_vm2, %v7168_v61, -inf  ;;  %v3107_v59 = vsub.f32 %v6924_v51, %v7147_v29 }
 0x77d   :  { %3070 = vmax.xlane.f32.xlu0 %v3069_v30 }
 0x77e   :  { %3571 = vst.msk [vmem:[%s7492_s8 + $0x68] sm:$0xff] %vm2933_vm2, %v3523_v15 }
 0x77f   :  { %v4377_v39 = vpop.eup %4376  ;;  %v2570_v8 = vpop.f32.mrf.mxu3 }
 0x780   :  { %v3395_v23 = vmul.f32 0.6931472, %v4377_v39  ;;  %v2876_v12 = vadd.f32 %v2875_v17, %v2570_v8  ;;  %v3269_v9 = vpop.xlane.xlu0 %3268  ;;  %v7179_v60 = vpop.xlane.xlu1 %3028 }
 0x781   :  { %v4379_v5 = vpop.eup %4378  ;;  %4380 = vlog2.f32 %v3269_v9  ;;  %v3109_v55 = vsub.f32 %v6950_v24, %v7179_v60 }
 0x782   :  { %4382 = vpow2.f32 %v3182_v4  ;;  %v3476_v54 = vadd.f32 %v3395_v23, %v6919_v33  ;;  %v7185_v30 = vadd.f32 %v6979_v42, %v2876_v12  ;;  %v3303_v17 = vsel %vm2933_vm2, %v4379_v5, 0.0 }
 0x783   :  { %4384 = vpow2.f32 %v3186_v52  ;;  %v3184_v4 = vmul.f32 1.442695, %v3107_v59  ;;  %v2878_v52 = vpop.f32.mrf.mxu0  ;;  %v3188_v8 = vmul.f32 1.442695, %v3109_v55 }
 0x784   :  { %v3524_v15 = vsub.f32 %v6701_v37, %v3476_v54  ;;  %v3072_v39 = vsel %vm2933_vm2, %v7185_v30, -inf }
 0x785   :  { %3304 = vadd.xlane.f32.xlu0 %v3303_v17  ;;  %3073 = vmax.xlane.f32.xlu1 %v3072_v39 }
 0x786   :  { %3572 = vst.msk [vmem:[%s7492_s8 + $0x70] sm:$0xff] %vm2933_vm2, %v3524_v15 }
 0x787   :  { %v4381_v33 = vpop.eup %4380  ;;  %v2573_v23 = vpop.f32.mrf.mxu3 }
 0x788   :  { %v4383_v12 = vpop.eup %4382  ;;  %v3397_v9 = vmul.f32 0.6931472, %v4381_v33  ;;  %v2879_v37 = vadd.f32 %v2878_v52, %v2573_v23  ;;  %v3272_v54 = vpop.xlane.xlu1 %3271 }
 0x789   :  { %v7197_v5 = vpop.xlane.xlu2 %3031  ;;  %v4385_v51 = vpop.eup %4384  ;;  %4386 = vlog2.f32 %v3272_v54  ;;  %v3306_v15 = vsel %vm2933_vm2, %v4383_v12, 0.0  ;;  %v7962_v54 = vld [vmem:[#allocation8_spill] sm:$0xff] }
 0x78a   :  { %4388 = vpow2.f32 %v3184_v4  ;;  %v3477_v59 = vadd.f32 %v3397_v9, %v6934_v43  ;;  %v7201_v17 = vadd.f32 %v6979_v42, %v2879_v37  ;;  %v3110_v39 = vsub.f32 %v6961_v6, %v7197_v5 }
 0x78b   :  { %4390 = vpow2.f32 %v3188_v8  ;;  %v3312_v33 = vsel %vm2933_vm2, %v4385_v51, 0.0 }
 0x78c   :  { %v3525_v55 = vsub.f32 %v6715_v62, %v3477_v59  ;;  %v3075_v52 = vsel %vm2933_vm2, %v7201_v17, -inf  ;;  %v3190_v62 = vmul.f32 1.442695, %v3110_v39 }
 0x78d   :  { %3313 = vadd.xlane.f32.xlu0 %v3312_v33  ;;  %3307 = vadd.xlane.f32.xlu1 %v3306_v15 }
 0x78e   :  { %3573 = vst.msk [vmem:[%s7492_s8 + $0x78] sm:$0xff] %vm2933_vm2, %v3525_v55  ;;  %3076 = vmax.xlane.f32.xlu2 %v3075_v52 }
 0x78f   :  { %v4387_v43 = vpop.eup %4386 }
 0x790   :  { %v4389_v42 = vpop.eup %4388  ;;  %v3399_v4 = vmul.f32 0.6931472, %v4387_v43  ;;  %v7214_v23 = vpop.xlane.xlu0 %3034 }
 0x791   :  { %v3275_v8 = vpop.xlane.xlu2 %3274  ;;  %v4391_v12 = vpop.eup %4390  ;;  %v3111_v51 = vsub.f32 %v6982_v36, %v7214_v23  ;;  %v3309_v55 = vsel %vm2933_vm2, %v4389_v42, 0.0 }
 0x792   :  { %4392 = vlog2.f32 %v3275_v8  ;;  %v3478_v9 = vadd.f32 %v3399_v4, %v6945_v31  ;;  %v3315_v15 = vsel %vm2933_vm2, %v4391_v12, 0.0 }
 0x793   :  { %v3192_v37 = vmul.f32 1.442695, %v3111_v51  ;;  %4394 = vpow2.f32 %v3190_v62 }
 0x794   :  { %v3526_v59 = vsub.f32 %v7962_v54, %v3478_v9 }
 0x795   :  { %4396 = vpow2.f32 %v3192_v37  ;;  %3316 = vadd.xlane.f32.xlu1 %v3315_v15 }
 0x796   :  { %3574 = vst.msk [vmem:[%s7492_s8 + $0x80] sm:$0xff] %vm2933_vm2, %v3526_v59  ;;  %3310 = vadd.xlane.f32.xlu2 %v3309_v55 }
 0x798   :  { %v4393_v39 = vpop.eup %4392  ;;  %v3278_v52 = vpop.xlane.xlu0 %3277 }
 0x799   :  { %v3401_v33 = vmul.f32 0.6931472, %v4393_v39  ;;  %v7226_v31 = vpop.xlane.xlu1 %3037  ;;  %4398 = vlog2.f32 %v3278_v52  ;;  %v4395_v4 = vpop.eup %4394 }
 0x79a   :  { %v3112_v43 = vsub.f32 %v6998_v7, %v7226_v31  ;;  %v3318_v9 = vsel %vm2933_vm2, %v4395_v4, 0.0 }
 0x79b   :  { %v3479_v62 = vadd.f32 %v3401_v33, %v6955_v22  ;;  %v4397_v8 = vpop.eup %4396 }
 0x79c   :  { %v3194_v42 = vmul.f32 1.442695, %v3112_v43  ;;  %v3321_v51 = vsel %vm2933_vm2, %v4397_v8, 0.0 }
 0x79d   :  { %v3527_v12 = vsub.f32 %v6744_v49, %v3479_v62  ;;  %3322 = vadd.xlane.f32.xlu0 %v3321_v51 }
 0x79e   :  { %4400 = vpow2.f32 %v3194_v42  ;;  %3319 = vadd.xlane.f32.xlu2 %v3318_v9 }
 0x79f   :  { %3575 = vst.msk [vmem:[%s7492_s8 + $0x88] sm:$0xff] %vm2933_vm2, %v3527_v12  ;;  %v4399_v37 = vpop.eup %4398 }
 0x7a0   :  { %v3403_v54 = vmul.f32 0.6931472, %v4399_v37  ;;  %v7238_v22 = vpop.xlane.xlu2 %3040 }
 0x7a1   :  { %v3281_v59 = vpop.xlane.xlu1 %3280  ;;  %v3113_v49 = vsub.f32 %v7014_v10, %v7238_v22 }
 0x7a2   :  { %4402 = vlog2.f32 %v3281_v59  ;;  %v3480_v15 = vadd.f32 %v3403_v54, %v6971_v1 }
 0x7a3   :  { %v3196_v39 = vmul.f32 1.442695, %v3113_v49 }
 0x7a4   :  { %v4401_v55 = vpop.eup %4400  ;;  %v3528_v33 = vsub.f32 %v6759_v19, %v3480_v15 }
 0x7a5   :  { %v3324_v52 = vsel %vm2933_vm2, %v4401_v55, 0.0  ;;  %4404 = vpow2.f32 %v3196_v39 }
 0x7a6   :  { %3325 = vadd.xlane.f32.xlu1 %v3324_v52  ;;  %3576 = vst.msk [vmem:[%s7492_s8 + $0x90] sm:$0xff] %vm2933_vm2, %v3528_v33 }
 0x7a8   :  { %v4403_v43 = vpop.eup %4402  ;;  %v3284_v62 = vpop.xlane.xlu2 %3283 }
 0x7a9   :  { %v3405_v4 = vmul.f32 0.6931472, %v4403_v43  ;;  %v7249_v8 = vpop.xlane.xlu0 %3043  ;;  %4406 = vlog2.f32 %v3284_v62 }
 0x7aa   :  { %v3114_v1 = vsub.f32 %v7030_v0, %v7249_v8 }
 0x7ab   :  { %v3481_v19 = vadd.f32 %v3405_v4, %v6992_v18  ;;  %v4405_v42 = vpop.eup %4404 }
 0x7ac   :  { %v3198_v12 = vmul.f32 1.442695, %v3114_v1  ;;  %v3327_v9 = vsel %vm2933_vm2, %v4405_v42, 0.0 }
 0x7ad   :  { %v3529_v51 = vsub.f32 %v6774_v16, %v3481_v19  ;;  %3328 = vadd.xlane.f32.xlu2 %v3327_v9 }
 0x7ae   :  { %4408 = vpow2.f32 %v3198_v12 }
 0x7af   :  { %3577 = vst.msk [vmem:[%s7492_s8 + $0x98] sm:$0xff] %vm2933_vm2, %v3529_v51  ;;  %v4407_v37 = vpop.eup %4406 }
 0x7b0   :  { %v3407_v54 = vmul.f32 0.6931472, %v4407_v37  ;;  %v7260_v49 = vpop.xlane.xlu1 %3046 }
 0x7b1   :  { %v3287_v59 = vpop.xlane.xlu0 %3286  ;;  %v3115_v18 = vsub.f32 %v7046_v63, %v7260_v49 }
 0x7b2   :  { %4410 = vlog2.f32 %v3287_v59  ;;  %v3482_v16 = vadd.f32 %v3407_v54, %v7008_v35 }
 0x7b3   :  { %v3200_v55 = vmul.f32 1.442695, %v3115_v18 }
 0x7b4   :  { %v4409_v15 = vpop.eup %4408  ;;  %v3530_v39 = vsub.f32 %v6789_v2, %v3482_v16 }
 0x7b5   :  { %v3330_v33 = vsel %vm2933_vm2, %v4409_v15, 0.0  ;;  %4412 = vpow2.f32 %v3200_v55 }
 0x7b6   :  { %3331 = vadd.xlane.f32.xlu0 %v3330_v33  ;;  %3578 = vst.msk [vmem:[%s7492_s8 + $0xa0] sm:$0xff] %vm2933_vm2, %v3530_v39 }
 0x7b8   :  { %v4411_v52 = vpop.eup %4410  ;;  %v3290_v4 = vpop.xlane.xlu1 %3289 }
 0x7b9   :  { %v3409_v43 = vmul.f32 0.6931472, %v4411_v52  ;;  %v7271_v62 = vpop.xlane.xlu2 %3049  ;;  %4414 = vlog2.f32 %v3290_v4 }
 0x7ba   :  { %v3116_v35 = vsub.f32 %v7062_v46, %v7271_v62 }
 0x7bb   :  { %v3483_v2 = vadd.f32 %v3409_v43, %v7024_v11  ;;  %v4413_v1 = vpop.eup %4412 }
 0x7bc   :  { %v3202_v19 = vmul.f32 1.442695, %v3116_v35  ;;  %v3333_v12 = vsel %vm2933_vm2, %v4413_v1, 0.0 }
 0x7bd   :  { %v3531_v42 = vsub.f32 %v6804_v20, %v3483_v2  ;;  %3334 = vadd.xlane.f32.xlu1 %v3333_v12 }
 0x7be   :  { %4416 = vpow2.f32 %v3202_v19 }
 0x7bf   :  { %3579 = vst.msk [vmem:[%s7492_s8 + $0xa8] sm:$0xff] %vm2933_vm2, %v3531_v42  ;;  %v4415_v51 = vpop.eup %4414 }
 0x7c0   :  { %v3411_v9 = vmul.f32 0.6931472, %v4415_v51  ;;  %v7282_v54 = vpop.xlane.xlu0 %3052 }
 0x7c1   :  { %v3293_v37 = vpop.xlane.xlu2 %3292  ;;  %v3117_v11 = vsub.f32 %v7078_v56, %v7282_v54 }
 0x7c2   :  { %4418 = vlog2.f32 %v3293_v37  ;;  %v3484_v20 = vadd.f32 %v3411_v9, %v7040_v57 }
 0x7c3   :  { %v3204_v18 = vmul.f32 1.442695, %v3117_v11 }
 0x7c4   :  { %v4417_v59 = vpop.eup %4416  ;;  %v3532_v16 = vsub.f32 %v6819_v58, %v3484_v20 }
 0x7c5   :  { %v3336_v15 = vsel %vm2933_vm2, %v4417_v59, 0.0  ;;  %4420 = vpow2.f32 %v3204_v18 }
 0x7c6   :  { %3337 = vadd.xlane.f32.xlu2 %v3336_v15  ;;  %3580 = vst.msk [vmem:[%s7492_s8 + $0xb0] sm:$0xff] %vm2933_vm2, %v3532_v16 }
 0x7c8   :  { %v4419_v55 = vpop.eup %4418  ;;  %v3296_v33 = vpop.xlane.xlu0 %3295 }
 0x7c9   :  { %v3413_v39 = vmul.f32 0.6931472, %v4419_v55  ;;  %v7293_v52 = vpop.xlane.xlu1 %3055  ;;  %4422 = vlog2.f32 %v3296_v33 }
 0x7ca   :  { %v3118_v57 = vsub.f32 %v7094_v47, %v7293_v52 }
 0x7cb   :  { %v3485_v58 = vadd.f32 %v3413_v39, %v7056_v13  ;;  %v4421_v43 = vpop.eup %4420 }
 0x7cc   :  { %v3206_v4 = vmul.f32 1.442695, %v3118_v57  ;;  %v3339_v2 = vsel %vm2933_vm2, %v4421_v43, 0.0 }
 0x7cd   :  { %v3533_v35 = vsub.f32 %v6834_v48, %v3485_v58  ;;  %3340 = vadd.xlane.f32.xlu0 %v3339_v2 }
 0x7ce   :  { %4424 = vpow2.f32 %v3206_v4 }
 0x7cf   :  { %3581 = vst.msk [vmem:[%s7492_s8 + $0xb8] sm:$0xff] %vm2933_vm2, %v3533_v35  ;;  %v4423_v1 = vpop.eup %4422 }
 0x7d0   :  { %v3415_v19 = vmul.f32 0.6931472, %v4423_v1  ;;  %v7304_v12 = vpop.xlane.xlu2 %3058 }
 0x7d1   :  { %v3299_v42 = vpop.xlane.xlu1 %3298  ;;  %v3119_v13 = vsub.f32 %v7110_v25, %v7304_v12 }
 0x7d2   :  { %4426 = vlog2.f32 %v3299_v42  ;;  %v3486_v48 = vadd.f32 %v3415_v19, %v7072_v21 }
 0x7d3   :  { %v3208_v9 = vmul.f32 1.442695, %v3119_v13 }
 0x7d4   :  { %v4425_v51 = vpop.eup %4424  ;;  %v3534_v37 = vsub.f32 %v6849_v32, %v3486_v48 }
 0x7d5   :  { %v3342_v11 = vsel %vm2933_vm2, %v4425_v51, 0.0  ;;  %4428 = vpow2.f32 %v3208_v9 }
 0x7d6   :  { %3343 = vadd.xlane.f32.xlu1 %v3342_v11  ;;  %3582 = vst.msk [vmem:[%s7492_s8 + $0xc0] sm:$0xff] %vm2933_vm2, %v3534_v37 }
 0x7d8   :  { %v4427_v20 = vpop.eup %4426  ;;  %v3302_v18 = vpop.xlane.xlu2 %3301 }
 0x7d9   :  { %v3417_v59 = vmul.f32 0.6931472, %v4427_v20  ;;  %v7315_v16 = vpop.xlane.xlu0 %3061  ;;  %4430 = vlog2.f32 %v3302_v18 }
 0x7da   :  { %v3120_v21 = vsub.f32 %v7124_v50, %v7315_v16 }
 0x7db   :  { %v3487_v32 = vadd.f32 %v3417_v59, %v7088_v53  ;;  %v4429_v15 = vpop.eup %4428 }
 0x7dc   :  { %v3210_v55 = vmul.f32 1.442695, %v3120_v21  ;;  %v3345_v33 = vsel %vm2933_vm2, %v4429_v15, 0.0 }
 0x7dd   :  { %v3535_v39 = vsub.f32 %v6864_v44, %v3487_v32  ;;  %3346 = vadd.xlane.f32.xlu2 %v3345_v33 }
 0x7de   :  { %4432 = vpow2.f32 %v3210_v55 }
 0x7df   :  { %3583 = vst.msk [vmem:[%s7492_s8 + $0xc8] sm:$0xff] %vm2933_vm2, %v3535_v39  ;;  %v4431_v57 = vpop.eup %4430 }
 0x7e0   :  { %v3419_v58 = vmul.f32 0.6931472, %v4431_v57  ;;  %v7326_v43 = vpop.xlane.xlu1 %3064 }
 0x7e1   :  { %v3121_v53 = vsub.f32 %v7138_v26, %v7326_v43 }
 0x7e2   :  { %v3488_v4 = vadd.f32 %v3419_v58, %v7104_v41 }
 0x7e3   :  { %v3212_v44 = vmul.f32 1.442695, %v3121_v53 }
 0x7e4   :  { %v4433_v35 = vpop.eup %4432  ;;  %v3536_v2 = vsub.f32 %v6879_v28, %v3488_v4 }
 0x7e5   :  { %v3348_v1 = vsel %vm2933_vm2, %v4433_v35, 0.0  ;;  %4434 = vpow2.f32 %v3212_v44 }
 0x7e6   :  { %3349 = vadd.xlane.f32.xlu0 %v3348_v1  ;;  %3584 = vst.msk [vmem:[%s7492_s8 + $0xd0] sm:$0xff] %vm2933_vm2, %v3536_v2 }
 0x7e8   :  { %v7337_v19 = vpop.xlane.xlu2 %3067 }
 0x7e9   :  { %v3122_v42 = vsub.f32 %v7151_v3, %v7337_v19 }
 0x7eb   :  { %v4435_v13 = vpop.eup %4434  ;;  %v3214_v41 = vmul.f32 1.442695, %v3122_v42 }
 0x7ec   :  { %v3351_v48 = vsel %vm2933_vm2, %v4435_v13, 0.0 }
 0x7ed   :  { %4436 = vpow2.f32 %v3214_v41  ;;  %3352 = vadd.xlane.f32.xlu1 %v3351_v48 }
 0x7f0   :  { %v7342_v28 = vpop.xlane.xlu0 %3070 }
 0x7f1   :  { %v3123_v51 = vsub.f32 %v7168_v61, %v7342_v28 }
 0x7f3   :  { %v4437_v9 = vpop.eup %4436  ;;  %v3216_v37 = vmul.f32 1.442695, %v3123_v51 }
 0x7f4   :  { %v3354_v11 = vsel %vm2933_vm2, %v4437_v9, 0.0 }
 0x7f5   :  { %4438 = vpow2.f32 %v3216_v37  ;;  %3355 = vadd.xlane.f32.xlu2 %v3354_v11 }
 0x7f8   :  { %v3305_v20 = vpop.xlane.xlu0 %3304  ;;  %v7347_v59 = vpop.xlane.xlu1 %3073 }
 0x7f9   :  { %4440 = vlog2.f32 %v3305_v20  ;;  %v3124_v18 = vsub.f32 %v7185_v30, %v7347_v59 }
 0x7fb   :  { %v4439_v21 = vpop.eup %4438  ;;  %v3218_v32 = vmul.f32 1.442695, %v3124_v18 }
 0x7fc   :  { %v3357_v15 = vsel %vm2933_vm2, %v4439_v21, 0.0 }
 0x7fd   :  { %4442 = vpow2.f32 %v3218_v32  ;;  %3358 = vadd.xlane.f32.xlu0 %v3357_v15 }
 0x7ff   :  { %v4441_v55 = vpop.eup %4440 }
 0x800   :  { %v3421_v39 = vmul.f32 0.6931472, %v4441_v55  ;;  %v3314_v33 = vpop.xlane.xlu0 %3313  ;;  %v3308_v57 = vpop.xlane.xlu1 %3307 }
 0x801   :  { %4444 = vlog2.f32 %v3314_v33  ;;  %v7352_v58 = vpop.xlane.xlu2 %3076  ;;  %v7963_v33 = vld [vmem:[#allocation65_spill] sm:$0xff] }
 0x802   :  { %v3489_v53 = vadd.f32 %v3421_v39, %v7120_v38  ;;  %4446 = vlog2.f32 %v3308_v57  ;;  %v3125_v4 = vsub.f32 %v7201_v17, %v7352_v58 }
 0x803   :  { %v4443_v35 = vpop.eup %4442 }
 0x804   :  { %v3537_v44 = vsub.f32 %v6894_v40, %v3489_v53  ;;  %v3220_v2 = vmul.f32 1.442695, %v3125_v4  ;;  %v3360_v1 = vsel %vm2933_vm2, %v4443_v35, 0.0 }
 0x805   :  { %3361 = vadd.xlane.f32.xlu1 %v3360_v1 }
 0x806   :  { %3585 = vst.msk [vmem:[%s7492_s8 + $0xd8] sm:$0xff] %vm2933_vm2, %v3537_v44  ;;  %4448 = vpow2.f32 %v3220_v2 }
 0x807   :  { %v4445_v42 = vpop.eup %4444 }
 0x808   :  { %v4447_v13 = vpop.eup %4446  ;;  %v3427_v38 = vmul.f32 0.6931472, %v4445_v42  ;;  %v3317_v41 = vpop.xlane.xlu1 %3316 }
 0x809   :  { %v3423_v48 = vmul.f32 0.6931472, %v4447_v13  ;;  %4450 = vlog2.f32 %v3317_v41  ;;  %v3311_v51 = vpop.xlane.xlu2 %3310 }
 0x80a   :  { %v3492_v9 = vadd.f32 %v3427_v38, %v7162_v34  ;;  %4452 = vlog2.f32 %v3311_v51 }
 0x80b   :  { %v3490_v40 = vadd.f32 %v3423_v48, %v7134_v27 }
 0x80c   :  { %v4449_v37 = vpop.eup %4448  ;;  %v3540_v11 = vsub.f32 %v6939_v45, %v3492_v9 }
 0x80d   :  { %v3538_v20 = vsub.f32 %v6909_v14, %v3490_v40  ;;  %v3363_v18 = vsel %vm2933_vm2, %v4449_v37, 0.0 }
 0x80e   :  { %3588 = vst.msk [vmem:[%s7492_s8 + $0xf0] sm:$0xff] %vm2933_vm2, %v3540_v11  ;;  %3364 = vadd.xlane.f32.xlu2 %v3363_v18 }
 0x80f   :  { %v4451_v21 = vpop.eup %4450  ;;  %3586 = vst.msk [vmem:[%s7492_s8 + $0xe0] sm:$0xff] %vm2933_vm2, %v3538_v20 }
 0x810   :  { %v4453_v27 = vpop.eup %4452  ;;  %v3429_v34 = vmul.f32 0.6931472, %v4451_v21  ;;  %v3323_v32 = vpop.xlane.xlu0 %3322 }
 0x811   :  { %v3425_v45 = vmul.f32 0.6931472, %v4453_v27  ;;  %4454 = vlog2.f32 %v3323_v32  ;;  %v3320_v14 = vpop.xlane.xlu2 %3319 }
 0x812   :  { %v3493_v15 = vadd.f32 %v3429_v34, %v7179_v60  ;;  %4456 = vlog2.f32 %v3320_v14 }
 0x813   :  { %v3491_v55 = vadd.f32 %v3425_v45, %v7147_v29 }
 0x814   :  { %v3541_v39 = vsub.f32 %v6950_v24, %v3493_v15 }
 0x815   :  { %v3539_v57 = vsub.f32 %v7963_v33, %v3491_v55 }
 0x816   :  { %3589 = vst.msk [vmem:[%s7492_s8 + $0xf8] sm:$0xff] %vm2933_vm2, %v3541_v39 }
 0x817   :  { %v4455_v53 = vpop.eup %4454  ;;  %3587 = vst.msk [vmem:[%s7492_s8 + $0xe8] sm:$0xff] %vm2933_vm2, %v3539_v57 }
 0x818   :  { %v4457_v4 = vpop.eup %4456  ;;  %v3433_v60 = vmul.f32 0.6931472, %v4455_v53 }
 0x819   :  { %v3326_v35 = vpop.xlane.xlu1 %3325  ;;  %v3431_v44 = vmul.f32 0.6931472, %v4457_v4 }
 0x81a   :  { %4458 = vlog2.f32 %v3326_v35  ;;  %v3495_v24 = vadd.f32 %v3433_v60, %v7214_v23 }
 0x81b   :  { %v3494_v29 = vadd.f32 %v3431_v44, %v7197_v5 }
 0x81c   :  { %v3543_v2 = vsub.f32 %v6982_v36, %v3495_v24 }
 0x81d   :  { %v3542_v1 = vsub.f32 %v6961_v6, %v3494_v29 }
 0x81e   :  { %3591 = vst.msk [vmem:[%s7492_s8 + $0x108] sm:$0xff] %vm2933_vm2, %v3543_v2 }
 0x81f   :  { %3590 = vst.msk [vmem:[%s7492_s8 + $0x100] sm:$0xff] %vm2933_vm2, %v3542_v1 }
 0x820   :  { %v4459_v42 = vpop.eup %4458  ;;  %v3329_v38 = vpop.xlane.xlu2 %3328 }
 0x821   :  { %v3435_v13 = vmul.f32 0.6931472, %v4459_v42  ;;  %4460 = vlog2.f32 %v3329_v38 }
 0x823   :  { %v3496_v5 = vadd.f32 %v3435_v13, %v7226_v31 }
 0x825   :  { %v3544_v36 = vsub.f32 %v6998_v7, %v3496_v5 }
 0x827   :  { %3592 = vst.msk [vmem:[%s7492_s8 + $0x110] sm:$0xff] %vm2933_vm2, %v3544_v36  ;;  %v4461_v6 = vpop.eup %4460 }
 0x828   :  { %v3437_v23 = vmul.f32 0.6931472, %v4461_v6 }
 0x829   :  { %v3332_v41 = vpop.xlane.xlu0 %3331 }
 0x82a   :  { %4462 = vlog2.f32 %v3332_v41  ;;  %v3497_v48 = vadd.f32 %v3437_v23, %v7238_v22 }
 0x82c   :  { %v3545_v51 = vsub.f32 %v7014_v10, %v3497_v48 }
 0x82e   :  { %3593 = vst.msk [vmem:[%s7492_s8 + $0x118] sm:$0xff] %vm2933_vm2, %v3545_v51 }
 0x830   :  { %v4463_v31 = vpop.eup %4462  ;;  %v3335_v9 = vpop.xlane.xlu1 %3334 }
 0x831   :  { %v3439_v7 = vmul.f32 0.6931472, %v4463_v31  ;;  %4464 = vlog2.f32 %v3335_v9 }
 0x833   :  { %v3498_v40 = vadd.f32 %v3439_v7, %v7249_v8 }
 0x835   :  { %v3546_v37 = vsub.f32 %v7030_v0, %v3498_v40 }
 0x837   :  { %3594 = vst.msk [vmem:[%s7492_s8 + $0x120] sm:$0xff] %vm2933_vm2, %v3546_v37  ;;  %v4465_v22 = vpop.eup %4464 }
 0x838   :  { %v3441_v10 = vmul.f32 0.6931472, %v4465_v22 }
 0x839   :  { %v3338_v11 = vpop.xlane.xlu2 %3337 }
 0x83a   :  { %4466 = vlog2.f32 %v3338_v11  ;;  %v3499_v20 = vadd.f32 %v3441_v10, %v7260_v49 }
 0x83c   :  { %v3547_v18 = vsub.f32 %v7046_v63, %v3499_v20 }
 0x83e   :  { %3595 = vst.msk [vmem:[%s7492_s8 + $0x128] sm:$0xff] %vm2933_vm2, %v3547_v18 }
 0x840   :  { %v4467_v8 = vpop.eup %4466  ;;  %v3341_v21 = vpop.xlane.xlu0 %3340 }
 0x841   :  { %v3443_v0 = vmul.f32 0.6931472, %v4467_v8  ;;  %4468 = vlog2.f32 %v3341_v21 }
 0x843   :  { %v3500_v27 = vadd.f32 %v3443_v0, %v7271_v62 }
 0x845   :  { %v3548_v34 = vsub.f32 %v7062_v46, %v3500_v27 }
 0x847   :  { %3596 = vst.msk [vmem:[%s7492_s8 + $0x130] sm:$0xff] %vm2933_vm2, %v3548_v34  ;;  %v4469_v49 = vpop.eup %4468 }
 0x848   :  { %v3445_v63 = vmul.f32 0.6931472, %v4469_v49 }
 0x849   :  { %v3344_v32 = vpop.xlane.xlu1 %3343 }
 0x84a   :  { %4470 = vlog2.f32 %v3344_v32  ;;  %v3501_v45 = vadd.f32 %v3445_v63, %v7282_v54 }
 0x84c   :  { %v3549_v14 = vsub.f32 %v7078_v56, %v3501_v45 }
 0x84e   :  { %3597 = vst.msk [vmem:[%s7492_s8 + $0x138] sm:$0xff] %vm2933_vm2, %v3549_v14 }
 0x850   :  { %v4471_v62 = vpop.eup %4470  ;;  %v3347_v15 = vpop.xlane.xlu2 %3346 }
 0x851   :  { %v3447_v46 = vmul.f32 0.6931472, %v4471_v62  ;;  %4472 = vlog2.f32 %v3347_v15 }
 0x853   :  { %v3502_v55 = vadd.f32 %v3447_v46, %v7293_v52 }
 0x855   :  { %v3550_v39 = vsub.f32 %v7094_v47, %v3502_v55 }
 0x857   :  { %3598 = vst.msk [vmem:[%s7492_s8 + $0x140] sm:$0xff] %vm2933_vm2, %v3550_v39  ;;  %v4473_v54 = vpop.eup %4472 }
 0x858   :  { %v3449_v56 = vmul.f32 0.6931472, %v4473_v54 }
 0x859   :  { %v3350_v33 = vpop.xlane.xlu0 %3349 }
 0x85a   :  { %4474 = vlog2.f32 %v3350_v33  ;;  %v3503_v57 = vadd.f32 %v3449_v56, %v7304_v12 }
 0x85c   :  { %v3551_v53 = vsub.f32 %v7110_v25, %v3503_v57 }
 0x85e   :  { %3599 = vst.msk [vmem:[%s7492_s8 + $0x148] sm:$0xff] %vm2933_vm2, %v3551_v53 }
 0x860   :  { %v4475_v52 = vpop.eup %4474  ;;  %v3353_v4 = vpop.xlane.xlu1 %3352 }
 0x861   :  { %v3451_v47 = vmul.f32 0.6931472, %v4475_v52  ;;  %4476 = vlog2.f32 %v3353_v4 }
 0x863   :  { %v3504_v60 = vadd.f32 %v3451_v47, %v7315_v16 }
 0x865   :  { %v3552_v35 = vsub.f32 %v7124_v50, %v3504_v60 }
 0x867   :  { %3600 = vst.msk [vmem:[%s7492_s8 + $0x150] sm:$0xff] %vm2933_vm2, %v3552_v35  ;;  %v4477_v12 = vpop.eup %4476 }
 0x868   :  { %v3453_v25 = vmul.f32 0.6931472, %v4477_v12  ;;  %v3356_v44 = vpop.xlane.xlu2 %3355 }
 0x869   :  { %4478 = vlog2.f32 %v3356_v44 }
 0x86a   :  { %v3505_v24 = vadd.f32 %v3453_v25, %v7326_v43 }
 0x86c   :  { %v3553_v29 = vsub.f32 %v7138_v26, %v3505_v24 }
 0x86e   :  { %3601 = vst.msk [vmem:[%s7492_s8 + $0x158] sm:$0xff] %vm2933_vm2, %v3553_v29 }
 0x86f   :  { %v4479_v16 = vpop.eup %4478 }
 0x870   :  { %v3455_v50 = vmul.f32 0.6931472, %v4479_v16  ;;  %v3359_v2 = vpop.xlane.xlu0 %3358 }
 0x871   :  { %4480 = vlog2.f32 %v3359_v2 }
 0x872   :  { %v3506_v1 = vadd.f32 %v3455_v50, %v7337_v19 }
 0x874   :  { %v3554_v42 = vsub.f32 %v7151_v3, %v3506_v1 }
 0x876   :  { %3602 = vst.msk [vmem:[%s7492_s8 + $0x160] sm:$0xff] %vm2933_vm2, %v3554_v42 }
 0x877   :  { %v4481_v43 = vpop.eup %4480 }
 0x878   :  { %v3457_v26 = vmul.f32 0.6931472, %v4481_v43  ;;  %v3362_v13 = vpop.xlane.xlu1 %3361 }
 0x879   :  { %4482 = vlog2.f32 %v3362_v13 }
 0x87a   :  { %v3507_v38 = vadd.f32 %v3457_v26, %v7342_v28 }
 0x87c   :  { %v3555_v5 = vsub.f32 %v7168_v61, %v3507_v38 }
 0x87e   :  { %3603 = vst.msk [vmem:[%s7492_s8 + $0x168] sm:$0xff] %vm2933_vm2, %v3555_v5 }
 0x87f   :  { %v4483_v19 = vpop.eup %4482 }
 0x880   :  { %v3459_v3 = vmul.f32 0.6931472, %v4483_v19 }
 0x881   :  { %v3365_v36 = vpop.xlane.xlu2 %3364 }
 0x882   :  { %v3508_v6 = vadd.f32 %v3459_v3, %v7347_v59  ;;  %4484 = vlog2.f32 %v3365_v36 }
 0x884   :  { %v3556_v23 = vsub.f32 %v7185_v30, %v3508_v6 }
 0x886   :  { %3604 = vst.msk [vmem:[%s7492_s8 + $0x170] sm:$0xff] %vm2933_vm2, %v3556_v23 }
 0x888   :  { %v4485_v28 = vpop.eup %4484 }
 0x889   :  { %v3461_v61 = vmul.f32 0.6931472, %v4485_v28 }
 0x88b   :  { %v3509_v41 = vadd.f32 %v3461_v61, %v7352_v58 }
 0x88d   :  { %v3557_v48 = vsub.f32 %v7201_v17, %v3509_v41 }
 0x88f   :  { %3605 = vst.msk [vmem:[%s7492_s8 + $0x178] sm:$0xff] %vm2933_vm2, %v3557_v48 }

</bundles_post_ra>
